<compile_context>
chip_gen: v7x
topology: tpu7x:2x2x1
jax: 0.10.0
libtpu: 0.0.40
codegen_flags: <defaults>
</compile_context>

<pallas_src>
import functools
import math

import jax
import jax.numpy as jnp
from jax.experimental import pallas as pl
from jax.experimental.pallas import tpu as pltpu


# ---------------------------------------------------------------------------
# Fused 3x3 conv (padding=1, stride=1) + bias + BatchNorm partial statistics
# ---------------------------------------------------------------------------

def _conv3x3_kernel(x_ref, w_ref, b_ref, o_ref, sum_ref, ssq_ref, patch_ref,
                    *, band, W, Cp):
    """x_ref:   (1, band+2, W+2, Cp)  bf16 halo-padded activation band
       w_ref:   (n_co, 9*Cp, TCO)     bf16 resident weights (all Cout blocks)
       b_ref:   (1, 1, TCO)           f32 bias for this Cout block
       o_ref:   (1, band*W, TCO)      bf16 conv output
       sum/ssq: (1, 1, TCO)           f32 per-cell BatchNorm partials
       patch_ref: (band*W, 9*Cp)      bf16 VMEM scratch (im2col patch)."""
    rows = band * W
    j = pl.program_id(2)

    # Build the im2col patch once (9 static-slice copies) so a single MXU
    # matmul carries the full 9*Cin contraction instead of 9 tiny-K matmuls.
    for t in range(9):
        dy, dx = divmod(t, 3)
        patch_ref[:, pl.ds(t * Cp, Cp)] = (
            x_ref[0, pl.ds(dy, band), pl.ds(dx, W), :].reshape(rows, Cp))

    y = jnp.dot(patch_ref[...], w_ref[j],
                preferred_element_type=jnp.float32) + b_ref[0]

    # Fused BatchNorm statistics for this (batch, band, cout-block) cell,
    # computed from the f32 accumulator before the bf16 cast.
    sum_ref[0] = jnp.sum(y, axis=0, keepdims=True)
    ssq_ref[0] = jnp.sum(y * y, axis=0, keepdims=True)

    # TODO(synk): when TCO < 128, fold rows into the lane dim of this store to
    # avoid masked vst; only the BN-apply pass is lane-densified for now.
    o_ref[0] = y.astype(o_ref.dtype)


def _pick_band(H, W, Cp, Cop, TCO, budget_bytes):
    """Largest divisor of H whose working set fits the VMEM budget (prefer
    >=2 bands so the band axis can feed both v7x TensorCores)."""
    def fits(band):
        rows = band * W
        need = (2 * ((band + 2) * (W + 2) * Cp * 2      # input  (double-buffered)
                     + rows * TCO * 2                    # output (double-buffered)
                     + 4 * TCO * 4)                      # stats outputs
                + rows * 9 * Cp * 2                      # im2col patch scratch
                + rows * TCO * 4                         # live f32 accumulator
                + 2 * 9 * Cp * Cop * 2)                  # resident weights
        return need <= budget_bytes

    ok = [d for d in range(1, H + 1)
          if H % d == 0 and (d * W) % 8 == 0 and fits(d)]
    if not ok:
        return H                      # whole image (full-dim block is legal)
    multi = [d for d in ok if H // d >= 2]
    return max(multi) if multi else max(ok)


def conv3x3_bias_stats(x, w, b, *, vmem_budget=12 << 20):
    """3x3 conv (padding=1, stride=1) + bias on NHWC `x` with PyTorch-layout
    weights, returning the bf16 output (spatially flattened) and per-grid-cell
    BatchNorm partial sums / sums-of-squares.

    x: (N, H, W, Cin); w: (Cout, Cin, 3, 3) f32; b: (Cout,) f32.
    Returns (out (N, H*W, Cop) bf16, psum (cells,1,Cop) f32, pssq (..))."""
    N, H, W, C = x.shape
    Cout = w.shape[0]

    Cp = ((C + 7) // 8) * 8                      # pad Cin (contraction) to 8
    if Cout >= 256 and Cout % 256 == 0:
        TCO = 256                                # fill v6e/v7x 256-wide MXU
    elif Cout > 128:
        TCO = 128
    else:
        TCO = Cout                               # narrow layer: no Cout padding
    n_co = pl.cdiv(Cout, TCO)
    Cop = n_co * TCO

    band = _pick_band(H, W, Cp, Cop, TCO, vmem_budget)
    nbands = H // band
    rows = band * W
    cells = N * nbands

    # Halo pad + channel pad, then restack into per-band tiles that already
    # carry their 1-row halos, so BlockSpec blocks never overlap.
    xp = jnp.pad(x.astype(jnp.bfloat16),
                 ((0, 0), (1, 1), (1, 1), (0, Cp - C)))
    if nbands == 1:
        xb = xp
    else:
        xb = jnp.stack([xp[:, h * band:h * band + band + 2]
                        for h in range(nbands)], axis=1
                       ).reshape(cells, band + 2, W + 2, Cp)

    # Weights -> (n_co, 9*Cp, TCO), tap-major rows matching the patch columns;
    # kept fully resident in VMEM (single DMA).
    wt = jnp.transpose(w, (2, 3, 1, 0)).reshape(9, C, Cout)
    wt = jnp.pad(wt, ((0, 0), (0, Cp - C), (0, Cop - Cout)))
    wt = wt.reshape(9 * Cp, n_co, TCO).transpose(1, 0, 2).astype(jnp.bfloat16)
    bias = jnp.pad(b, (0, Cop - Cout)).astype(jnp.float32).reshape(n_co, 1, TCO)

    out, psum, pssq = pl.pallas_call(
        functools.partial(_conv3x3_kernel, band=band, W=W, Cp=Cp),
        out_shape=(jax.ShapeDtypeStruct((N, H * W, Cop), jnp.bfloat16),
                   jax.ShapeDtypeStruct((cells, 1, Cop), jnp.float32),
                   jax.ShapeDtypeStruct((cells, 1, Cop), jnp.float32)),
        grid_spec=pltpu.PrefetchScalarGridSpec(
            num_scalar_prefetch=0,
            grid=(N, nbands, n_co),
            in_specs=[
                pl.BlockSpec((1, band + 2, W + 2, Cp),
                             lambda n, h, j: (n * nbands + h, 0, 0, 0)),
                pl.BlockSpec((n_co, 9 * Cp, TCO),       # resident, DMA'd once
                             lambda n, h, j: (0, 0, 0)),
                pl.BlockSpec((1, 1, TCO), lambda n, h, j: (j, 0, 0)),
            ],
            out_specs=[
                pl.BlockSpec((1, rows, TCO), lambda n, h, j: (n, h, j)),
                pl.BlockSpec((1, 1, TCO),
                             lambda n, h, j: (n * nbands + h, 0, j)),
                pl.BlockSpec((1, 1, TCO),
                             lambda n, h, j: (n * nbands + h, 0, j)),
            ],
            scratch_shapes=[pltpu.VMEM((rows, 9 * Cp), jnp.bfloat16)],
        ),
        compiler_params=pltpu.CompilerParams(
            dimension_semantics=("parallel", "parallel", "parallel"),
            vmem_limit_bytes=48 * 1024 * 1024),
    )(xb, wt, bias)
    return out, psum, pssq


# ---------------------------------------------------------------------------
# BatchNorm (training-mode batch statistics, biased variance) + ReLU
# ---------------------------------------------------------------------------

def bn_scale_shift(psum, pssq, count, gamma, beta, eps):
    """Per-channel scale/shift from conv-fused partial statistics (tiny O(C)
    XLA work).  Variance clamped >= 0 (E[x^2]-mean^2 cancellation guard)."""
    s = jnp.sum(psum, axis=0)[0]                        # (Cop,)
    q = jnp.sum(pssq, axis=0)[0]
    mean = s / count
    var = jnp.maximum(q / count - mean * mean, 0.0)
    cpad = s.shape[0] - gamma.shape[0]
    g = jnp.pad(gamma.astype(jnp.float32), (0, cpad))
    bt = jnp.pad(beta.astype(jnp.float32), (0, cpad))
    scale = g * jax.lax.rsqrt(var + eps)
    shift = bt - mean * scale
    return scale, shift


def _bn_apply_kernel(y_ref, scale_ref, shift_ref, o_ref):
    y = y_ref[...].astype(jnp.float32)
    o_ref[...] = jnp.maximum(y * scale_ref[...] + shift_ref[...],
                             0.0).astype(o_ref.dtype)


def batchnorm_relu_apply(y2d, scale, shift, *, out_dtype):
    """y*scale + shift, ReLU over a (M, C) view.  For C < 128 the array is
    folded to (M/k, k*C) with tiled scale/shift so stores are lane-dense."""
    M, C = y2d.shape
    k = 1
    if C < 128 and 128 % C == 0:
        k = 128 // C
        while k > 1 and M % k:
            k //= 2
    rows, width = M // k, k * C
    yk = y2d.reshape(rows, width)
    sc = jnp.tile(scale.astype(jnp.float32), k).reshape(1, width)
    sh = jnp.tile(shift.astype(jnp.float32), k).reshape(1, width)

    # ~2 MB per block so per-step overhead is amortized; multiple of 8 rows.
    tile = max(256, min(8192, (2 << 20) // (width * 4)))
    tile = (tile // 8) * 8
    tile = min(tile, ((rows + 7) // 8) * 8)
    n_blk = pl.cdiv(rows, tile)
    rp = n_blk * tile
    if rp != rows:
        yk = jnp.pad(yk, ((0, rp - rows), (0, 0)))

    out = pl.pallas_call(
        _bn_apply_kernel,
        out_shape=jax.ShapeDtypeStruct((rp, width), out_dtype),
        grid_spec=pltpu.PrefetchScalarGridSpec(
            num_scalar_prefetch=0,
            grid=(n_blk,),
            in_specs=[pl.BlockSpec((tile, width), lambda i: (i, 0)),
                      pl.BlockSpec((1, width), lambda i: (0, 0)),
                      pl.BlockSpec((1, width), lambda i: (0, 0))],
            out_specs=pl.BlockSpec((tile, width), lambda i: (i, 0)),
        ),
        compiler_params=pltpu.CompilerParams(
            dimension_semantics=("parallel",)),
    )(yk, sc, sh)
    if rp != rows:
        out = out[:rows]
    return out.reshape(M, C)


# ---------------------------------------------------------------------------
# VGGBlock forward (NCHW in / NCHW out, like the PyTorch module)
# ---------------------------------------------------------------------------

def vgg_block(x_nchw, params, eps=1e-5):
    x = jnp.transpose(x_nchw, (0, 2, 3, 1))                  # NCHW -> NHWC
    N, H, W, _ = x.shape
    M = N * H * W

    def stage(x_nhwc, conv_p, bn_p, out_dtype):
        cout = conv_p["w"].shape[0]
        y, psum, pssq = conv3x3_bias_stats(x_nhwc, conv_p["w"], conv_p["b"])
        scale, shift = bn_scale_shift(psum, pssq, M, bn_p["gamma"],
                                      bn_p["beta"], eps)
        z = batchnorm_relu_apply(y.reshape(M, -1), scale, shift,
                                 out_dtype=out_dtype)
        return z[:, :cout].reshape(N, H, W, cout)

    # TODO(synk): fold bn1-apply + ReLU + bf16 cast into conv2's prologue
    # (per-channel scale/shift on the VMEM tile with halo masking) to remove
    # one more read+write of the mid tensor.
    y = stage(x, params["conv1"], params["bn1"], jnp.bfloat16)   # bf16 -> conv2
    y = stage(y, params["conv2"], params["bn2"], jnp.float32)
    return jnp.transpose(y, (0, 3, 1, 2))                        # NHWC -> NCHW


# ---------------------------------------------------------------------------
# Parameters (PyTorch-default-style init) and pure-JAX reference
# ---------------------------------------------------------------------------

def _conv_params(key, cin, cout, k):
    kw, kb = jax.random.split(key)
    bound = 1.0 / math.sqrt(cin * k * k)
    return {"w": jax.random.uniform(kw, (cout, cin, k, k), jnp.float32,
                                    -bound, bound),
            "b": jax.random.uniform(kb, (cout,), jnp.float32, -bound, bound)}


def _bn_params(c):
    return {"gamma": jnp.ones((c,), jnp.float32),
            "beta": jnp.zeros((c,), jnp.float32)}


def make_params(in_channels, mid_channels, out_channels, seed=0):
    k1, k2 = jax.random.split(jax.random.PRNGKey(seed))
    return {"conv1": _conv_params(k1, in_channels, mid_channels, 3),
            "bn1": _bn_params(mid_channels),
            "conv2": _conv_params(k2, mid_channels, out_channels, 3),
            "bn2": _bn_params(out_channels)}


def vgg_block_reference(x_nchw, p, eps=1e-5):
    def conv(x, w, b):
        y = jax.lax.conv_general_dilated(
            x, w, window_strides=(1, 1), padding="SAME",
            dimension_numbers=("NCHW", "OIHW", "NCHW"))
        return y + b.reshape(1, -1, 1, 1)

    def bn_relu(x, g, bt):
        mean = jnp.mean(x, axis=(0, 2, 3), keepdims=True)
        var = jnp.mean((x - mean) ** 2, axis=(0, 2, 3), keepdims=True)
        y = (x - mean) * jax.lax.rsqrt(var + eps)
        y = y * g.reshape(1, -1, 1, 1) + bt.reshape(1, -1, 1, 1)
        return jnp.maximum(y, 0.0)

    y = bn_relu(conv(x_nchw, p["conv1"]["w"], p["conv1"]["b"]),
                p["bn1"]["gamma"], p["bn1"]["beta"])
    y = bn_relu(conv(y, p["conv2"]["w"], p["conv2"]["b"]),
                p["bn2"]["gamma"], p["bn2"]["beta"])
    return y


# ---------------------------------------------------------------------------

if __name__ == "__main__":
    batch, cin, cmid, cout, spatial = 2, 3, 32, 32, 16

    params = make_params(cin, cmid, cout, seed=0)
    x = jax.random.normal(jax.random.PRNGKey(0),
                          (batch, cin, spatial, spatial), jnp.float32)

    fwd = jax.jit(vgg_block)
    out = jax.block_until_ready(fwd(x, params))

    assert out.shape == (batch, cout, spatial, spatial), out.shape
    assert bool(jnp.all(jnp.isfinite(out)))

    # Sanity check vs the XLA reference (bf16 MXU operands / bf16 intermediates
    # vs an all-f32 reference).
    ref = jax.block_until_ready(vgg_block_reference(x, params))
    max_err = float(jnp.max(jnp.abs(out - ref)))
    assert max_err < 0.25, f"max abs err {max_err}"

    print("KERNEL_OK")
</pallas_src>

<mosaic_0001>
module attributes {stable_mosaic.version = 11 : i64} {
  func.func @_conv3x3_kernel(%arg0: i32, %arg1: i32, %arg2: i32, %arg3: memref<1x10x18x8xbf16, #tpu.memory_space<vmem>>, %arg4: memref<1x72x32xbf16, #tpu.memory_space<vmem>>, %arg5: memref<1x1x32xf32, #tpu.memory_space<vmem>>, %arg6: memref<1x128x32xbf16, #tpu.memory_space<vmem>>, %arg7: memref<1x1x32xf32, #tpu.memory_space<vmem>>, %arg8: memref<1x1x32xf32, #tpu.memory_space<vmem>>, %arg9: memref<128x72xbf16, #tpu.memory_space<vmem>>) attributes {dimension_semantics = [#tpu.dimension_semantics<parallel>, #tpu.dimension_semantics<parallel>, #tpu.dimension_semantics<parallel>], iteration_bounds = array<i64: 2, 2, 1>, scalar_prefetch = 0 : i64, scratch_operands = 1 : i64, tpu.core_type = #tpu.core_type<tc>, window_params = [{transform_indices = @transform_0, window_bounds = array<i64: 1, 10, 18, 8>}, {pipeline_mode = #tpu.pipeline_mode<synchronous>, transform_indices = @transform_1, window_bounds = array<i64: 1, 72, 32>}, {transform_indices = @transform_2, window_bounds = array<i64: 1, 1, 32>}, {transform_indices = @transform_3, window_bounds = array<i64: 1, 128, 32>}, {transform_indices = @transform_4, window_bounds = array<i64: 1, 1, 32>}, {transform_indices = @transform_5, window_bounds = array<i64: 1, 1, 32>}]} {
    %c0 = arith.constant 0 : index
    %c0_0 = arith.constant 0 : index
    %c0_1 = arith.constant 0 : index
    %c0_2 = arith.constant 0 : index
    %0 = vector.load %arg3[%c0, %c0_0, %c0_1, %c0_2] : memref<1x10x18x8xbf16, #tpu.memory_space<vmem>>, vector<1x8x16x8xbf16>
    %1 = vector.shape_cast %0 : vector<1x8x16x8xbf16> to vector<8x16x8xbf16>
    %2 = vector.shape_cast %1 : vector<8x16x8xbf16> to vector<128x8xbf16>
    %c0_3 = arith.constant 0 : index
    %c0_4 = arith.constant 0 : index
    %3 = vector.load %arg9[%c0_3, %c0_4] : memref<128x72xbf16, #tpu.memory_space<vmem>>, vector<128x8xbf16>
    tpu.vector_store %arg9[%c0_3, %c0_4], %2 {strides = array<i32>} : memref<128x72xbf16, #tpu.memory_space<vmem>>, vector<128x8xbf16>,
    %c0_5 = arith.constant 0 : index
    %c0_6 = arith.constant 0 : index
    %c1 = arith.constant 1 : index
    %c0_7 = arith.constant 0 : index
    %4 = vector.load %arg3[%c0_5, %c0_6, %c1, %c0_7] : memref<1x10x18x8xbf16, #tpu.memory_space<vmem>>, vector<1x8x16x8xbf16>
    %5 = vector.shape_cast %4 : vector<1x8x16x8xbf16> to vector<8x16x8xbf16>
    %6 = vector.shape_cast %5 : vector<8x16x8xbf16> to vector<128x8xbf16>
    %c0_8 = arith.constant 0 : index
    %c8 = arith.constant 8 : index
    %7 = vector.load %arg9[%c0_8, %c8] : memref<128x72xbf16, #tpu.memory_space<vmem>>, vector<128x8xbf16>
    tpu.vector_store %arg9[%c0_8, %c8], %6 {strides = array<i32>} : memref<128x72xbf16, #tpu.memory_space<vmem>>, vector<128x8xbf16>,
    %c0_9 = arith.constant 0 : index
    %c0_10 = arith.constant 0 : index
    %c2 = arith.constant 2 : index
    %c0_11 = arith.constant 0 : index
    %8 = vector.load %arg3[%c0_9, %c0_10, %c2, %c0_11] : memref<1x10x18x8xbf16, #tpu.memory_space<vmem>>, vector<1x8x16x8xbf16>
    %9 = vector.shape_cast %8 : vector<1x8x16x8xbf16> to vector<8x16x8xbf16>
    %10 = vector.shape_cast %9 : vector<8x16x8xbf16> to vector<128x8xbf16>
    %c0_12 = arith.constant 0 : index
    %c16 = arith.constant 16 : index
    %11 = vector.load %arg9[%c0_12, %c16] : memref<128x72xbf16, #tpu.memory_space<vmem>>, vector<128x8xbf16>
    tpu.vector_store %arg9[%c0_12, %c16], %10 {strides = array<i32>} : memref<128x72xbf16, #tpu.memory_space<vmem>>, vector<128x8xbf16>,
    %c0_13 = arith.constant 0 : index
    %c1_14 = arith.constant 1 : index
    %c0_15 = arith.constant 0 : index
    %c0_16 = arith.constant 0 : index
    %12 = vector.load %arg3[%c0_13, %c1_14, %c0_15, %c0_16] : memref<1x10x18x8xbf16, #tpu.memory_space<vmem>>, vector<1x8x16x8xbf16>
    %13 = vector.shape_cast %12 : vector<1x8x16x8xbf16> to vector<8x16x8xbf16>
    %14 = vector.shape_cast %13 : vector<8x16x8xbf16> to vector<128x8xbf16>
    %c0_17 = arith.constant 0 : index
    %c24 = arith.constant 24 : index
    %15 = vector.load %arg9[%c0_17, %c24] : memref<128x72xbf16, #tpu.memory_space<vmem>>, vector<128x8xbf16>
    tpu.vector_store %arg9[%c0_17, %c24], %14 {strides = array<i32>} : memref<128x72xbf16, #tpu.memory_space<vmem>>, vector<128x8xbf16>,
    %c0_18 = arith.constant 0 : index
    %c1_19 = arith.constant 1 : index
    %c1_20 = arith.constant 1 : index
    %c0_21 = arith.constant 0 : index
    %16 = vector.load %arg3[%c0_18, %c1_19, %c1_20, %c0_21] : memref<1x10x18x8xbf16, #tpu.memory_space<vmem>>, vector<1x8x16x8xbf16>
    %17 = vector.shape_cast %16 : vector<1x8x16x8xbf16> to vector<8x16x8xbf16>
    %18 = vector.shape_cast %17 : vector<8x16x8xbf16> to vector<128x8xbf16>
    %c0_22 = arith.constant 0 : index
    %c32 = arith.constant 32 : index
    %19 = vector.load %arg9[%c0_22, %c32] : memref<128x72xbf16, #tpu.memory_space<vmem>>, vector<128x8xbf16>
    tpu.vector_store %arg9[%c0_22, %c32], %18 {strides = array<i32>} : memref<128x72xbf16, #tpu.memory_space<vmem>>, vector<128x8xbf16>,
    %c0_23 = arith.constant 0 : index
    %c1_24 = arith.constant 1 : index
    %c2_25 = arith.constant 2 : index
    %c0_26 = arith.constant 0 : index
    %20 = vector.load %arg3[%c0_23, %c1_24, %c2_25, %c0_26] : memref<1x10x18x8xbf16, #tpu.memory_space<vmem>>, vector<1x8x16x8xbf16>
    %21 = vector.shape_cast %20 : vector<1x8x16x8xbf16> to vector<8x16x8xbf16>
    %22 = vector.shape_cast %21 : vector<8x16x8xbf16> to vector<128x8xbf16>
    %c0_27 = arith.constant 0 : index
    %c40 = arith.constant 40 : index
    %23 = vector.load %arg9[%c0_27, %c40] : memref<128x72xbf16, #tpu.memory_space<vmem>>, vector<128x8xbf16>
    tpu.vector_store %arg9[%c0_27, %c40], %22 {strides = array<i32>} : memref<128x72xbf16, #tpu.memory_space<vmem>>, vector<128x8xbf16>,
    %c0_28 = arith.constant 0 : index
    %c2_29 = arith.constant 2 : index
    %c0_30 = arith.constant 0 : index
    %c0_31 = arith.constant 0 : index
    %24 = vector.load %arg3[%c0_28, %c2_29, %c0_30, %c0_31] : memref<1x10x18x8xbf16, #tpu.memory_space<vmem>>, vector<1x8x16x8xbf16>
    %25 = vector.shape_cast %24 : vector<1x8x16x8xbf16> to vector<8x16x8xbf16>
    %26 = vector.shape_cast %25 : vector<8x16x8xbf16> to vector<128x8xbf16>
    %c0_32 = arith.constant 0 : index
    %c48 = arith.constant 48 : index
    %27 = vector.load %arg9[%c0_32, %c48] : memref<128x72xbf16, #tpu.memory_space<vmem>>, vector<128x8xbf16>
    tpu.vector_store %arg9[%c0_32, %c48], %26 {strides = array<i32>} : memref<128x72xbf16, #tpu.memory_space<vmem>>, vector<128x8xbf16>,
    %c0_33 = arith.constant 0 : index
    %c2_34 = arith.constant 2 : index
    %c1_35 = arith.constant 1 : index
    %c0_36 = arith.constant 0 : index
    %28 = vector.load %arg3[%c0_33, %c2_34, %c1_35, %c0_36] : memref<1x10x18x8xbf16, #tpu.memory_space<vmem>>, vector<1x8x16x8xbf16>
    %29 = vector.shape_cast %28 : vector<1x8x16x8xbf16> to vector<8x16x8xbf16>
    %30 = vector.shape_cast %29 : vector<8x16x8xbf16> to vector<128x8xbf16>
    %c0_37 = arith.constant 0 : index
    %c56 = arith.constant 56 : index
    %31 = vector.load %arg9[%c0_37, %c56] : memref<128x72xbf16, #tpu.memory_space<vmem>>, vector<128x8xbf16>
    tpu.vector_store %arg9[%c0_37, %c56], %30 {strides = array<i32>} : memref<128x72xbf16, #tpu.memory_space<vmem>>, vector<128x8xbf16>,
    %c0_38 = arith.constant 0 : index
    %c2_39 = arith.constant 2 : index
    %c2_40 = arith.constant 2 : index
    %c0_41 = arith.constant 0 : index
    %32 = vector.load %arg3[%c0_38, %c2_39, %c2_40, %c0_41] : memref<1x10x18x8xbf16, #tpu.memory_space<vmem>>, vector<1x8x16x8xbf16>
    %33 = vector.shape_cast %32 : vector<1x8x16x8xbf16> to vector<8x16x8xbf16>
    %34 = vector.shape_cast %33 : vector<8x16x8xbf16> to vector<128x8xbf16>
    %c0_42 = arith.constant 0 : index
    %c64 = arith.constant 64 : index
    %35 = vector.load %arg9[%c0_42, %c64] : memref<128x72xbf16, #tpu.memory_space<vmem>>, vector<128x8xbf16>
    tpu.vector_store %arg9[%c0_42, %c64], %34 {strides = array<i32>} : memref<128x72xbf16, #tpu.memory_space<vmem>>, vector<128x8xbf16>,
    %c0_43 = arith.constant 0 : index
    %c0_44 = arith.constant 0 : index
    %36 = vector.load %arg9[%c0_43, %c0_44] : memref<128x72xbf16, #tpu.memory_space<vmem>>, vector<128x72xbf16>
    %37 = arith.index_cast %arg2 : i32 to index
    %c0_45 = arith.constant 0 : index
    %c0_46 = arith.constant 0 : index
    %38 = vector.load %arg4[%37, %c0_45, %c0_46] : memref<1x72x32xbf16, #tpu.memory_space<vmem>>, vector<1x72x32xbf16>
    %39 = vector.shape_cast %38 : vector<1x72x32xbf16> to vector<72x32xbf16>
    %cst = arith.constant dense<0.000000e+00> : vector<128x32xf32>
    %40 = tpu.matmul %36, %39, %cst {dimension_numbers = #tpu.dot_dimension_numbers<[1], [0], [0], [1], [0, 0, 1, 1], [], []>} : vector<128x72xbf16>, vector<72x32xbf16>, vector<128x32xf32> -> vector<128x32xf32>
    %c0_47 = arith.constant 0 : index
    %c0_48 = arith.constant 0 : index
    %c0_49 = arith.constant 0 : index
    %41 = vector.load %arg5[%c0_47, %c0_48, %c0_49] : memref<1x1x32xf32, #tpu.memory_space<vmem>>, vector<1x1x32xf32>
    %42 = vector.shape_cast %41 : vector<1x1x32xf32> to vector<1x32xf32>
    %43 = vector.broadcast %42 : vector<1x32xf32> to vector<128x32xf32>
    %44 = arith.addf %40, %43 : vector<128x32xf32>
    %cst_50 = arith.constant dense<0.000000e+00> : vector<32xf32>
    %45 = vector.multi_reduction <add>, %44, %cst_50 [0] : vector<128x32xf32> to vector<32xf32>
    %46 = vector.shape_cast %45 : vector<32xf32> to vector<1x32xf32>
    %c0_51 = arith.constant 0 : index
    %c0_52 = arith.constant 0 : index
    %c0_53 = arith.constant 0 : index
    %47 = vector.load %arg7[%c0_51, %c0_52, %c0_53] : memref<1x1x32xf32, #tpu.memory_space<vmem>>, vector<1x1x32xf32>
    %48 = vector.shape_cast %47 : vector<1x1x32xf32> to vector<1x32xf32>
    %49 = vector.shape_cast %46 : vector<1x32xf32> to vector<1x1x32xf32>
    tpu.vector_store %arg7[%c0_51, %c0_52, %c0_53], %49 {strides = array<i32>} : memref<1x1x32xf32, #tpu.memory_space<vmem>>, vector<1x1x32xf32>,
    %50 = arith.mulf %44, %44 : vector<128x32xf32>
    %cst_54 = arith.constant dense<0.000000e+00> : vector<32xf32>
    %51 = vector.multi_reduction <add>, %50, %cst_54 [0] : vector<128x32xf32> to vector<32xf32>
    %52 = vector.shape_cast %51 : vector<32xf32> to vector<1x32xf32>
    %c0_55 = arith.constant 0 : index
    %c0_56 = arith.constant 0 : index
    %c0_57 = arith.constant 0 : index
    %53 = vector.load %arg8[%c0_55, %c0_56, %c0_57] : memref<1x1x32xf32, #tpu.memory_space<vmem>>, vector<1x1x32xf32>
    %54 = vector.shape_cast %53 : vector<1x1x32xf32> to vector<1x32xf32>
    %55 = vector.shape_cast %52 : vector<1x32xf32> to vector<1x1x32xf32>
    tpu.vector_store %arg8[%c0_55, %c0_56, %c0_57], %55 {strides = array<i32>} : memref<1x1x32xf32, #tpu.memory_space<vmem>>, vector<1x1x32xf32>,
    %56 = arith.truncf %44 : vector<128x32xf32> to vector<128x32xbf16>
    %c0_58 = arith.constant 0 : index
    %c0_59 = arith.constant 0 : index
    %c0_60 = arith.constant 0 : index
    %57 = vector.load %arg6[%c0_58, %c0_59, %c0_60] : memref<1x128x32xbf16, #tpu.memory_space<vmem>>, vector<1x128x32xbf16>
    %58 = vector.shape_cast %57 : vector<1x128x32xbf16> to vector<128x32xbf16>
    %59 = vector.shape_cast %56 : vector<128x32xbf16> to vector<1x128x32xbf16>
    tpu.vector_store %arg6[%c0_58, %c0_59, %c0_60], %59 {strides = array<i32>} : memref<1x128x32xbf16, #tpu.memory_space<vmem>>, vector<1x128x32xbf16>,
    return
  }
  func.func @transform_0(%arg0: i32, %arg1: i32, %arg2: i32) -> (i32, i32, i32, i32) {
    %c2_i32 = arith.constant 2 : i32
    %0 = arith.muli %arg0, %c2_i32 : i32
    %1 = arith.addi %0, %arg1 : i32
    %c0_i32 = arith.constant 0 : i32
    %c0_i32_0 = arith.constant 0 : i32
    %c0_i32_1 = arith.constant 0 : i32
    %c0_i32_2 = arith.constant 0 : i32
    return %1, %c0_i32, %c0_i32_0, %c0_i32_1 : i32, i32, i32, i32
  }
  func.func @transform_1(%arg0: i32, %arg1: i32, %arg2: i32) -> (i32, i32, i32) {
    %c0_i32 = arith.constant 0 : i32
    %c0_i32_0 = arith.constant 0 : i32
    %c0_i32_1 = arith.constant 0 : i32
    %c0_i32_2 = arith.constant 0 : i32
    return %c0_i32, %c0_i32_0, %c0_i32_1 : i32, i32, i32
  }
  func.func @transform_2(%arg0: i32, %arg1: i32, %arg2: i32) -> (i32, i32, i32) {
    %c0_i32 = arith.constant 0 : i32
    %c0_i32_0 = arith.constant 0 : i32
    %c0_i32_1 = arith.constant 0 : i32
    return %arg2, %c0_i32, %c0_i32_0 : i32, i32, i32
  }
  func.func @transform_3(%arg0: i32, %arg1: i32, %arg2: i32) -> (i32, i32, i32) {
    %c0_i32 = arith.constant 0 : i32
    return %arg0, %arg1, %arg2 : i32, i32, i32
  }
  func.func @transform_4(%arg0: i32, %arg1: i32, %arg2: i32) -> (i32, i32, i32) {
    %c2_i32 = arith.constant 2 : i32
    %0 = arith.muli %arg0, %c2_i32 : i32
    %1 = arith.addi %0, %arg1 : i32
    %c0_i32 = arith.constant 0 : i32
    %c0_i32_0 = arith.constant 0 : i32
    return %1, %c0_i32, %arg2 : i32, i32, i32
  }
  func.func @transform_5(%arg0: i32, %arg1: i32, %arg2: i32) -> (i32, i32, i32) {
    %c2_i32 = arith.constant 2 : i32
    %0 = arith.muli %arg0, %c2_i32 : i32
    %1 = arith.addi %0, %arg1 : i32
    %c0_i32 = arith.constant 0 : i32
    %c0_i32_0 = arith.constant 0 : i32
    return %1, %c0_i32, %arg2 : i32, i32, i32
  }
}

module attributes {stable_mosaic.version = 11 : i64} {
  func.func @_bn_apply_kernel(%arg0: i32, %arg1: memref<128x128xbf16, #tpu.memory_space<vmem>>, %arg2: memref<1x128xf32, #tpu.memory_space<vmem>>, %arg3: memref<1x128xf32, #tpu.memory_space<vmem>>, %arg4: memref<128x128xbf16, #tpu.memory_space<vmem>>) attributes {dimension_semantics = [#tpu.dimension_semantics<parallel>], iteration_bounds = array<i64: 1>, scalar_prefetch = 0 : i64, scratch_operands = 0 : i64, tpu.core_type = #tpu.core_type<tc>, window_params = [{transform_indices = @transform_0, window_bounds = array<i64: 128, 128>}, {pipeline_mode = #tpu.pipeline_mode<synchronous>, transform_indices = @transform_1, window_bounds = array<i64: 1, 128>}, {pipeline_mode = #tpu.pipeline_mode<synchronous>, transform_indices = @transform_2, window_bounds = array<i64: 1, 128>}, {transform_indices = @transform_3, window_bounds = array<i64: 128, 128>}]} {
    %c0 = arith.constant 0 : index
    %c0_0 = arith.constant 0 : index
    %0 = vector.load %arg1[%c0, %c0_0] : memref<128x128xbf16, #tpu.memory_space<vmem>>, vector<128x128xbf16>
    %1 = arith.extf %0 : vector<128x128xbf16> to vector<128x128xf32>
    %c0_1 = arith.constant 0 : index
    %c0_2 = arith.constant 0 : index
    %2 = vector.load %arg2[%c0_1, %c0_2] : memref<1x128xf32, #tpu.memory_space<vmem>>, vector<1x128xf32>
    %3 = vector.broadcast %2 : vector<1x128xf32> to vector<128x128xf32>
    %4 = arith.mulf %1, %3 : vector<128x128xf32>
    %c0_3 = arith.constant 0 : index
    %c0_4 = arith.constant 0 : index
    %5 = vector.load %arg3[%c0_3, %c0_4] : memref<1x128xf32, #tpu.memory_space<vmem>>, vector<1x128xf32>
    %6 = vector.broadcast %5 : vector<1x128xf32> to vector<128x128xf32>
    %7 = arith.addf %4, %6 : vector<128x128xf32>
    %cst = arith.constant 0.000000e+00 : f32
    %8 = vector.broadcast %cst : f32 to vector<128x128xf32>
    %9 = arith.maximumf %7, %8 : vector<128x128xf32>
    %10 = arith.truncf %9 : vector<128x128xf32> to vector<128x128xbf16>
    %c0_5 = arith.constant 0 : index
    %c0_6 = arith.constant 0 : index
    %11 = vector.load %arg4[%c0_5, %c0_6] : memref<128x128xbf16, #tpu.memory_space<vmem>>, vector<128x128xbf16>
    tpu.vector_store %arg4[%c0_5, %c0_6], %10 {strides = array<i32>} : memref<128x128xbf16, #tpu.memory_space<vmem>>, vector<128x128xbf16>,
    return
  }
  func.func @transform_0(%arg0: i32) -> (i32, i32) {
    %c0_i32 = arith.constant 0 : i32
    %c0_i32_0 = arith.constant 0 : i32
    return %arg0, %c0_i32 : i32, i32
  }
  func.func @transform_1(%arg0: i32) -> (i32, i32) {
    %c0_i32 = arith.constant 0 : i32
    %c0_i32_0 = arith.constant 0 : i32
    %c0_i32_1 = arith.constant 0 : i32
    return %c0_i32, %c0_i32_0 : i32, i32
  }
  func.func @transform_2(%arg0: i32) -> (i32, i32) {
    %c0_i32 = arith.constant 0 : i32
    %c0_i32_0 = arith.constant 0 : i32
    %c0_i32_1 = arith.constant 0 : i32
    return %c0_i32, %c0_i32_0 : i32, i32
  }
  func.func @transform_3(%arg0: i32) -> (i32, i32) {
    %c0_i32 = arith.constant 0 : i32
    %c0_i32_0 = arith.constant 0 : i32
    return %arg0, %c0_i32 : i32, i32
  }
}

module attributes {stable_mosaic.version = 11 : i64} {
  func.func @_conv3x3_kernel(%arg0: i32, %arg1: i32, %arg2: i32, %arg3: memref<1x10x18x32xbf16, #tpu.memory_space<vmem>>, %arg4: memref<1x288x32xbf16, #tpu.memory_space<vmem>>, %arg5: memref<1x1x32xf32, #tpu.memory_space<vmem>>, %arg6: memref<1x128x32xbf16, #tpu.memory_space<vmem>>, %arg7: memref<1x1x32xf32, #tpu.memory_space<vmem>>, %arg8: memref<1x1x32xf32, #tpu.memory_space<vmem>>, %arg9: memref<128x288xbf16, #tpu.memory_space<vmem>>) attributes {dimension_semantics = [#tpu.dimension_semantics<parallel>, #tpu.dimension_semantics<parallel>, #tpu.dimension_semantics<parallel>], iteration_bounds = array<i64: 2, 2, 1>, scalar_prefetch = 0 : i64, scratch_operands = 1 : i64, tpu.core_type = #tpu.core_type<tc>, window_params = [{transform_indices = @transform_0, window_bounds = array<i64: 1, 10, 18, 32>}, {pipeline_mode = #tpu.pipeline_mode<synchronous>, transform_indices = @transform_1, window_bounds = array<i64: 1, 288, 32>}, {transform_indices = @transform_2, window_bounds = array<i64: 1, 1, 32>}, {transform_indices = @transform_3, window_bounds = array<i64: 1, 128, 32>}, {transform_indices = @transform_4, window_bounds = array<i64: 1, 1, 32>}, {transform_indices = @transform_5, window_bounds = array<i64: 1, 1, 32>}]} {
    %c0 = arith.constant 0 : index
    %c0_0 = arith.constant 0 : index
    %c0_1 = arith.constant 0 : index
    %c0_2 = arith.constant 0 : index
    %0 = vector.load %arg3[%c0, %c0_0, %c0_1, %c0_2] : memref<1x10x18x32xbf16, #tpu.memory_space<vmem>>, vector<1x8x16x32xbf16>
    %1 = vector.shape_cast %0 : vector<1x8x16x32xbf16> to vector<8x16x32xbf16>
    %2 = vector.shape_cast %1 : vector<8x16x32xbf16> to vector<128x32xbf16>
    %c0_3 = arith.constant 0 : index
    %c0_4 = arith.constant 0 : index
    %3 = vector.load %arg9[%c0_3, %c0_4] : memref<128x288xbf16, #tpu.memory_space<vmem>>, vector<128x32xbf16>
    tpu.vector_store %arg9[%c0_3, %c0_4], %2 {strides = array<i32>} : memref<128x288xbf16, #tpu.memory_space<vmem>>, vector<128x32xbf16>,
    %c0_5 = arith.constant 0 : index
    %c0_6 = arith.constant 0 : index
    %c1 = arith.constant 1 : index
    %c0_7 = arith.constant 0 : index
    %4 = vector.load %arg3[%c0_5, %c0_6, %c1, %c0_7] : memref<1x10x18x32xbf16, #tpu.memory_space<vmem>>, vector<1x8x16x32xbf16>
    %5 = vector.shape_cast %4 : vector<1x8x16x32xbf16> to vector<8x16x32xbf16>
    %6 = vector.shape_cast %5 : vector<8x16x32xbf16> to vector<128x32xbf16>
    %c0_8 = arith.constant 0 : index
    %c32 = arith.constant 32 : index
    %7 = vector.load %arg9[%c0_8, %c32] : memref<128x288xbf16, #tpu.memory_space<vmem>>, vector<128x32xbf16>
    tpu.vector_store %arg9[%c0_8, %c32], %6 {strides = array<i32>} : memref<128x288xbf16, #tpu.memory_space<vmem>>, vector<128x32xbf16>,
    %c0_9 = arith.constant 0 : index
    %c0_10 = arith.constant 0 : index
    %c2 = arith.constant 2 : index
    %c0_11 = arith.constant 0 : index
    %8 = vector.load %arg3[%c0_9, %c0_10, %c2, %c0_11] : memref<1x10x18x32xbf16, #tpu.memory_space<vmem>>, vector<1x8x16x32xbf16>
    %9 = vector.shape_cast %8 : vector<1x8x16x32xbf16> to vector<8x16x32xbf16>
    %10 = vector.shape_cast %9 : vector<8x16x32xbf16> to vector<128x32xbf16>
    %c0_12 = arith.constant 0 : index
    %c64 = arith.constant 64 : index
    %11 = vector.load %arg9[%c0_12, %c64] : memref<128x288xbf16, #tpu.memory_space<vmem>>, vector<128x32xbf16>
    tpu.vector_store %arg9[%c0_12, %c64], %10 {strides = array<i32>} : memref<128x288xbf16, #tpu.memory_space<vmem>>, vector<128x32xbf16>,
    %c0_13 = arith.constant 0 : index
    %c1_14 = arith.constant 1 : index
    %c0_15 = arith.constant 0 : index
    %c0_16 = arith.constant 0 : index
    %12 = vector.load %arg3[%c0_13, %c1_14, %c0_15, %c0_16] : memref<1x10x18x32xbf16, #tpu.memory_space<vmem>>, vector<1x8x16x32xbf16>
    %13 = vector.shape_cast %12 : vector<1x8x16x32xbf16> to vector<8x16x32xbf16>
    %14 = vector.shape_cast %13 : vector<8x16x32xbf16> to vector<128x32xbf16>
    %c0_17 = arith.constant 0 : index
    %c96 = arith.constant 96 : index
    %15 = vector.load %arg9[%c0_17, %c96] : memref<128x288xbf16, #tpu.memory_space<vmem>>, vector<128x32xbf16>
    tpu.vector_store %arg9[%c0_17, %c96], %14 {strides = array<i32>} : memref<128x288xbf16, #tpu.memory_space<vmem>>, vector<128x32xbf16>,
    %c0_18 = arith.constant 0 : index
    %c1_19 = arith.constant 1 : index
    %c1_20 = arith.constant 1 : index
    %c0_21 = arith.constant 0 : index
    %16 = vector.load %arg3[%c0_18, %c1_19, %c1_20, %c0_21] : memref<1x10x18x32xbf16, #tpu.memory_space<vmem>>, vector<1x8x16x32xbf16>
    %17 = vector.shape_cast %16 : vector<1x8x16x32xbf16> to vector<8x16x32xbf16>
    %18 = vector.shape_cast %17 : vector<8x16x32xbf16> to vector<128x32xbf16>
    %c0_22 = arith.constant 0 : index
    %c128 = arith.constant 128 : index
    %19 = vector.load %arg9[%c0_22, %c128] : memref<128x288xbf16, #tpu.memory_space<vmem>>, vector<128x32xbf16>
    tpu.vector_store %arg9[%c0_22, %c128], %18 {strides = array<i32>} : memref<128x288xbf16, #tpu.memory_space<vmem>>, vector<128x32xbf16>,
    %c0_23 = arith.constant 0 : index
    %c1_24 = arith.constant 1 : index
    %c2_25 = arith.constant 2 : index
    %c0_26 = arith.constant 0 : index
    %20 = vector.load %arg3[%c0_23, %c1_24, %c2_25, %c0_26] : memref<1x10x18x32xbf16, #tpu.memory_space<vmem>>, vector<1x8x16x32xbf16>
    %21 = vector.shape_cast %20 : vector<1x8x16x32xbf16> to vector<8x16x32xbf16>
    %22 = vector.shape_cast %21 : vector<8x16x32xbf16> to vector<128x32xbf16>
    %c0_27 = arith.constant 0 : index
    %c160 = arith.constant 160 : index
    %23 = vector.load %arg9[%c0_27, %c160] : memref<128x288xbf16, #tpu.memory_space<vmem>>, vector<128x32xbf16>
    tpu.vector_store %arg9[%c0_27, %c160], %22 {strides = array<i32>} : memref<128x288xbf16, #tpu.memory_space<vmem>>, vector<128x32xbf16>,
    %c0_28 = arith.constant 0 : index
    %c2_29 = arith.constant 2 : index
    %c0_30 = arith.constant 0 : index
    %c0_31 = arith.constant 0 : index
    %24 = vector.load %arg3[%c0_28, %c2_29, %c0_30, %c0_31] : memref<1x10x18x32xbf16, #tpu.memory_space<vmem>>, vector<1x8x16x32xbf16>
    %25 = vector.shape_cast %24 : vector<1x8x16x32xbf16> to vector<8x16x32xbf16>
    %26 = vector.shape_cast %25 : vector<8x16x32xbf16> to vector<128x32xbf16>
    %c0_32 = arith.constant 0 : index
    %c192 = arith.constant 192 : index
    %27 = vector.load %arg9[%c0_32, %c192] : memref<128x288xbf16, #tpu.memory_space<vmem>>, vector<128x32xbf16>
    tpu.vector_store %arg9[%c0_32, %c192], %26 {strides = array<i32>} : memref<128x288xbf16, #tpu.memory_space<vmem>>, vector<128x32xbf16>,
    %c0_33 = arith.constant 0 : index
    %c2_34 = arith.constant 2 : index
    %c1_35 = arith.constant 1 : index
    %c0_36 = arith.constant 0 : index
    %28 = vector.load %arg3[%c0_33, %c2_34, %c1_35, %c0_36] : memref<1x10x18x32xbf16, #tpu.memory_space<vmem>>, vector<1x8x16x32xbf16>
    %29 = vector.shape_cast %28 : vector<1x8x16x32xbf16> to vector<8x16x32xbf16>
    %30 = vector.shape_cast %29 : vector<8x16x32xbf16> to vector<128x32xbf16>
    %c0_37 = arith.constant 0 : index
    %c224 = arith.constant 224 : index
    %31 = vector.load %arg9[%c0_37, %c224] : memref<128x288xbf16, #tpu.memory_space<vmem>>, vector<128x32xbf16>
    tpu.vector_store %arg9[%c0_37, %c224], %30 {strides = array<i32>} : memref<128x288xbf16, #tpu.memory_space<vmem>>, vector<128x32xbf16>,
    %c0_38 = arith.constant 0 : index
    %c2_39 = arith.constant 2 : index
    %c2_40 = arith.constant 2 : index
    %c0_41 = arith.constant 0 : index
    %32 = vector.load %arg3[%c0_38, %c2_39, %c2_40, %c0_41] : memref<1x10x18x32xbf16, #tpu.memory_space<vmem>>, vector<1x8x16x32xbf16>
    %33 = vector.shape_cast %32 : vector<1x8x16x32xbf16> to vector<8x16x32xbf16>
    %34 = vector.shape_cast %33 : vector<8x16x32xbf16> to vector<128x32xbf16>
    %c0_42 = arith.constant 0 : index
    %c256 = arith.constant 256 : index
    %35 = vector.load %arg9[%c0_42, %c256] : memref<128x288xbf16, #tpu.memory_space<vmem>>, vector<128x32xbf16>
    tpu.vector_store %arg9[%c0_42, %c256], %34 {strides = array<i32>} : memref<128x288xbf16, #tpu.memory_space<vmem>>, vector<128x32xbf16>,
    %c0_43 = arith.constant 0 : index
    %c0_44 = arith.constant 0 : index
    %36 = vector.load %arg9[%c0_43, %c0_44] : memref<128x288xbf16, #tpu.memory_space<vmem>>, vector<128x288xbf16>
    %37 = arith.index_cast %arg2 : i32 to index
    %c0_45 = arith.constant 0 : index
    %c0_46 = arith.constant 0 : index
    %38 = vector.load %arg4[%37, %c0_45, %c0_46] : memref<1x288x32xbf16, #tpu.memory_space<vmem>>, vector<1x288x32xbf16>
    %39 = vector.shape_cast %38 : vector<1x288x32xbf16> to vector<288x32xbf16>
    %cst = arith.constant dense<0.000000e+00> : vector<128x32xf32>
    %40 = tpu.matmul %36, %39, %cst {dimension_numbers = #tpu.dot_dimension_numbers<[1], [0], [0], [1], [0, 0, 1, 1], [], []>} : vector<128x288xbf16>, vector<288x32xbf16>, vector<128x32xf32> -> vector<128x32xf32>
    %c0_47 = arith.constant 0 : index
    %c0_48 = arith.constant 0 : index
    %c0_49 = arith.constant 0 : index
    %41 = vector.load %arg5[%c0_47, %c0_48, %c0_49] : memref<1x1x32xf32, #tpu.memory_space<vmem>>, vector<1x1x32xf32>
    %42 = vector.shape_cast %41 : vector<1x1x32xf32> to vector<1x32xf32>
    %43 = vector.broadcast %42 : vector<1x32xf32> to vector<128x32xf32>
    %44 = arith.addf %40, %43 : vector<128x32xf32>
    %cst_50 = arith.constant dense<0.000000e+00> : vector<32xf32>
    %45 = vector.multi_reduction <add>, %44, %cst_50 [0] : vector<128x32xf32> to vector<32xf32>
    %46 = vector.shape_cast %45 : vector<32xf32> to vector<1x32xf32>
    %c0_51 = arith.constant 0 : index
    %c0_52 = arith.constant 0 : index
    %c0_53 = arith.constant 0 : index
    %47 = vector.load %arg7[%c0_51, %c0_52, %c0_53] : memref<1x1x32xf32, #tpu.memory_space<vmem>>, vector<1x1x32xf32>
    %48 = vector.shape_cast %47 : vector<1x1x32xf32> to vector<1x32xf32>
    %49 = vector.shape_cast %46 : vector<1x32xf32> to vector<1x1x32xf32>
    tpu.vector_store %arg7[%c0_51, %c0_52, %c0_53], %49 {strides = array<i32>} : memref<1x1x32xf32, #tpu.memory_space<vmem>>, vector<1x1x32xf32>,
    %50 = arith.mulf %44, %44 : vector<128x32xf32>
    %cst_54 = arith.constant dense<0.000000e+00> : vector<32xf32>
    %51 = vector.multi_reduction <add>, %50, %cst_54 [0] : vector<128x32xf32> to vector<32xf32>
    %52 = vector.shape_cast %51 : vector<32xf32> to vector<1x32xf32>
    %c0_55 = arith.constant 0 : index
    %c0_56 = arith.constant 0 : index
    %c0_57 = arith.constant 0 : index
    %53 = vector.load %arg8[%c0_55, %c0_56, %c0_57] : memref<1x1x32xf32, #tpu.memory_space<vmem>>, vector<1x1x32xf32>
    %54 = vector.shape_cast %53 : vector<1x1x32xf32> to vector<1x32xf32>
    %55 = vector.shape_cast %52 : vector<1x32xf32> to vector<1x1x32xf32>
    tpu.vector_store %arg8[%c0_55, %c0_56, %c0_57], %55 {strides = array<i32>} : memref<1x1x32xf32, #tpu.memory_space<vmem>>, vector<1x1x32xf32>,
    %56 = arith.truncf %44 : vector<128x32xf32> to vector<128x32xbf16>
    %c0_58 = arith.constant 0 : index
    %c0_59 = arith.constant 0 : index
    %c0_60 = arith.constant 0 : index
    %57 = vector.load %arg6[%c0_58, %c0_59, %c0_60] : memref<1x128x32xbf16, #tpu.memory_space<vmem>>, vector<1x128x32xbf16>
    %58 = vector.shape_cast %57 : vector<1x128x32xbf16> to vector<128x32xbf16>
    %59 = vector.shape_cast %56 : vector<128x32xbf16> to vector<1x128x32xbf16>
    tpu.vector_store %arg6[%c0_58, %c0_59, %c0_60], %59 {strides = array<i32>} : memref<1x128x32xbf16, #tpu.memory_space<vmem>>, vector<1x128x32xbf16>,
    return
  }
  func.func @transform_0(%arg0: i32, %arg1: i32, %arg2: i32) -> (i32, i32, i32, i32) {
    %c2_i32 = arith.constant 2 : i32
    %0 = arith.muli %arg0, %c2_i32 : i32
    %1 = arith.addi %0, %arg1 : i32
    %c0_i32 = arith.constant 0 : i32
    %c0_i32_0 = arith.constant 0 : i32
    %c0_i32_1 = arith.constant 0 : i32
    %c0_i32_2 = arith.constant 0 : i32
    return %1, %c0_i32, %c0_i32_0, %c0_i32_1 : i32, i32, i32, i32
  }
  func.func @transform_1(%arg0: i32, %arg1: i32, %arg2: i32) -> (i32, i32, i32) {
    %c0_i32 = arith.constant 0 : i32
    %c0_i32_0 = arith.constant 0 : i32
    %c0_i32_1 = arith.constant 0 : i32
    %c0_i32_2 = arith.constant 0 : i32
    return %c0_i32, %c0_i32_0, %c0_i32_1 : i32, i32, i32
  }
  func.func @transform_2(%arg0: i32, %arg1: i32, %arg2: i32) -> (i32, i32, i32) {
    %c0_i32 = arith.constant 0 : i32
    %c0_i32_0 = arith.constant 0 : i32
    %c0_i32_1 = arith.constant 0 : i32
    return %arg2, %c0_i32, %c0_i32_0 : i32, i32, i32
  }
  func.func @transform_3(%arg0: i32, %arg1: i32, %arg2: i32) -> (i32, i32, i32) {
    %c0_i32 = arith.constant 0 : i32
    return %arg0, %arg1, %arg2 : i32, i32, i32
  }
  func.func @transform_4(%arg0: i32, %arg1: i32, %arg2: i32) -> (i32, i32, i32) {
    %c2_i32 = arith.constant 2 : i32
    %0 = arith.muli %arg0, %c2_i32 : i32
    %1 = arith.addi %0, %arg1 : i32
    %c0_i32 = arith.constant 0 : i32
    %c0_i32_0 = arith.constant 0 : i32
    return %1, %c0_i32, %arg2 : i32, i32, i32
  }
  func.func @transform_5(%arg0: i32, %arg1: i32, %arg2: i32) -> (i32, i32, i32) {
    %c2_i32 = arith.constant 2 : i32
    %0 = arith.muli %arg0, %c2_i32 : i32
    %1 = arith.addi %0, %arg1 : i32
    %c0_i32 = arith.constant 0 : i32
    %c0_i32_0 = arith.constant 0 : i32
    return %1, %c0_i32, %arg2 : i32, i32, i32
  }
}

module attributes {stable_mosaic.version = 11 : i64} {
  func.func @_bn_apply_kernel(%arg0: i32, %arg1: memref<128x128xbf16, #tpu.memory_space<vmem>>, %arg2: memref<1x128xf32, #tpu.memory_space<vmem>>, %arg3: memref<1x128xf32, #tpu.memory_space<vmem>>, %arg4: memref<128x128xf32, #tpu.memory_space<vmem>>) attributes {dimension_semantics = [#tpu.dimension_semantics<parallel>], iteration_bounds = array<i64: 1>, scalar_prefetch = 0 : i64, scratch_operands = 0 : i64, tpu.core_type = #tpu.core_type<tc>, window_params = [{transform_indices = @transform_0, window_bounds = array<i64: 128, 128>}, {pipeline_mode = #tpu.pipeline_mode<synchronous>, transform_indices = @transform_1, window_bounds = array<i64: 1, 128>}, {pipeline_mode = #tpu.pipeline_mode<synchronous>, transform_indices = @transform_2, window_bounds = array<i64: 1, 128>}, {transform_indices = @transform_3, window_bounds = array<i64: 128, 128>}]} {
    %c0 = arith.constant 0 : index
    %c0_0 = arith.constant 0 : index
    %0 = vector.load %arg1[%c0, %c0_0] : memref<128x128xbf16, #tpu.memory_space<vmem>>, vector<128x128xbf16>
    %1 = arith.extf %0 : vector<128x128xbf16> to vector<128x128xf32>
    %c0_1 = arith.constant 0 : index
    %c0_2 = arith.constant 0 : index
    %2 = vector.load %arg2[%c0_1, %c0_2] : memref<1x128xf32, #tpu.memory_space<vmem>>, vector<1x128xf32>
    %3 = vector.broadcast %2 : vector<1x128xf32> to vector<128x128xf32>
    %4 = arith.mulf %1, %3 : vector<128x128xf32>
    %c0_3 = arith.constant 0 : index
    %c0_4 = arith.constant 0 : index
    %5 = vector.load %arg3[%c0_3, %c0_4] : memref<1x128xf32, #tpu.memory_space<vmem>>, vector<1x128xf32>
    %6 = vector.broadcast %5 : vector<1x128xf32> to vector<128x128xf32>
    %7 = arith.addf %4, %6 : vector<128x128xf32>
    %cst = arith.constant 0.000000e+00 : f32
    %8 = vector.broadcast %cst : f32 to vector<128x128xf32>
    %9 = arith.maximumf %7, %8 : vector<128x128xf32>
    %c0_5 = arith.constant 0 : index
    %c0_6 = arith.constant 0 : index
    %10 = vector.load %arg4[%c0_5, %c0_6] : memref<128x128xf32, #tpu.memory_space<vmem>>, vector<128x128xf32>
    tpu.vector_store %arg4[%c0_5, %c0_6], %9 {strides = array<i32>} : memref<128x128xf32, #tpu.memory_space<vmem>>, vector<128x128xf32>,
    return
  }
  func.func @transform_0(%arg0: i32) -> (i32, i32) {
    %c0_i32 = arith.constant 0 : i32
    %c0_i32_0 = arith.constant 0 : i32
    return %arg0, %c0_i32 : i32, i32
  }
  func.func @transform_1(%arg0: i32) -> (i32, i32) {
    %c0_i32 = arith.constant 0 : i32
    %c0_i32_0 = arith.constant 0 : i32
    %c0_i32_1 = arith.constant 0 : i32
    return %c0_i32, %c0_i32_0 : i32, i32
  }
  func.func @transform_2(%arg0: i32) -> (i32, i32) {
    %c0_i32 = arith.constant 0 : i32
    %c0_i32_0 = arith.constant 0 : i32
    %c0_i32_1 = arith.constant 0 : i32
    return %c0_i32, %c0_i32_0 : i32, i32
  }
  func.func @transform_3(%arg0: i32) -> (i32, i32) {
    %c0_i32 = arith.constant 0 : i32
    %c0_i32_0 = arith.constant 0 : i32
    return %arg0, %c0_i32 : i32, i32
  }
}

</mosaic_0001>

<bundles_post_ra>
// kernel: tile.23
= control target key start
LH: loop header
LB: loop body
LE: loop exit
PB: predicated region body
PF: predicated region fallthrough
CT: control target
= control target key end

     0   :  { %s22_s0 = inlined_call_operand.vmem [shape: f32[32], index: 0, kind: input, shape index: {}]   ;;  %s23_s1 = inlined_call_operand.vmem [shape: f32[4,32], index: 1, kind: output, shape index: {}]  }
   0x1   :  { %v4_v0 = vld [vmem:[%s22_s0] ss:$0 sm:$0xff] }
   0x2   :  { %5 = vst [vmem:[%s23_s1] sm:$0xf] %v4_v0 }

// kernel: tile.24
= control target key start
LH: loop header
LB: loop body
LE: loop exit
PB: predicated region body
PF: predicated region fallthrough
CT: control target
= control target key end

     0   :  { %vm7_vm0 = vcmask 261120   ;;  %s37_s8 = smov 32   ;;  %s38_s9 = smov 64   ;;  %vm13_vm1 = vcmask 1048320   ;;  %vm19_vm2 = vcmask 785920   ;;  %vm25_vm3 = vcmask 523520   ;;  %s55_s0 = inlined_call_operand.vmem [shape: f32[4,32], index: 0, kind: input, shape index: {}]   ;;  %s56_s1 = inlined_call_operand.vmem [shape: f32[1,128], index: 1, kind: output, shape index: {}]  }
   0x1   :  { %v4_v0 = vld [vmem:[%s55_s0] sm:$0xf]  ;;  %s36_s0 = smov 96  }
   0x2   :  { %5 = vst [vmem:[#allocation1] sm:$0xf] %v4_v0 }
   0x9   :  { %v10_v1 = vld [vmem:[#allocation1 + $0x3] sm:$0x1]   ;;  %v22_v2 = vld [vmem:[#allocation1 + $0x1] sm:$0x1]   ;;  %v6_v3 = vld [vmem:[#allocation1] sm:$0x1]  }
   0xa   :  { %11 = vrot.lane.b32.xlu0 %v10_v1, %s36_s0  ;;  %23 = vrot.lane.b32.xlu1 %v22_v2, %s37_s8  ;;  %v16_v4 = vld [vmem:[#allocation1 + $0x2] sm:$0x1]   ;;  %8 = vst.msk [vmem:[#allocation0] sm:$0x1] %vm7_vm0, %v6_v3  }
   0xe   :  { %17 = vrot.lane.b32.xlu0 %v16_v4, %s38_s9 }
  0x7c   :  { %v12_v5 = vpop.permute.xlu0 %11   ;;  %v24_v6 = vpop.permute.xlu1 %23  }
  0x7d   :  { %14 = vst.msk [vmem:[#allocation0] sm:$0x1] %vm13_vm1, %v12_v5  }
  0x80   :  { %v18_v7 = vpop.permute.xlu0 %17  }
  0x81   :  { %20 = vst.msk [vmem:[#allocation0] sm:$0x1] %vm19_vm2, %v18_v7  }
  0x82   :  { %26 = vst.msk [vmem:[#allocation0] sm:$0x1] %vm25_vm3, %v24_v6  }
  0x89   :  { %v30_v8 = vld [vmem:[#allocation0] sm:$0x1] }
  0x8a   :  { %32 = vst [vmem:[%s56_s1] sm:$0x1] %v30_v8 }

// kernel: vgg_block.5
= control target key start
LH: loop header
LB: loop body
LE: loop exit
PB: predicated region body
PF: predicated region fallthrough
CT: control target
= control target key end

     0   :  { %s422_s0 = inlined_call_operand.vmem [shape: bf16[128,128], index: 0, kind: input, shape index: {}]   ;;  %s423_s1 = inlined_call_operand.vmem [shape: f32[1,128], index: 1, kind: input, shape index: {}]   ;;  %s424_s2 = inlined_call_operand.vmem [shape: f32[1,128], index: 2, kind: input, shape index: {}]   ;;  %s425_s3 = inlined_call_operand.vmem [shape: bf16[128,128], index: 3, kind: output, shape index: {}]  }
   0x1   :  { %v227_v0 = vld [vmem:[%s422_s0] sm:$0xff]   ;;  %v298_v4 = vld [vmem:[%s422_s0 + $0x8] sm:$0xff]   ;;  %v299_v5 = vld [vmem:[%s422_s0 + $0x10] sm:$0xff]  }
   0x2   :  { %v338_v1 = vld [vmem:[%s423_s1] ss:$0 sm:$0xff]  ;;  %v228_v2 = vunpack.c.l.bf16 %v227_v0  ;;  %v229_v3 = vunpack.c.h.bf16 %v227_v0  ;;  %v300_v6 = vld [vmem:[%s422_s0 + $0x18] sm:$0xff]   ;;  %v232_v8 = vunpack.c.l.bf16 %v298_v4  ;;  %v233_v9 = vunpack.c.h.bf16 %v298_v4  ;;  %v302_v33 = vld [vmem:[%s422_s0 + $0x28] sm:$0xff]  }
   0x3   :  { %v352_v7 = vld [vmem:[%s424_s2] ss:$0 sm:$0xff]  ;;  %v236_v10 = vunpack.c.l.bf16 %v299_v5  ;;  %v237_v11 = vunpack.c.h.bf16 %v299_v5  ;;  %v240_v14 = vunpack.c.l.bf16 %v300_v6  ;;  %v241_v15 = vunpack.c.h.bf16 %v300_v6  ;;  %v303_v38 = vld [vmem:[%s422_s0 + $0x30] sm:$0xff]   ;;  %v304_v43 = vld [vmem:[%s422_s0 + $0x38] sm:$0xff]  }
   0x4   :  { %v53_v12 = vmul.f32 %v228_v2, %v338_v1  ;;  %v54_v13 = vmul.f32 %v229_v3, %v338_v1  ;;  %v55_v16 = vmul.f32 %v232_v8, %v338_v1  ;;  %v56_v17 = vmul.f32 %v233_v9, %v338_v1  ;;  %v301_v28 = vld [vmem:[%s422_s0 + $0x20] sm:$0xff]  }
   0x5   :  { %v57_v18 = vmul.f32 %v236_v10, %v338_v1  ;;  %v58_v19 = vmul.f32 %v237_v11, %v338_v1  ;;  %v59_v22 = vmul.f32 %v240_v14, %v338_v1  ;;  %v60_v23 = vmul.f32 %v241_v15, %v338_v1 }
   0x6   :  { %v76_v20 = vadd.f32 %v352_v7, %v53_v12  ;;  %v77_v21 = vadd.f32 %v352_v7, %v54_v13  ;;  %v78_v24 = vadd.f32 %v352_v7, %v55_v16  ;;  %v79_v25 = vadd.f32 %v352_v7, %v56_v17 }
   0x7   :  { %v80_v26 = vadd.f32 %v352_v7, %v57_v18  ;;  %v81_v27 = vadd.f32 %v352_v7, %v58_v19  ;;  %v82_v31 = vadd.f32 %v352_v7, %v59_v22  ;;  %v83_v32 = vadd.f32 %v352_v7, %v60_v23 }
   0x8   :  { %v92_v29 = vmax.f32 %v76_v20, 0.0  ;;  %v93_v30 = vmax.f32 %v77_v21, 0.0  ;;  %v94_v34 = vmax.f32 %v78_v24, 0.0  ;;  %v95_v35 = vmax.f32 %v79_v25, 0.0 }
   0x9   :  { %v96_v36 = vmax.f32 %v80_v26, 0.0  ;;  %v97_v37 = vmax.f32 %v81_v27, 0.0  ;;  %v98_v40 = vmax.f32 %v82_v31, 0.0  ;;  %v99_v41 = vmax.f32 %v83_v32, 0.0 }
   0xa   :  { %v261_v39 = vpack.c.bf16 %v93_v30, %v92_v29  ;;  %v244_v42 = vunpack.c.l.bf16 %v301_v28  ;;  %v266_v44 = vpack.c.bf16 %v95_v35, %v94_v34  ;;  %v245_v46 = vunpack.c.h.bf16 %v301_v28 }
   0xb   :  { %v271_v45 = vpack.c.bf16 %v97_v37, %v96_v36  ;;  %v248_v47 = vunpack.c.l.bf16 %v302_v33  ;;  %v276_v48 = vpack.c.bf16 %v99_v41, %v98_v40  ;;  %v249_v50 = vunpack.c.h.bf16 %v302_v33 }
   0xc   :  { %262 = vst [vmem:[%s425_s3] sm:$0xff] %v261_v39   ;;  %v61_v49 = vmul.f32 %v244_v42, %v338_v1  ;;  %v252_v51 = vunpack.c.l.bf16 %v303_v38  ;;  %305 = vst [vmem:[%s425_s3 + $0x8] sm:$0xff] %v266_v44   ;;  %v62_v52 = vmul.f32 %v245_v46, %v338_v1  ;;  %v253_v54 = vunpack.c.h.bf16 %v303_v38 }
   0xd   :  { %306 = vst [vmem:[%s425_s3 + $0x10] sm:$0xff] %v271_v45   ;;  %v63_v53 = vmul.f32 %v248_v47, %v338_v1  ;;  %v256_v55 = vunpack.c.l.bf16 %v304_v43  ;;  %307 = vst [vmem:[%s425_s3 + $0x18] sm:$0xff] %v276_v48   ;;  %v64_v57 = vmul.f32 %v249_v50, %v338_v1  ;;  %v257_v59 = vunpack.c.h.bf16 %v304_v43 }
   0xe   :  { %v84_v56 = vadd.f32 %v352_v7, %v61_v49  ;;  %v65_v58 = vmul.f32 %v252_v51, %v338_v1  ;;  %v85_v60 = vadd.f32 %v352_v7, %v62_v52  ;;  %v66_v62 = vmul.f32 %v253_v54, %v338_v1 }
   0xf   :  { %v86_v61 = vadd.f32 %v352_v7, %v63_v53  ;;  %v67_v63 = vmul.f32 %v256_v55, %v338_v1  ;;  %v87_v2 = vadd.f32 %v352_v7, %v64_v57  ;;  %v68_v4 = vmul.f32 %v257_v59, %v338_v1 }
  0x10   :  { %v100_v0 = vmax.f32 %v84_v56, 0.0  ;;  %v88_v3 = vadd.f32 %v352_v7, %v65_v58  ;;  %v101_v5 = vmax.f32 %v85_v60, 0.0  ;;  %v89_v8 = vadd.f32 %v352_v7, %v66_v62 }
  0x11   :  { %v102_v6 = vmax.f32 %v86_v61, 0.0  ;;  %v90_v9 = vadd.f32 %v352_v7, %v67_v63  ;;  %v103_v10 = vmax.f32 %v87_v2, 0.0  ;;  %v91_v12 = vadd.f32 %v352_v7, %v68_v4 }
  0x12   :  { %v104_v11 = vmax.f32 %v88_v3, 0.0  ;;  %v281_v13 = vpack.c.bf16 %v101_v5, %v100_v0  ;;  %v105_v14 = vmax.f32 %v89_v8, 0.0 }
  0x13   :  { %v106_v15 = vmax.f32 %v90_v9, 0.0  ;;  %v286_v16 = vpack.c.bf16 %v103_v10, %v102_v6  ;;  %v107_v17 = vmax.f32 %v91_v12, 0.0 }
  0x14   :  { %308 = vst [vmem:[%s425_s3 + $0x20] sm:$0xff] %v281_v13   ;;  %v291_v1 = vpack.c.bf16 %v105_v14, %v104_v11 }
  0x15   :  { %309 = vst [vmem:[%s425_s3 + $0x28] sm:$0xff] %v286_v16   ;;  %v296_v18 = vpack.c.bf16 %v107_v17, %v106_v15 }
  0x16   :  { %310 = vst [vmem:[%s425_s3 + $0x30] sm:$0xff] %v291_v1  }
  0x17   :  { %311 = vst [vmem:[%s425_s3 + $0x38] sm:$0xff] %v296_v18  }

// kernel: vgg_block.7
= control target key start
LH: loop header
LB: loop body
LE: loop exit
PB: predicated region body
PF: predicated region fallthrough
CT: control target
= control target key end

     0   :  { %s303_s0 = inlined_call_operand.vmem [shape: bf16[128,128], index: 0, kind: input, shape index: {}]   ;;  %s304_s1 = inlined_call_operand.vmem [shape: f32[1,128], index: 1, kind: input, shape index: {}]   ;;  %s305_s2 = inlined_call_operand.vmem [shape: f32[1,128], index: 2, kind: input, shape index: {}]   ;;  %s306_s3 = inlined_call_operand.vmem [shape: f32[128,128], index: 3, kind: output, shape index: {}]  }
   0x1   :  { %v131_v0 = vld [vmem:[%s303_s0] sm:$0xff]   ;;  %v162_v4 = vld [vmem:[%s303_s0 + $0x8] sm:$0xff]   ;;  %v163_v5 = vld [vmem:[%s303_s0 + $0x10] sm:$0xff]  }
   0x2   :  { %v195_v1 = vld [vmem:[%s304_s1] ss:$0 sm:$0xff]  ;;  %v132_v2 = vunpack.c.l.bf16 %v131_v0  ;;  %v133_v3 = vunpack.c.h.bf16 %v131_v0  ;;  %v164_v6 = vld [vmem:[%s303_s0 + $0x18] sm:$0xff]   ;;  %v136_v8 = vunpack.c.l.bf16 %v162_v4  ;;  %v137_v9 = vunpack.c.h.bf16 %v162_v4  ;;  %v166_v33 = vld [vmem:[%s303_s0 + $0x28] sm:$0xff]  }
   0x3   :  { %v209_v7 = vld [vmem:[%s305_s2] ss:$0 sm:$0xff]  ;;  %v140_v10 = vunpack.c.l.bf16 %v163_v5  ;;  %v141_v11 = vunpack.c.h.bf16 %v163_v5  ;;  %v144_v14 = vunpack.c.l.bf16 %v164_v6  ;;  %v145_v15 = vunpack.c.h.bf16 %v164_v6  ;;  %v167_v34 = vld [vmem:[%s303_s0 + $0x30] sm:$0xff]   ;;  %v168_v39 = vld [vmem:[%s303_s0 + $0x38] sm:$0xff]  }
   0x4   :  { %v53_v12 = vmul.f32 %v132_v2, %v195_v1  ;;  %v54_v13 = vmul.f32 %v133_v3, %v195_v1  ;;  %v55_v16 = vmul.f32 %v136_v8, %v195_v1  ;;  %v56_v17 = vmul.f32 %v137_v9, %v195_v1  ;;  %v165_v28 = vld [vmem:[%s303_s0 + $0x20] sm:$0xff]  }
   0x5   :  { %v57_v18 = vmul.f32 %v140_v10, %v195_v1  ;;  %v58_v19 = vmul.f32 %v141_v11, %v195_v1  ;;  %v59_v22 = vmul.f32 %v144_v14, %v195_v1  ;;  %v60_v23 = vmul.f32 %v145_v15, %v195_v1 }
   0x6   :  { %v76_v20 = vadd.f32 %v209_v7, %v53_v12  ;;  %v77_v21 = vadd.f32 %v209_v7, %v54_v13  ;;  %v78_v24 = vadd.f32 %v209_v7, %v55_v16  ;;  %v79_v25 = vadd.f32 %v209_v7, %v56_v17 }
   0x7   :  { %v80_v26 = vadd.f32 %v209_v7, %v57_v18  ;;  %v81_v27 = vadd.f32 %v209_v7, %v58_v19  ;;  %v82_v31 = vadd.f32 %v209_v7, %v59_v22  ;;  %v83_v32 = vadd.f32 %v209_v7, %v60_v23 }
   0x8   :  { %v92_v29 = vmax.f32 %v76_v20, 0.0  ;;  %v93_v30 = vmax.f32 %v77_v21, 0.0  ;;  %v94_v35 = vmax.f32 %v78_v24, 0.0  ;;  %v95_v36 = vmax.f32 %v79_v25, 0.0 }
   0x9   :  { %v96_v37 = vmax.f32 %v80_v26, 0.0  ;;  %v97_v38 = vmax.f32 %v81_v27, 0.0  ;;  %v98_v40 = vmax.f32 %v82_v31, 0.0  ;;  %v99_v41 = vmax.f32 %v83_v32, 0.0 }
   0xa   :  { %108 = vst [vmem:[%s306_s3] sm:$0xff] %v92_v29  ;;  %109 = vst [vmem:[%s306_s3 + $0x8] sm:$0xff] %v93_v30  ;;  %v148_v42 = vunpack.c.l.bf16 %v165_v28  ;;  %v149_v43 = vunpack.c.h.bf16 %v165_v28  ;;  %v152_v44 = vunpack.c.l.bf16 %v166_v33  ;;  %v153_v45 = vunpack.c.h.bf16 %v166_v33 }
   0xb   :  { %110 = vst [vmem:[%s306_s3 + $0x10] sm:$0xff] %v94_v35  ;;  %111 = vst [vmem:[%s306_s3 + $0x18] sm:$0xff] %v95_v36  ;;  %v156_v46 = vunpack.c.l.bf16 %v167_v34  ;;  %v157_v47 = vunpack.c.h.bf16 %v167_v34  ;;  %v160_v50 = vunpack.c.l.bf16 %v168_v39  ;;  %v161_v51 = vunpack.c.h.bf16 %v168_v39 }
   0xc   :  { %112 = vst [vmem:[%s306_s3 + $0x20] sm:$0xff] %v96_v37  ;;  %113 = vst [vmem:[%s306_s3 + $0x28] sm:$0xff] %v97_v38  ;;  %v61_v48 = vmul.f32 %v148_v42, %v195_v1  ;;  %v62_v49 = vmul.f32 %v149_v43, %v195_v1  ;;  %v63_v52 = vmul.f32 %v152_v44, %v195_v1 }
   0xd   :  { %114 = vst [vmem:[%s306_s3 + $0x30] sm:$0xff] %v98_v40  ;;  %115 = vst [vmem:[%s306_s3 + $0x38] sm:$0xff] %v99_v41  ;;  %v64_v53 = vmul.f32 %v153_v45, %v195_v1  ;;  %v65_v54 = vmul.f32 %v156_v46, %v195_v1  ;;  %v66_v55 = vmul.f32 %v157_v47, %v195_v1 }
   0xe   :  { %v84_v56 = vadd.f32 %v209_v7, %v61_v48  ;;  %v85_v57 = vadd.f32 %v209_v7, %v62_v49  ;;  %v67_v58 = vmul.f32 %v160_v50, %v195_v1  ;;  %v68_v59 = vmul.f32 %v161_v51, %v195_v1 }
   0xf   :  { %v86_v60 = vadd.f32 %v209_v7, %v63_v52  ;;  %v87_v61 = vadd.f32 %v209_v7, %v64_v53  ;;  %v88_v62 = vadd.f32 %v209_v7, %v65_v54  ;;  %v89_v63 = vadd.f32 %v209_v7, %v66_v55 }
  0x10   :  { %v100_v0 = vmax.f32 %v84_v56, 0.0  ;;  %v101_v2 = vmax.f32 %v85_v57, 0.0  ;;  %v90_v3 = vadd.f32 %v209_v7, %v67_v58  ;;  %v91_v4 = vadd.f32 %v209_v7, %v68_v59 }
  0x11   :  { %v102_v5 = vmax.f32 %v86_v60, 0.0  ;;  %v103_v6 = vmax.f32 %v87_v61, 0.0  ;;  %v104_v8 = vmax.f32 %v88_v62, 0.0  ;;  %v105_v9 = vmax.f32 %v89_v63, 0.0 }
  0x12   :  { %116 = vst [vmem:[%s306_s3 + $0x40] sm:$0xff] %v100_v0  ;;  %117 = vst [vmem:[%s306_s3 + $0x48] sm:$0xff] %v101_v2  ;;  %v106_v1 = vmax.f32 %v90_v3, 0.0  ;;  %v107_v10 = vmax.f32 %v91_v4, 0.0 }
  0x13   :  { %118 = vst [vmem:[%s306_s3 + $0x50] sm:$0xff] %v102_v5  ;;  %119 = vst [vmem:[%s306_s3 + $0x58] sm:$0xff] %v103_v6 }
  0x14   :  { %120 = vst [vmem:[%s306_s3 + $0x60] sm:$0xff] %v104_v8  ;;  %121 = vst [vmem:[%s306_s3 + $0x68] sm:$0xff] %v105_v9 }
  0x15   :  { %122 = vst [vmem:[%s306_s3 + $0x70] sm:$0xff] %v106_v1  ;;  %123 = vst [vmem:[%s306_s3 + $0x78] sm:$0xff] %v107_v10 }

// kernel: vgg_block.4
= control target key start
LH: loop header
LB: loop body
LE: loop exit
PB: predicated region body
PF: predicated region fallthrough
CT: control target
= control target key end

     0   :  { %s2952_s18 = smov 0   ;;  %s2954_s19 = smov 0   ;;  %s3666_s0 = inlined_call_operand.vmem [shape: bf16[4,10,18,8], index: 0, kind: input, shape index: {}]   ;;  %s3667_s1 = inlined_call_operand.vmem [shape: bf16[1,72,32], index: 1, kind: input, shape index: {}]   ;;  %s3668_s2 = inlined_call_operand.vmem [shape: f32[1,1,32], index: 2, kind: input, shape index: {}]   ;;  %s3669_s3 = inlined_call_operand.vmem [shape: bf16[2,256,32], index: 3, kind: output, shape index: {0}]   ;;  %s3670_s4 = inlined_call_operand.vmem [shape: f32[4,1,32], index: 4, kind: output, shape index: {1}]   ;;  %s3671_s5 = inlined_call_operand.vmem [shape: f32[4,1,32], index: 5, kind: output, shape index: {2}]  }
   0x1   :  { %s2956_s20 = smov 0   ;;  %s2958_s21 = smov 0  }
   0x2   :  { %s2960_s22 = smov 0  }
   0x3 LB: > { %s31_s23 = sadd.s32 1, %s2904_s20  ;;  %s35_s24 = sadd.s32 1, %s2908_s21  ;;  %s2912_s22 = sphi %s2960_s22, %s16_s22   ;;  %s2908_s21 = sphi %s2958_s21, %s3679_s21   ;;  %s2904_s20 = sphi %s2956_s20, %s3678_s20   ;;  %s2900_s19 = sphi %s2954_s19, %s3677_s19   ;;  %s2896_s18 = sphi %s2952_s18, %s3676_s18  }
   0x4   : > { %p33_p0 = scmp.ge.s32.totalorder %s31_s23, 2  ;;  %p2465_p1 = scmp.ge.s32.totalorder %s2912_s22, 1 }
   0x5   : > { %p243_p2 = scmp.lt.s32.totalorder %s2912_s22, 5 }
   0x6   : > { %s3681_s23 = smov (%p33_p0, %s31_s23), 0  ;;  %s3683_s24 = smov (!%p33_p0, %s35_s24), %s2908_s21 }
   0x7   : > { %p244_p3 = pnand %p2465_p1, %p243_p2  ;;  %p37_p4 = scmp.ge.s32.totalorder %s3683_s24, 2 }
   0x8   : > { %s2466_s25 = sshll.u32 (!%p244_p3), %s2900_s19, 1  ;;  %vm742_vm0 = vcmask (!%p244_p3), 1042432   ;;  %vm743_vm1 = vcmask (!%p244_p3), 1046532   ;;  %s2914_s6 = smov (!%p244_p3), 24   ;;  %vm442_vm3 = vsmask.f32 (!%p244_p3), 3328 }
   0x9   : > { %s3685_s24 = smov (%p37_p4, %s3683_s24), 0  ;;  %247 = sbr.rel (%p244_p3) target bundleno = 537 (0x219), region = 32 }
   0xa   : > { %s300_s26 = sadd.s32 (!%p244_p3), %s2896_s18, %s2466_s25  ;;  %vm2996_vm2 = vmor (!%p244_p3), %vm742_vm0, %vm743_vm1  ;;  %vm443_vm4 = vsmask.f32 (!%p244_p3), 7440  ;;  %s2915_s7 = smov (!%p244_p3), 48   ;;  %vm409_vm6 = vcmask (!%p244_p3), 64512   ;;  %vm685_vm7 = vcmask (!%p244_p3), 130112   ;;  %vm849_vm8 = vcmask (!%p244_p3), 195712  }
   0xb   : > { %p301_p5 = scmp.lt.s32.totalorder (!%p244_p3), %s300_s26, 3  ;;  %s2916_s8 = smov (!%p244_p3), 40   ;;  %vm3041_vm5 = vmor (!%p244_p3), %vm442_vm3, %vm443_vm4  ;;  %vm939_vm9 = vcmask (!%p244_p3), 261312   ;;  %vm1212_vm10 = vcmask (!%p244_p3), 326912   ;;  %vm1373_vm11 = vcmask (!%p244_p3), 392512   ;;  %vm1463_vm12 = vcmask (!%p244_p3), 458112  }
   0xc   : > { %s2917_s9 = smov (!%p244_p3), 16   ;;  %s2918_s10 = smov (!%p244_p3), 8   ;;  %vm1985_vm13 = vcmask (!%p244_p3), 1043456   ;;  %vm1736_vm14 = vcmask (!%p244_p3), 523712   ;;  %vm1897_vm15 = vcmask (!%p244_p3), 589312   ;;  %vm1960_vm0 = vcmask (!%p244_p3), 588800  }
   0xd   : > { %s2919_s11 = smov (!%p244_p3), 32   ;;  %s2920_s25 = smov (!%p244_p3), 56   ;;  %vm2244_vm1 = vcmask (!%p244_p3), 257024   ;;  %vm2124_vm3 = vcmask (!%p244_p3), 253952  }
   0xe   : > { %p312_p6 = scmp.lt.s32.totalorder (!%p244_p3), %s2900_s19, 1 }
  0x10   : > { %s3687_s26 = smov (!%p301_p5, %s300_s26), 3  ;;  %s3689_s19 = smov (!%p312_p6, %s2900_s19), 1 }
  0x11   : > { %s2796_s27 = smul.u32 120, %s3687_s26  ;;  %s331_s16 = scalar_lea.vmem %s3670_s4, %s3687_s26 }
  0x13   : > { %s2994_s30 = scalar_lea.vmem %s3666_s0, %s2796_s27  ;;  %s2921_s27 = smov 64  }
  0x14   : > { %v2845_v1 = vld [vmem:[%s2994_s30 + $0x18] sm:$0xff]   ;;  %v2846_v2 = vld [vmem:[%s2994_s30 + $0xc] sm:$0xff]   ;;  %v2847_v3 = vld [vmem:[%s2994_s30 + $0x24] sm:$0xff]  }
  0x15   : > { %917 = vrot.lane.b32.xlu1 %v2845_v1, %s2914_s6  ;;  %915 = vrot.lane.b32.xlu0 %v2846_v2, %s2914_s6  ;;  %v2848_v4 = vld [vmem:[%s2994_s30 + $0x18] sm:$0xff]   ;;  %v2561_v5 = vld [vmem:[%s2994_s30 + $0xc] sm:$0xe] }
  0x16   : > { %v2562_v6 = vld [vmem:[%s2994_s30 + $0x10] sm:$0xf]  ;;  %v2563_v7 = vld [vmem:[%s2994_s30 + $0x14] sm:$0x1]  ;;  %v2585_v8 = vrot.slane %v2561_v5, 9 }
  0x17   : > { %v1271_v9 = vrot.slane %v2562_v6, 5  ;;  %v1274_v10 = vrot.slane %v2563_v7, 5  ;;  %v694_v11 = vld [vmem:[%s2994_s30] sm:$0xe]  ;;  %v695_v12 = vld [vmem:[%s2994_s30 + $0x4] sm:$0xf] }
  0x18   : > { %v696_v13 = vld [vmem:[%s2994_s30 + $0x8] sm:$0x1]  ;;  %v2489_v14 = vrot.slane %v694_v11, 9  ;;  %v747_v17 = vrot.slane %v695_v12, 5  ;;  %v697_v19 = vld [vmem:[%s2994_s30 + $0xc] sm:$0xe] }
  0x19   : > { %1441 = vrot.lane.b32.xlu1 %v2847_v3, %s2915_s7  ;;  %1439 = vrot.lane.b32.xlu0 %v2848_v4, %s2915_s7  ;;  %v1272_v15 = vsel %vm2996_vm2, %v2585_v8, %v1271_v9  ;;  %v1273_v16 = vrot.slane %v1271_v9, 4  ;;  %v750_v18 = vrot.slane %v696_v13, 5  ;;  %v698_v20 = vld [vmem:[%s2994_s30 + $0x10] sm:$0xf]  ;;  %v699_v21 = vld [vmem:[%s2994_s30 + $0x14] sm:$0x1] }
  0x1a   : > { %v2490_v22 = vrot.slane %v697_v19, 9  ;;  %v748_v24 = vsel %vm2996_vm2, %v2489_v14, %v747_v17  ;;  %v749_v25 = vrot.slane %v747_v17, 4  ;;  %v754_v26 = vrot.slane %v698_v20, 5  ;;  %v418_v27 = vld [vmem:[%s2994_s30] sm:$0xf] }
  0x1b   : > { %v1275_v23 = vsel %vm2996_vm2, %v1273_v16, %v1274_v10  ;;  %v419_v28 = vld [vmem:[%s2994_s30 + $0x4] sm:$0xf]  ;;  %v757_v30 = vrot.slane %v699_v21, 5  ;;  %v420_v31 = vld [vmem:[%s2994_s30 + $0x8] sm:$0x1]  ;;  %v446_v32 = vshrl.u32 %v418_v27, 16 }
  0x1c   : > { %v2593_v29 = vcombine.low %v1272_v15, %v1275_v23  ;;  %v449_v33 = vshll.u32 %v418_v27, 16  ;;  %v751_v34 = vsel %vm2996_vm2, %v749_v25, %v750_v18  ;;  %v755_v35 = vsel %vm2996_vm2, %v2490_v22, %v754_v26  ;;  %v2564_v38 = vld [vmem:[%s2994_s30 + $0x18] sm:$0xe]  ;;  %v2565_v39 = vld [vmem:[%s2994_s30 + $0x1c] sm:$0xf] }
  0x1d   : > { %v756_v36 = vrot.slane %v754_v26, 4  ;;  %v455_v37 = vshll.u32 %v419_v28, 16  ;;  %v2497_v40 = vcombine.low %v748_v24, %v751_v34  ;;  %v448_v41 = vrot.slane %v446_v32, 4  ;;  %v2566_v44 = vld [vmem:[%s2994_s30 + $0x20] sm:$0x1] }
  0x1e   : > { %1349 = vrot.lane.b32.xlu0 %v2593_v29, %s2916_s8  ;;  %v451_v42 = vrot.slane %v449_v33, 5  ;;  %v459_v43 = vshrl.u32 %v419_v28, 16  ;;  %v465_v47 = vshll.u32 %v420_v31, 16  ;;  %v2586_v48 = vrot.slane %v2564_v38, 9  ;;  %v421_v49 = vld [vmem:[%s2994_s30 + $0xc] sm:$0xf] }
  0x1f   : > { %v758_v45 = vsel %vm2996_vm2, %v756_v36, %v757_v30  ;;  %v457_v46 = vrot.slane %v455_v37, 5  ;;  %825 = vrot.lane.b32.xlu1 %v2497_v40, %s2917_s9  ;;  %v1278_v53 = vrot.slane %v2565_v39, 5  ;;  %v422_v54 = vld [vmem:[%s2994_s30 + $0x10] sm:$0xf]  ;;  %v1281_v57 = vrot.slane %v2566_v44, 5 }
  0x20   : > { %v2498_v50 = vcombine.low %v755_v35, %v758_v45  ;;  %v452_v51 = vor.u32 %v451_v42, %v448_v41  ;;  %v461_v52 = vrot.slane %v459_v43, 4  ;;  %v467_v56 = vrot.slane %v465_v47, 5  ;;  %v423_v58 = vld [vmem:[%s2994_s30 + $0x14] sm:$0x1]  ;;  %v2532_v6 = vld [vmem:[%s2994_s30 + $0x18] sm:$0xf] }
  0x21   : > { %v470_v59 = vshrl.u32 %v421_v49, 16  ;;  %v473_v60 = vshll.u32 %v421_v49, 16  ;;  %v1279_v63 = vsel %vm2996_vm2, %v2586_v48, %v1278_v53  ;;  %v1280_v1 = vrot.slane %v1278_v53, 4  ;;  %v2533_v11 = vld [vmem:[%s2994_s30 + $0x1c] sm:$0xf] }
  0x22   : > { %v453_v61 = vrot.slane %v452_v51, 4  ;;  %v462_v62 = vor.u32 %v461_v52, %v457_v46  ;;  %v479_v4 = vshll.u32 %v422_v54, 16  ;;  %v483_v5 = vshrl.u32 %v422_v54, 16  ;;  %v2534_v16 = vld [vmem:[%s2994_s30 + $0x20] sm:$0x1] }
  0x23   : > { %v472_v2 = vrot.slane %v470_v59, 4  ;;  %v475_v3 = vrot.slane %v473_v60, 5  ;;  %827 = vrot.lane.b32.xlu1 %v2498_v50, %s2917_s9  ;;  %v1282_v9 = vsel %vm2996_vm2, %v1280_v1, %v1281_v57  ;;  %v489_v10 = vshll.u32 %v423_v58, 16  ;;  %v2529_v21 = vld [vmem:[%s2994_s30 + $0xc] sm:$0xf] }
  0x24   : > { %v458_v7 = vsel %vm3041_vm5, %v453_v61, %v457_v46  ;;  %v463_v8 = vrot.slane %v462_v62, 4  ;;  %v2594_v12 = vcombine.low %v1279_v63, %v1282_v9  ;;  %v481_v14 = vrot.slane %v479_v4, 5  ;;  %v2530_v30 = vld [vmem:[%s2994_s30 + $0x10] sm:$0xf]  ;;  %v2531_v34 = vld [vmem:[%s2994_s30 + $0x14] sm:$0x1] }
  0x25   : > { %v476_v13 = vor.u32 %v475_v3, %v472_v2  ;;  %v485_v15 = vrot.slane %v483_v5, 4  ;;  %v491_v18 = vrot.slane %v489_v10, 5  ;;  %v997_v19 = vshrl.u32 %v2532_v6, 16  ;;  %v2625_v40 = vld [vmem:[%s2994_s30 + $0x18] sm:$0xf] }
  0x26   : > { %v468_v17 = vsel %vm3041_vm5, %v463_v8, %v467_v56  ;;  %v1000_v20 = vshll.u32 %v2532_v6, 16  ;;  %v1006_v25 = vshll.u32 %v2533_v11, 16  ;;  %v1010_v28 = vshrl.u32 %v2533_v11, 16  ;;  %v2626_v49 = vld [vmem:[%s2994_s30 + $0x1c] sm:$0xf] }
  0x27   : > { %v2481_v22 = vcombine.low %v458_v7, %v468_v17  ;;  %v477_v23 = vrot.slane %v476_v13, 4  ;;  %v486_v24 = vor.u32 %v485_v15, %v481_v14  ;;  %1351 = vrot.lane.b32.xlu1 %v2594_v12, %s2916_s8  ;;  %v999_v26 = vrot.slane %v997_v19, 4  ;;  %v2627_v58 = vld [vmem:[%s2994_s30 + $0x20] sm:$0x1]  ;;  %v2628_v1 = vld [vmem:[%s2994_s30 + $0x24] sm:$0xf] }
  0x28   : > { %v1002_v27 = vrot.slane %v1000_v20, 5  ;;  %v1016_v29 = vshll.u32 %v2534_v16, 16  ;;  %v1008_v33 = vrot.slane %v1006_v25, 5  ;;  %v973_v35 = vshrl.u32 %v2529_v21, 16  ;;  %v2629_v6 = vld [vmem:[%s2994_s30 + $0x28] sm:$0xf] }
  0x29   : > { %661 = vrot.lane.b32.xlu0 %v2481_v22, %s2918_s10  ;;  %v482_v31 = vsel %vm3041_vm5, %v477_v23, %v481_v14  ;;  %v487_v32 = vrot.slane %v486_v24, 4  ;;  %v1012_v37 = vrot.slane %v1010_v28, 4  ;;  %v976_v39 = vshll.u32 %v2529_v21, 16  ;;  %v2630_v14 = vld [vmem:[%s2994_s30 + $0x2c] sm:$0x1]  ;;  %v2863_v22 = vld [vmem:[%s3667_s1] sm:$0xff]  }
  0x2a   : > { %v1003_v36 = vor.u32 %v1002_v27, %v999_v26  ;;  %v1018_v38 = vrot.slane %v1016_v29, 5  ;;  %v975_v42 = vrot.slane %v973_v35, 4  ;;  %v982_v43 = vshll.u32 %v2530_v30, 16  ;;  %v2657_v16 = vld [vmem:[%s2994_s30 + $0x18] sm:$0xe]  ;;  %2758 = vmatprep.subr.bf16.mxu0 %v2863_v22  ;;  %2784 = vmatprep.subr.bf16.mxu1 %v2863_v22 }
  0x2b   : > { %v492_v41 = vsel %vm3041_vm5, %v487_v32, %v491_v18  ;;  %v986_v44 = vshrl.u32 %v2530_v30, 16  ;;  %v1013_v47 = vor.u32 %v1012_v37, %v1008_v33  ;;  %v978_v48 = vrot.slane %v976_v39, 5  ;;  %v2658_v21 = vld [vmem:[%s2994_s30 + $0x1c] sm:$0xf]  ;;  %v2659_v27 = vld [vmem:[%s2994_s30 + $0x20] sm:$0x1]  ;;  %2759 = vmatpush3.bf16.msra.mxu0 %v2863_v22  ;;  %2789 = vmatpush3.bf16.msra.mxu1 %v2863_v22 }
  0x2c   : > { %v2482_v45 = vcombine.low %v482_v31, %v492_v41  ;;  %v1004_v46 = vrot.slane %v1003_v36, 4  ;;  %v984_v50 = vrot.slane %v982_v43, 5  ;;  %v992_v52 = vshll.u32 %v2531_v34, 16  ;;  %v424_v32 = vld [vmem:[%s2994_s30 + $0x18] sm:$0xf] }
  0x2d   : > { %v988_v51 = vrot.slane %v986_v44, 4  ;;  %v1497_v53 = vshrl.u32 %v2625_v40, 16  ;;  %v1014_v56 = vrot.slane %v1013_v47, 4  ;;  %v979_v57 = vor.u32 %v978_v48, %v975_v42  ;;  %v425_v37 = vld [vmem:[%s2994_s30 + $0x1c] sm:$0xf] }
  0x2e   : > { %663 = vrot.lane.b32.xlu0 %v2482_v45, %s2918_s10  ;;  %v1009_v54 = vsel %vm3041_vm5, %v1004_v46, %v1008_v33  ;;  %v1500_v59 = vshll.u32 %v2625_v40, 16  ;;  %v994_v61 = vrot.slane %v992_v52, 5  ;;  %v1506_v63 = vshll.u32 %v2626_v49, 16  ;;  %v426_v43 = vld [vmem:[%s2994_s30 + $0x20] sm:$0x1]  ;;  %v2865_v45 = vld [vmem:[%s3667_s1 + $0x10] sm:$0xff]  }
  0x2f   : > { %v989_v60 = vor.u32 %v988_v51, %v984_v50  ;;  %v1499_v62 = vrot.slane %v1497_v53, 4  ;;  %v1019_v2 = vsel %vm3041_vm5, %v1014_v56, %v1018_v38  ;;  %v980_v3 = vrot.slane %v979_v57, 4  ;;  %v2864_v38 = vld [vmem:[%s3667_s1 + $0x8] sm:$0xff]   ;;  %v2660_v44 = vld [vmem:[%s2994_s30 + $0x24] sm:$0xe] }
  0x30   : > { %v1502_v4 = vrot.slane %v1500_v59, 5  ;;  %v1510_v5 = vshrl.u32 %v2626_v49, 16  ;;  %v2554_v7 = vcombine.low %v1009_v54, %v1019_v2  ;;  %v1508_v9 = vrot.slane %v1506_v63, 5  ;;  %2760 = vmatprep.subr.bf16.mxu0 %v2864_v38  ;;  %2785 = vmatprep.subr.bf16.mxu1 %v2864_v38  ;;  %v2661_v54 = vld [vmem:[%s2994_s30 + $0x28] sm:$0xf] }
  0x31   : > { %v990_v8 = vrot.slane %v989_v60, 4  ;;  %v1516_v10 = vshll.u32 %v2627_v58, 16  ;;  %v985_v11 = vsel %vm3041_vm5, %v980_v3, %v984_v50  ;;  %v1521_v15 = vshrl.u32 %v2628_v1, 16  ;;  %v2662_v60 = vld [vmem:[%s2994_s30 + $0x2c] sm:$0x1]  ;;  %2761 = vmatpush3.bf16.msra.mxu0 %v2864_v38  ;;  %2790 = vmatpush3.bf16.msra.mxu1 %v2864_v38 }
  0x32   : > { %v1503_v12 = vor.u32 %v1502_v4, %v1499_v62  ;;  %v1512_v13 = vrot.slane %v1510_v5, 4  ;;  %1190 = vrot.lane.b32.xlu1 %v2554_v7, %s2919_s11  ;;  %v1524_v19 = vshll.u32 %v2628_v1, 16  ;;  %v1530_v20 = vshll.u32 %v2629_v6, 16  ;;  %v427_v2 = vld [vmem:[%s2994_s30 + $0x24] sm:$0xf]  ;;  %2762 = vmatprep.subr.bf16.mxu0 %v2865_v45 }
  0x33   : > { %v995_v17 = vsel %vm3041_vm5, %v990_v8, %v994_v61  ;;  %v1518_v18 = vrot.slane %v1516_v10, 5  ;;  %v1523_v26 = vrot.slane %v1521_v15, 4  ;;  %v1534_v30 = vshrl.u32 %v2629_v6, 16  ;;  %2786 = vmatprep.subr.bf16.mxu1 %v2865_v45  ;;  %v429_v15 = vld [vmem:[%s2994_s30 + $0x2c] sm:$0x1] }
  0x34   : > { %v2553_v23 = vcombine.low %v985_v11, %v995_v17  ;;  %v1504_v24 = vrot.slane %v1503_v12, 4  ;;  %v1513_v25 = vor.u32 %v1512_v13, %v1508_v9  ;;  %v1526_v28 = vrot.slane %v1524_v19, 5  ;;  %v428_v11 = vld [vmem:[%s2994_s30 + $0x28] sm:$0xf]  ;;  %v700_v17 = vld [vmem:[%s2994_s30 + $0x18] sm:$0xe] }
  0x35   : > { %v1532_v29 = vrot.slane %v1530_v20, 5  ;;  %v1540_v31 = vshll.u32 %v2630_v14, 16  ;;  %v2681_v35 = vrot.slane %v2657_v16, 9  ;;  %v1795_v36 = vrot.slane %v2658_v21, 5  ;;  %2763 = vmatpush3.bf16.msra.mxu0 %v2865_v45  ;;  %v701_v22 = vld [vmem:[%s2994_s30 + $0x1c] sm:$0xf]  ;;  %2791 = vmatpush3.bf16.msra.mxu1 %v2865_v45 }
  0x36   : > { %1188 = vrot.lane.b32.xlu0 %v2553_v23, %s2919_s11  ;;  %v1509_v33 = vsel %vm3041_vm5, %v1504_v24, %v1508_v9  ;;  %v1514_v34 = vrot.slane %v1513_v25, 4  ;;  %v1527_v39 = vor.u32 %v1526_v28, %v1523_v26  ;;  %v1536_v40 = vrot.slane %v1534_v30, 4  ;;  %v702_v23 = vld [vmem:[%s2994_s30 + $0x20] sm:$0x1]  ;;  %v703_v24 = vld [vmem:[%s2994_s30 + $0x24] sm:$0xe] }
  0x37   : > { %v1542_v41 = vrot.slane %v1540_v31, 5  ;;  %v1798_v42 = vrot.slane %v2659_v27, 5  ;;  %v1796_v47 = vsel %vm2996_vm2, %v2681_v35, %v1795_v36  ;;  %v1797_v48 = vrot.slane %v1795_v36, 4  ;;  %v2867_v25 = vld [vmem:[%s3667_s1 + $0x18] sm:$0xff]   ;;  %v704_v30 = vld [vmem:[%s2994_s30 + $0x28] sm:$0xf] }
  0x38   : > { %v1519_v46 = vsel %vm3041_vm5, %v1514_v34, %v1518_v18  ;;  %v494_v49 = vshrl.u32 %v424_v32, 16  ;;  %v1528_v51 = vrot.slane %v1527_v39, 4  ;;  %v1537_v52 = vor.u32 %v1536_v40, %v1532_v29  ;;  %v705_v31 = vld [vmem:[%s2994_s30 + $0x2c] sm:$0x1]  ;;  %v2535_v36 = vld [vmem:[%s2994_s30 + $0x24] sm:$0xf]  ;;  %2764 = vmatprep.subr.bf16.mxu0 %v2867_v25  ;;  %2787 = vmatprep.subr.bf16.mxu1 %v2867_v25 }
  0x39   : > { %v2649_v50 = vcombine.low %v1509_v33, %v1519_v46  ;;  %v497_v53 = vshll.u32 %v424_v32, 16  ;;  %v1799_v56 = vsel %vm2996_vm2, %v1797_v48, %v1798_v42  ;;  %v503_v58 = vshll.u32 %v425_v37, 16  ;;  %2765 = vmatpush3.bf16.msra.mxu0 %v2867_v25  ;;  %2792 = vmatpush3.bf16.msra.mxu1 %v2867_v25 }
  0x3a   : > { %v496_v57 = vrot.slane %v494_v49, 4  ;;  %v507_v59 = vshrl.u32 %v425_v37, 16  ;;  %v1533_v61 = vsel %vm3041_vm5, %v1528_v51, %v1532_v29  ;;  %v1538_v62 = vrot.slane %v1537_v52, 4  ;;  %v2536_v52 = vld [vmem:[%s2994_s30 + $0x28] sm:$0xf] }
  0x3b   : > { %1712 = vrot.lane.b32.xlu0 %v2649_v50, %s2920_s25  ;;  %v2689_v63 = vcombine.low %v1796_v47, %v1799_v56  ;;  %v499_v1 = vrot.slane %v497_v53, 5  ;;  %v505_v3 = vrot.slane %v503_v58, 5  ;;  %v513_v5 = vshll.u32 %v426_v43, 16 }
  0x3c   : > { %v509_v4 = vrot.slane %v507_v59, 4  ;;  %v2682_v6 = vrot.slane %v2660_v44, 9  ;;  %v1543_v7 = vsel %vm3041_vm5, %v1538_v62, %v1542_v41  ;;  %v1802_v9 = vrot.slane %v2661_v54, 5  ;;  %v2537_v62 = vld [vmem:[%s2994_s30 + $0x2c] sm:$0x1] }
  0x3d   : > { %v500_v8 = vor.u32 %v499_v1, %v496_v57  ;;  %v1805_v10 = vrot.slane %v2662_v60, 5  ;;  %v2650_v12 = vcombine.low %v1533_v61, %v1543_v7  ;;  %v515_v14 = vrot.slane %v513_v5, 5  ;;  %v2538_v5 = vld [vmem:[%s2994_s30 + $0x30] sm:$0xf] }
  0x3e   : > { %v510_v13 = vor.u32 %v509_v4, %v505_v3  ;;  %v518_v16 = vshrl.u32 %v427_v2, 16  ;;  %v1803_v19 = vsel %vm2996_vm2, %v2682_v6, %v1802_v9  ;;  %v1804_v20 = vrot.slane %v1802_v9, 4  ;;  %v2539_v6 = vld [vmem:[%s2994_s30 + $0x34] sm:$0xf] }
  0x3f   : > { %1873 = vrot.lane.b32.xlu0 %v2689_v63, %s2921_s27  ;;  %v501_v18 = vrot.slane %v500_v8, 4  ;;  %v521_v21 = vshll.u32 %v427_v2, 16  ;;  %1714 = vrot.lane.b32.xlu1 %v2650_v12, %s2920_s25  ;;  %v527_v28 = vshll.u32 %v428_v11, 16  ;;  %v531_v29 = vshrl.u32 %v428_v11, 16  ;;  %v2540_v12 = vld [vmem:[%s2994_s30 + $0x38] sm:$0x1] }
  0x40   : > { %v511_v26 = vrot.slane %v510_v13, 4  ;;  %v520_v27 = vrot.slane %v518_v16, 4  ;;  %v1806_v33 = vsel %vm2996_vm2, %v1804_v20, %v1805_v10  ;;  %v537_v35 = vshll.u32 %v429_v15, 16  ;;  %v2849_v10 = vld [vmem:[%s2994_s30 + $0x24] sm:$0xff]  }
  0x41   : > { %v506_v32 = vsel %vm3041_vm5, %v501_v18, %v505_v3  ;;  %v523_v34 = vrot.slane %v521_v21, 5  ;;  %v2690_v38 = vcombine.low %v1803_v19, %v1806_v33  ;;  %v529_v39 = vrot.slane %v527_v28, 5  ;;  %v2567_v13 = vld [vmem:[%s2994_s30 + $0x24] sm:$0xe]  ;;  %v2568_v18 = vld [vmem:[%s2994_s30 + $0x28] sm:$0xf] }
  0x42   : > { %v516_v37 = vsel %vm3041_vm5, %v511_v26, %v515_v14  ;;  %v533_v40 = vrot.slane %v531_v29, 4  ;;  %v539_v43 = vrot.slane %v537_v35, 5  ;;  %v2491_v44 = vrot.slane %v700_v17, 9  ;;  %v2569_v19 = vld [vmem:[%s2994_s30 + $0x2c] sm:$0x1] }
  0x43   : > { %v2483_v41 = vcombine.low %v506_v32, %v516_v37  ;;  %v524_v42 = vor.u32 %v523_v34, %v520_v27  ;;  %1875 = vrot.lane.b32.xlu0 %v2690_v38, %s2921_s27  ;;  %v761_v46 = vrot.slane %v701_v22, 5  ;;  %v764_v47 = vrot.slane %v702_v23, 5  ;;  %v2571_v29 = vld [vmem:[%s2994_s30 + $0x34] sm:$0xf]  ;;  %v2572_v34 = vld [vmem:[%s2994_s30 + $0x38] sm:$0x1] }
  0x44   : > { %v534_v45 = vor.u32 %v533_v40, %v529_v39  ;;  %v2492_v48 = vrot.slane %v703_v24, 9  ;;  %v768_v50 = vrot.slane %v704_v30, 5  ;;  %v771_v51 = vrot.slane %v705_v31, 5  ;;  %v2570_v24 = vld [vmem:[%s2994_s30 + $0x30] sm:$0xe] }
  0x45   : > { %665 = vrot.lane.b32.xlu1 %v2483_v41, %s2918_s10  ;;  %v525_v49 = vrot.slane %v524_v42, 4  ;;  %v1021_v53 = vshrl.u32 %v2535_v36, 16  ;;  %v762_v56 = vsel %vm2996_vm2, %v2491_v44, %v761_v46  ;;  %v763_v57 = vrot.slane %v761_v46, 4 }
  0x46   : > { %v535_v54 = vrot.slane %v534_v45, 4  ;;  %v1024_v58 = vshll.u32 %v2535_v36, 16  ;;  %v769_v60 = vsel %vm2996_vm2, %v2492_v48, %v768_v50  ;;  %v770_v61 = vrot.slane %v768_v50, 4  ;;  %v2631_v48 = vld [vmem:[%s2994_s30 + $0x30] sm:$0xf] }
  0x47   : > { %v530_v59 = vsel %vm3041_vm5, %v525_v49, %v529_v39  ;;  %v1023_v63 = vrot.slane %v1021_v53, 4  ;;  %v765_v2 = vsel %vm2996_vm2, %v763_v57, %v764_v47  ;;  %v1030_v4 = vshll.u32 %v2536_v52, 16  ;;  %v2850_v39 = vld [vmem:[%s2994_s30 + $0x30] sm:$0xff]  }
  0x48   : > { %v540_v1 = vsel %vm3041_vm5, %v535_v54, %v539_v43  ;;  %v1026_v3 = vrot.slane %v1024_v58, 5  ;;  %v2499_v8 = vcombine.low %v762_v56, %v765_v2  ;;  %v772_v9 = vsel %vm2996_vm2, %v770_v61, %v771_v51  ;;  %v2632_v53 = vld [vmem:[%s2994_s30 + $0x34] sm:$0xf]  ;;  %v2635_v2 = vld [vmem:[%s2994_s30 + $0x40] sm:$0xf] }
  0x49   : > { %v2484_v7 = vcombine.low %v530_v59, %v540_v1  ;;  %v1034_v11 = vshrl.u32 %v2536_v52, 16  ;;  %v2500_v14 = vcombine.low %v769_v60, %v772_v9  ;;  %v1032_v16 = vrot.slane %v1030_v4, 5  ;;  %v2633_v59 = vld [vmem:[%s2994_s30 + $0x38] sm:$0x1]  ;;  %v2634_v60 = vld [vmem:[%s2994_s30 + $0x3c] sm:$0xf] }
  0x4a   : > { %v1027_v15 = vor.u32 %v1026_v3, %v1023_v63  ;;  %v1040_v17 = vshll.u32 %v2537_v62, 16  ;;  %829 = vrot.lane.b32.xlu0 %v2499_v8, %s2917_s9  ;;  %v1045_v21 = vshrl.u32 %v2538_v5, 16  ;;  %v1048_v22 = vshll.u32 %v2538_v5, 16  ;;  %v2636_v3 = vld [vmem:[%s2994_s30 + $0x44] sm:$0x1] }
  0x4b   : > { %667 = vrot.lane.b32.xlu1 %v2484_v7, %s2918_s10  ;;  %v1036_v20 = vrot.slane %v1034_v11, 4  ;;  %v1054_v23 = vshll.u32 %v2539_v6, 16  ;;  %v1058_v27 = vshrl.u32 %v2539_v6, 16  ;;  %v1064_v28 = vshll.u32 %v2540_v12, 16 }
  0x4c   : > { %v1028_v25 = vrot.slane %v1027_v15, 4  ;;  %v1042_v26 = vrot.slane %v1040_v17, 5  ;;  %v1047_v31 = vrot.slane %v1045_v21, 4  ;;  %v1050_v32 = vrot.slane %v1048_v22, 5  ;;  %v2851_v17 = vld [vmem:[%s2994_s30 + $0x30] sm:$0xff]  }
  0x4d   : > { %v1037_v30 = vor.u32 %v1036_v20, %v1032_v16  ;;  %v1056_v33 = vrot.slane %v1054_v23, 5  ;;  %v1060_v36 = vrot.slane %v1058_v27, 4  ;;  %v1066_v37 = vrot.slane %v1064_v28, 5  ;;  %v2664_v22 = vld [vmem:[%s2994_s30 + $0x34] sm:$0xf] }
  0x4e   : > { %v1033_v35 = vsel %vm3041_vm5, %v1028_v25, %v1032_v16  ;;  %v2587_v38 = vrot.slane %v2567_v13, 9  ;;  %919 = vrot.lane.b32.xlu0 %v2849_v10, %s2914_s6  ;;  %v1051_v41 = vor.u32 %v1050_v32, %v1047_v31  ;;  %v1285_v42 = vrot.slane %v2568_v18, 5  ;;  %v2663_v16 = vld [vmem:[%s2994_s30 + $0x30] sm:$0xe]  ;;  %v2665_v27 = vld [vmem:[%s2994_s30 + $0x38] sm:$0x1] }
  0x4f   : > { %831 = vrot.lane.b32.xlu1 %v2500_v14, %s2917_s9  ;;  %v1038_v40 = vrot.slane %v1037_v30, 4  ;;  %v1288_v43 = vrot.slane %v2569_v19, 5  ;;  %v1061_v44 = vor.u32 %v1060_v36, %v1056_v33  ;;  %v2588_v45 = vrot.slane %v2570_v24, 9  ;;  %v430_v32 = vld [vmem:[%s2994_s30 + $0x30] sm:$0xf] }
  0x50   : > { %v1292_v46 = vrot.slane %v2571_v29, 5  ;;  %v1295_v47 = vrot.slane %v2572_v34, 5  ;;  %v1052_v50 = vrot.slane %v1051_v41, 4  ;;  %v1286_v51 = vsel %vm2996_vm2, %v2587_v38, %v1285_v42  ;;  %v2852_v38 = vld [vmem:[%s2994_s30 + $0x3c] sm:$0xff]  }
  0x51   : > { %v1043_v49 = vsel %vm3041_vm5, %v1038_v40, %v1042_v26  ;;  %v1287_v52 = vrot.slane %v1285_v42, 4  ;;  %v1062_v56 = vrot.slane %v1061_v44, 4  ;;  %v1545_v63 = vshrl.u32 %v2631_v48, 16 }
  0x52   : > { %v2555_v54 = vcombine.low %v1033_v35, %v1043_v49  ;;  %v1293_v57 = vsel %vm2996_vm2, %v2588_v45, %v1292_v46  ;;  %v1294_v58 = vrot.slane %v1292_v46, 4  ;;  %v1057_v61 = vsel %vm3041_vm5, %v1052_v50, %v1056_v33  ;;  %v432_v46 = vld [vmem:[%s2994_s30 + $0x38] sm:$0x1] }
  0x53   : > { %921 = vrot.lane.b32.xlu1 %v2850_v39, %s2914_s6  ;;  %v1289_v62 = vsel %vm2996_vm2, %v1287_v52, %v1288_v43  ;;  %v1548_v1 = vshll.u32 %v2631_v48, 16  ;;  %v1067_v4 = vsel %vm3041_vm5, %v1062_v56, %v1066_v37  ;;  %v1554_v7 = vshll.u32 %v2632_v53, 16  ;;  %v431_v37 = vld [vmem:[%s2994_s30 + $0x34] sm:$0xf]  ;;  %v2666_v48 = vld [vmem:[%s2994_s30 + $0x3c] sm:$0xe] }
  0x54   : > { %1192 = vrot.lane.b32.xlu0 %v2555_v54, %s2919_s11  ;;  %v2595_v5 = vcombine.low %v1286_v51, %v1289_v62  ;;  %v1296_v6 = vsel %vm2996_vm2, %v1294_v58, %v1295_v47  ;;  %v2556_v8 = vcombine.low %v1057_v61, %v1067_v4  ;;  %v1547_v10 = vrot.slane %v1545_v63, 4 }
  0x55   : > { %v2596_v9 = vcombine.low %v1293_v57, %v1296_v6  ;;  %v1550_v11 = vrot.slane %v1548_v1, 5  ;;  %v1556_v12 = vrot.slane %v1554_v7, 5  ;;  %v1558_v13 = vshrl.u32 %v2632_v53, 16  ;;  %v2667_v53 = vld [vmem:[%s2994_s30 + $0x40] sm:$0xf] }
  0x56   : > { %v1564_v14 = vshll.u32 %v2633_v59, 16  ;;  %v1569_v15 = vshrl.u32 %v2634_v60, 16  ;;  %v1572_v19 = vshll.u32 %v2634_v60, 16  ;;  %v1578_v20 = vshll.u32 %v2635_v2, 16  ;;  %v2668_v59 = vld [vmem:[%s2994_s30 + $0x44] sm:$0x1] }
  0x57   : > { %1194 = vrot.lane.b32.xlu1 %v2556_v8, %s2919_s11  ;;  %v1551_v18 = vor.u32 %v1550_v11, %v1547_v10  ;;  %v1582_v21 = vshrl.u32 %v2635_v2, 16  ;;  %v1560_v23 = vrot.slane %v1558_v13, 4  ;;  %v1588_v26 = vshll.u32 %v2636_v3, 16  ;;  %v433_v60 = vld [vmem:[%s2994_s30 + $0x3c] sm:$0xf] }
  0x58   : > { %1353 = vrot.lane.b32.xlu0 %v2595_v5, %s2916_s8  ;;  %v1566_v24 = vrot.slane %v1564_v14, 5  ;;  %v1571_v25 = vrot.slane %v1569_v15, 4  ;;  %v1574_v29 = vrot.slane %v1572_v19, 5  ;;  %v1580_v30 = vrot.slane %v1578_v20, 5  ;;  %v434_v2 = vld [vmem:[%s2994_s30 + $0x40] sm:$0xf] }
  0x59   : > { %v1552_v28 = vrot.slane %v1551_v18, 4  ;;  %v1584_v31 = vrot.slane %v1582_v21, 4  ;;  %v1561_v33 = vor.u32 %v1560_v23, %v1556_v12  ;;  %v1590_v34 = vrot.slane %v1588_v26, 5  ;;  %v435_v13 = vld [vmem:[%s2994_s30 + $0x44] sm:$0x1] }
  0x5a   : > { %v2683_v35 = vrot.slane %v2663_v16, 9  ;;  %v1809_v36 = vrot.slane %v2664_v22, 5  ;;  %v1575_v40 = vor.u32 %v1574_v29, %v1571_v25  ;;  %v1812_v42 = vrot.slane %v2665_v27, 5  ;;  %v706_v16 = vld [vmem:[%s2994_s30 + $0x30] sm:$0xe] }
  0x5b   : > { %1355 = vrot.lane.b32.xlu1 %v2596_v9, %s2916_s8  ;;  %v1557_v39 = vsel %vm3041_vm5, %v1552_v28, %v1556_v12  ;;  %v1585_v41 = vor.u32 %v1584_v31, %v1580_v30  ;;  %v1562_v43 = vrot.slane %v1561_v33, 4  ;;  %v542_v47 = vshrl.u32 %v430_v32, 16  ;;  %v707_v21 = vld [vmem:[%s2994_s30 + $0x34] sm:$0xf]  ;;  %v708_v26 = vld [vmem:[%s2994_s30 + $0x38] sm:$0x1] }
  0x5c   : > { %1443 = vrot.lane.b32.xlu0 %v2851_v17, %s2915_s7  ;;  %v1810_v44 = vsel %vm2996_vm2, %v2683_v35, %v1809_v36  ;;  %v1811_v45 = vrot.slane %v1809_v36, 4  ;;  %v1576_v49 = vrot.slane %v1575_v40, 4  ;;  %v545_v51 = vshll.u32 %v430_v32, 16  ;;  %v709_v31 = vld [vmem:[%s2994_s30 + $0x3c] sm:$0xe] }
  0x5d   : > { %v1586_v50 = vrot.slane %v1585_v41, 4  ;;  %v551_v52 = vshll.u32 %v431_v37, 16  ;;  %v1567_v54 = vsel %vm3041_vm5, %v1562_v43, %v1566_v24  ;;  %v544_v57 = vrot.slane %v542_v47, 4  ;;  %v710_v36 = vld [vmem:[%s2994_s30 + $0x40] sm:$0xf] }
  0x5e   : > { %v1813_v56 = vsel %vm2996_vm2, %v1811_v45, %v1812_v42  ;;  %v555_v58 = vshrl.u32 %v431_v37, 16  ;;  %v2651_v61 = vcombine.low %v1557_v39, %v1567_v54  ;;  %v1581_v62 = vsel %vm3041_vm5, %v1576_v49, %v1580_v30  ;;  %v711_v37 = vld [vmem:[%s2994_s30 + $0x44] sm:$0x1] }
  0x5f   : > { %1445 = vrot.lane.b32.xlu1 %v2852_v38, %s2915_s7  ;;  %v1591_v63 = vsel %vm3041_vm5, %v1586_v50, %v1590_v34  ;;  %v2691_v1 = vcombine.low %v1810_v44, %v1813_v56  ;;  %v547_v4 = vrot.slane %v545_v51, 5  ;;  %v553_v5 = vrot.slane %v551_v52, 5  ;;  %v2541_v38 = vld [vmem:[%s2994_s30 + $0x3c] sm:$0xf]  ;;  %v2542_v50 = vld [vmem:[%s2994_s30 + $0x40] sm:$0xf] }
  0x60   : > { %v2652_v3 = vcombine.low %v1581_v62, %v1591_v63  ;;  %v557_v6 = vrot.slane %v555_v58, 4  ;;  %1716 = vrot.lane.b32.xlu0 %v2651_v61, %s2920_s25  ;;  %v561_v7 = vshll.u32 %v432_v46, 16  ;;  %v2684_v8 = vrot.slane %v2666_v48, 9  ;;  %v2543_v56 = vld [vmem:[%s2994_s30 + $0x44] sm:$0x1] }
  0x61   : > { %v1816_v9 = vrot.slane %v2667_v53, 5  ;;  %v1819_v10 = vrot.slane %v2668_v59, 5  ;;  %v548_v11 = vor.u32 %v547_v4, %v544_v57  ;;  %v566_v14 = vshrl.u32 %v433_v60, 16  ;;  %v2544_v62 = vld [vmem:[%s2994_s30 + $0x48] sm:$0xf] }
  0x62   : > { %v558_v12 = vor.u32 %v557_v6, %v553_v5  ;;  %v569_v15 = vshll.u32 %v433_v60, 16  ;;  %v563_v17 = vrot.slane %v561_v7, 5  ;;  %v575_v20 = vshll.u32 %v434_v2, 16  ;;  %v2545_v4 = vld [vmem:[%s2994_s30 + $0x4c] sm:$0xf] }
  0x63   : > { %1718 = vrot.lane.b32.xlu1 %v2652_v3, %s2920_s25  ;;  %v1817_v18 = vsel %vm2996_vm2, %v2684_v8, %v1816_v9  ;;  %v1818_v19 = vrot.slane %v1816_v9, 4  ;;  %v549_v22 = vrot.slane %v548_v11, 4  ;;  %v568_v24 = vrot.slane %v566_v14, 4  ;;  %v2546_v9 = vld [vmem:[%s2994_s30 + $0x50] sm:$0x1] }
  0x64   : > { %v559_v23 = vrot.slane %v558_v12, 4  ;;  %v571_v25 = vrot.slane %v569_v15, 5  ;;  %1877 = vrot.lane.b32.xlu0 %v2691_v1, %s2921_s27  ;;  %v577_v28 = vrot.slane %v575_v20, 5  ;;  %v579_v29 = vshrl.u32 %v434_v2, 16 }
  0x65   : > { %v1820_v27 = vsel %vm2996_vm2, %v1818_v19, %v1819_v10  ;;  %v585_v30 = vshll.u32 %v435_v13, 16  ;;  %v554_v32 = vsel %vm3041_vm5, %v549_v22, %v553_v5  ;;  %v2493_v42 = vrot.slane %v706_v16, 9  ;;  %v2573_v10 = vld [vmem:[%s2994_s30 + $0x3c] sm:$0xe]  ;;  %v2574_v16 = vld [vmem:[%s2994_s30 + $0x40] sm:$0xf] }
  0x66   : > { %v564_v33 = vsel %vm3041_vm5, %v559_v23, %v563_v17  ;;  %v2692_v34 = vcombine.low %v1817_v18, %v1820_v27  ;;  %v572_v35 = vor.u32 %v571_v25, %v568_v24  ;;  %v581_v40 = vrot.slane %v579_v29, 4  ;;  %v2853_v13 = vld [vmem:[%s2994_s30 + $0x3c] sm:$0xff]   ;;  %v2575_v17 = vld [vmem:[%s2994_s30 + $0x44] sm:$0x1]  ;;  %v2576_v22 = vld [vmem:[%s2994_s30 + $0x48] sm:$0xe] }
  0x67   : > { %v2485_v39 = vcombine.low %v554_v32, %v564_v33  ;;  %v587_v41 = vrot.slane %v585_v30, 5  ;;  %v775_v44 = vrot.slane %v707_v21, 5  ;;  %v778_v45 = vrot.slane %v708_v26, 5  ;;  %v2577_v27 = vld [vmem:[%s2994_s30 + $0x4c] sm:$0xf] }
  0x68   : > { %v573_v43 = vrot.slane %v572_v35, 4  ;;  %v2494_v46 = vrot.slane %v709_v31, 9  ;;  %1879 = vrot.lane.b32.xlu0 %v2692_v34, %s2921_s27  ;;  %v582_v47 = vor.u32 %v581_v40, %v577_v28  ;;  %v782_v48 = vrot.slane %v710_v36, 5  ;;  %v2578_v32 = vld [vmem:[%s2994_s30 + $0x50] sm:$0x1] }
  0x69   : > { %669 = vrot.lane.b32.xlu1 %v2485_v39, %s2918_s10  ;;  %v785_v49 = vrot.slane %v711_v37, 5  ;;  %v1069_v51 = vshrl.u32 %v2541_v38, 16  ;;  %v776_v53 = vsel %vm2996_vm2, %v2493_v42, %v775_v44  ;;  %v777_v54 = vrot.slane %v775_v44, 4  ;;  %v2637_v37 = vld [vmem:[%s2994_s30 + $0x48] sm:$0xf] }
  0x6a   : > { %v578_v52 = vsel %vm3041_vm5, %v573_v43, %v577_v28  ;;  %v1072_v57 = vshll.u32 %v2541_v38, 16  ;;  %v583_v58 = vrot.slane %v582_v47, 4  ;;  %v783_v59 = vsel %vm2996_vm2, %v2494_v46, %v782_v48  ;;  %v2638_v42 = vld [vmem:[%s2994_s30 + $0x4c] sm:$0xf] }
  0x6b   : > { %v784_v60 = vrot.slane %v782_v48, 4  ;;  %v1071_v61 = vrot.slane %v1069_v51, 4  ;;  %v779_v63 = vsel %vm2996_vm2, %v777_v54, %v778_v45  ;;  %v1078_v2 = vshll.u32 %v2542_v50, 16  ;;  %v2854_v43 = vld [vmem:[%s2994_s30 + $0x48] sm:$0xff]  }
  0x6c   : > { %v1074_v1 = vrot.slane %v1072_v57, 5  ;;  %v1082_v3 = vshrl.u32 %v2542_v50, 16  ;;  %v588_v5 = vsel %vm3041_vm5, %v583_v58, %v587_v41  ;;  %v2501_v6 = vcombine.low %v776_v53, %v779_v63 }
  0x6d   : > { %v786_v7 = vsel %vm2996_vm2, %v784_v60, %v785_v49  ;;  %v1088_v8 = vshll.u32 %v2543_v56, 16  ;;  %v2486_v11 = vcombine.low %v578_v52, %v588_v5  ;;  %v1080_v15 = vrot.slane %v1078_v2, 5 }
  0x6e   : > { %v2502_v12 = vcombine.low %v783_v59, %v786_v7  ;;  %v1075_v14 = vor.u32 %v1074_v1, %v1071_v61  ;;  %833 = vrot.lane.b32.xlu0 %v2501_v6, %s2917_s9  ;;  %v1084_v18 = vrot.slane %v1082_v3, 4  ;;  %v1093_v20 = vshrl.u32 %v2544_v62, 16  ;;  %v2639_v59 = vld [vmem:[%s2994_s30 + $0x50] sm:$0x1] }
  0x6f   : > { %v1090_v19 = vrot.slane %v1088_v8, 5  ;;  %v1096_v21 = vshll.u32 %v2544_v62, 16  ;;  %671 = vrot.lane.b32.xlu1 %v2486_v11, %s2918_s10  ;;  %v1102_v24 = vshll.u32 %v2545_v4, 16  ;;  %v1106_v25 = vshrl.u32 %v2545_v4, 16  ;;  %v2640_v62 = vld [vmem:[%s2994_s30 + $0x54] sm:$0xf] }
  0x70   : > { %v1076_v23 = vrot.slane %v1075_v14, 4  ;;  %v1112_v26 = vshll.u32 %v2546_v9, 16  ;;  %v1085_v28 = vor.u32 %v1084_v18, %v1080_v15  ;;  %v1095_v29 = vrot.slane %v1093_v20, 4  ;;  %v2641_v4 = vld [vmem:[%s2994_s30 + $0x58] sm:$0xf] }
  0x71   : > { %v1098_v30 = vrot.slane %v1096_v21, 5  ;;  %v2589_v31 = vrot.slane %v2573_v10, 9  ;;  %v1104_v34 = vrot.slane %v1102_v24, 5  ;;  %v1108_v35 = vrot.slane %v1106_v25, 4  ;;  %v2642_v9 = vld [vmem:[%s2994_s30 + $0x5c] sm:$0x1] }
  0x72   : > { %v1081_v33 = vsel %vm3041_vm5, %v1076_v23, %v1080_v15  ;;  %v1114_v36 = vrot.slane %v1112_v26, 5  ;;  %923 = vrot.lane.b32.xlu0 %v2853_v13, %s2914_s6  ;;  %v1086_v38 = vrot.slane %v1085_v28, 4  ;;  %v1299_v40 = vrot.slane %v2574_v16, 5  ;;  %v2669_v14 = vld [vmem:[%s2994_s30 + $0x48] sm:$0xe] }
  0x73   : > { %v1099_v39 = vor.u32 %v1098_v30, %v1095_v29  ;;  %v1302_v41 = vrot.slane %v2575_v17, 5  ;;  %835 = vrot.lane.b32.xlu1 %v2502_v12, %s2917_s9  ;;  %v1109_v44 = vor.u32 %v1108_v35, %v1104_v34  ;;  %v2590_v45 = vrot.slane %v2576_v22, 9  ;;  %v2855_v15 = vld [vmem:[%s2994_s30 + $0x48] sm:$0xff]   ;;  %v2671_v25 = vld [vmem:[%s2994_s30 + $0x50] sm:$0x1] }
  0x74   : > { %v1306_v46 = vrot.slane %v2577_v27, 5  ;;  %v1309_v47 = vrot.slane %v2578_v32, 5  ;;  %v1091_v48 = vsel %vm3041_vm5, %v1086_v38, %v1090_v19  ;;  %v1300_v50 = vsel %vm2996_vm2, %v2589_v31, %v1299_v40  ;;  %v2670_v20 = vld [vmem:[%s2994_s30 + $0x4c] sm:$0xf]  ;;  %v436_v30 = vld [vmem:[%s2994_s30 + $0x48] sm:$0xf] }
  0x75   : > { %v1100_v49 = vrot.slane %v1099_v39, 4  ;;  %v1301_v51 = vrot.slane %v1299_v40, 4  ;;  %v2557_v52 = vcombine.low %v1081_v33, %v1091_v48  ;;  %v1110_v53 = vrot.slane %v1109_v44, 4  ;;  %v437_v35 = vld [vmem:[%s2994_s30 + $0x4c] sm:$0xf]  ;;  %v2856_v40 = vld [vmem:[%s2994_s30 + $0x54] sm:$0xff]  }
  0x76   : > { %v1307_v54 = vsel %vm2996_vm2, %v2590_v45, %v1306_v46  ;;  %v1308_v56 = vrot.slane %v1306_v46, 4  ;;  %v1593_v60 = vshrl.u32 %v2637_v37, 16  ;;  %v1596_v61 = vshll.u32 %v2637_v37, 16  ;;  %v438_v44 = vld [vmem:[%s2994_s30 + $0x50] sm:$0x1] }
  0x77   : > { %v1105_v57 = vsel %vm3041_vm5, %v1100_v49, %v1104_v34  ;;  %v1303_v58 = vsel %vm2996_vm2, %v1301_v51, %v1302_v41  ;;  %925 = vrot.lane.b32.xlu1 %v2854_v43, %s2914_s6  ;;  %1196 = vrot.lane.b32.xlu0 %v2557_v52, %s2919_s11  ;;  %v1115_v63 = vsel %vm3041_vm5, %v1110_v53, %v1114_v36  ;;  %v1602_v3 = vshll.u32 %v2638_v42, 16  ;;  %v2672_v46 = vld [vmem:[%s2994_s30 + $0x54] sm:$0xe] }
  0x78   : > { %v2597_v1 = vcombine.low %v1300_v50, %v1303_v58  ;;  %v1310_v2 = vsel %vm2996_vm2, %v1308_v56, %v1309_v47  ;;  %v2558_v5 = vcombine.low %v1105_v57, %v1115_v63  ;;  %v1595_v7 = vrot.slane %v1593_v60, 4  ;;  %v2673_v56 = vld [vmem:[%s2994_s30 + $0x58] sm:$0xf]  ;;  %v2674_v57 = vld [vmem:[%s2994_s30 + $0x5c] sm:$0x1] }
  0x79   : > { %v2598_v6 = vcombine.low %v1307_v54, %v1310_v2  ;;  %v1598_v8 = vrot.slane %v1596_v61, 5  ;;  %v1604_v10 = vrot.slane %v1602_v3, 5  ;;  %v1606_v11 = vshrl.u32 %v2638_v42, 16 }
  0x7a   : > { %v1612_v12 = vshll.u32 %v2639_v59, 16  ;;  %v1617_v13 = vshrl.u32 %v2640_v62, 16  ;;  %v1620_v17 = vshll.u32 %v2640_v62, 16  ;;  %v1626_v18 = vshll.u32 %v2641_v4, 16  ;;  %v439_v62 = vld [vmem:[%s2994_s30 + $0x54] sm:$0xf] }
  0x7b   : > { %v1599_v16 = vor.u32 %v1598_v8, %v1595_v7  ;;  %v1630_v19 = vshrl.u32 %v2641_v4, 16  ;;  %1198 = vrot.lane.b32.xlu1 %v2558_v5, %s2919_s11  ;;  %1357 = vrot.lane.b32.xlu0 %v2597_v1, %s2916_s8  ;;  %v1608_v21 = vrot.slane %v1606_v11, 4  ;;  %v1636_v24 = vshll.u32 %v2642_v9, 16  ;;  %v440_v4 = vld [vmem:[%s2994_s30 + $0x58] sm:$0xf] }
  0x7c   : > { %v1614_v22 = vrot.slane %v1612_v12, 5  ;;  %v1619_v23 = vrot.slane %v1617_v13, 4  ;;  %v1622_v27 = vrot.slane %v1620_v17, 5  ;;  %v1628_v28 = vrot.slane %v1626_v18, 5  ;;  %v441_v11 = vld [vmem:[%s2994_s30 + $0x5c] sm:$0x1] }
  0x7d   : > { %v1600_v26 = vrot.slane %v1599_v16, 4  ;;  %v1632_v29 = vrot.slane %v1630_v19, 4  ;;  %v1609_v31 = vor.u32 %v1608_v21, %v1604_v10  ;;  %v1638_v32 = vrot.slane %v1636_v24, 5  ;;  %v713_v19 = vld [vmem:[%s2994_s30 + $0x4c] sm:$0xf] }
  0x7e   : > { %v2685_v33 = vrot.slane %v2669_v14, 9  ;;  %v1823_v34 = vrot.slane %v2670_v20, 5  ;;  %v1623_v37 = vor.u32 %v1622_v27, %v1619_v23  ;;  %v1826_v39 = vrot.slane %v2671_v25, 5  ;;  %v712_v14 = vld [vmem:[%s2994_s30 + $0x48] sm:$0xe] }
  0x7f   : > { %v1605_v36 = vsel %vm3041_vm5, %v1600_v26, %v1604_v10  ;;  %v1633_v38 = vor.u32 %v1632_v29, %v1628_v28  ;;  %1359 = vrot.lane.b32.xlu1 %v2598_v6, %s2916_s8  ;;  %1447 = vrot.lane.b32.xlu0 %v2855_v15, %s2915_s7  ;;  %v1610_v41 = vrot.slane %v1609_v31, 4  ;;  %v590_v45 = vshrl.u32 %v436_v30, 16  ;;  %v714_v20 = vld [vmem:[%s2994_s30 + $0x50] sm:$0x1]  ;;  %v715_v21 = vld [vmem:[%s2994_s30 + $0x54] sm:$0xe] }
  0x80   : > { %v1824_v42 = vsel %vm2996_vm2, %v2685_v33, %v1823_v34  ;;  %v1825_v43 = vrot.slane %v1823_v34, 4  ;;  %v1624_v47 = vrot.slane %v1623_v37, 4  ;;  %v593_v49 = vshll.u32 %v436_v30, 16  ;;  %v716_v26 = vld [vmem:[%s2994_s30 + $0x58] sm:$0xf] }
  0x81   : > { %v1634_v48 = vrot.slane %v1633_v38, 4  ;;  %v599_v50 = vshll.u32 %v437_v35, 16  ;;  %v1615_v51 = vsel %vm3041_vm5, %v1610_v41, %v1614_v22  ;;  %v592_v53 = vrot.slane %v590_v45, 4  ;;  %v717_v27 = vld [vmem:[%s2994_s30 + $0x5c] sm:$0x1] }
  0x82   : > { %v1827_v52 = vsel %vm2996_vm2, %v1825_v43, %v1826_v39  ;;  %v603_v54 = vshrl.u32 %v437_v35, 16  ;;  %v2653_v58 = vcombine.low %v1605_v36, %v1615_v51  ;;  %v1629_v59 = vsel %vm3041_vm5, %v1624_v47, %v1628_v28  ;;  %v2548_v43 = vld [vmem:[%s2994_s30 + $0x58] sm:$0xf] }
  0x83   : > { %v1639_v60 = vsel %vm3041_vm5, %v1634_v48, %v1638_v32  ;;  %v2693_v61 = vcombine.low %v1824_v42, %v1827_v52  ;;  %1449 = vrot.lane.b32.xlu1 %v2856_v40, %s2915_s7  ;;  %v595_v1 = vrot.slane %v593_v49, 5  ;;  %v601_v2 = vrot.slane %v599_v50, 5  ;;  %v2547_v32 = vld [vmem:[%s2994_s30 + $0x54] sm:$0xf]  ;;  %v2549_v48 = vld [vmem:[%s2994_s30 + $0x5c] sm:$0x1] }
  0x84   : > { %v2654_v63 = vcombine.low %v1629_v59, %v1639_v60  ;;  %v605_v3 = vrot.slane %v603_v54, 4  ;;  %1720 = vrot.lane.b32.xlu0 %v2653_v58, %s2920_s25  ;;  %v609_v5 = vshll.u32 %v438_v44, 16  ;;  %v2686_v6 = vrot.slane %v2672_v46, 9  ;;  %v2550_v58 = vld [vmem:[%s2994_s30 + $0x60] sm:$0xf] }
  0x85   : > { %v1830_v7 = vrot.slane %v2673_v56, 5  ;;  %v1833_v8 = vrot.slane %v2674_v57, 5  ;;  %v596_v9 = vor.u32 %v595_v1, %v592_v53  ;;  %v614_v12 = vshrl.u32 %v439_v62, 16  ;;  %v2552_v1 = vld [vmem:[%s2994_s30 + $0x68] sm:$0x1] }
  0x86   : > { %v606_v10 = vor.u32 %v605_v3, %v601_v2  ;;  %v617_v13 = vshll.u32 %v439_v62, 16  ;;  %v611_v15 = vrot.slane %v609_v5, 5  ;;  %v623_v18 = vshll.u32 %v440_v4, 16 }
  0x87   : > { %v1831_v16 = vsel %vm2996_vm2, %v2686_v6, %v1830_v7  ;;  %v1832_v17 = vrot.slane %v1830_v7, 4  ;;  %1722 = vrot.lane.b32.xlu1 %v2654_v63, %s2920_s25  ;;  %v597_v22 = vrot.slane %v596_v9, 4  ;;  %v616_v24 = vrot.slane %v614_v12, 4  ;;  %v3346_v37 = vpop.permute.xlu1 %917  ;;  %v3348_v38 = vpop.permute.xlu0 %915  ;;  %v2551_v63 = vld [vmem:[%s2994_s30 + $0x64] sm:$0xf] }
  0x88   : > { %v607_v23 = vrot.slane %v606_v10, 4  ;;  %v619_v25 = vrot.slane %v617_v13, 5  ;;  %1881 = vrot.lane.b32.xlu0 %v2693_v61, %s2921_s27  ;;  %v625_v29 = vrot.slane %v623_v18, 5  ;;  %v627_v30 = vshrl.u32 %v440_v4, 16  ;;  %v2579_v6 = vld [vmem:[%s2994_s30 + $0x54] sm:$0xe] }
  0x89   : > { %v1834_v28 = vsel %vm2996_vm2, %v1832_v17, %v1833_v8  ;;  %v633_v31 = vshll.u32 %v441_v11, 16  ;;  %v602_v33 = vsel %vm3041_vm5, %v597_v22, %v601_v2  ;;  %v2495_v42 = vrot.slane %v712_v14, 9  ;;  %v2580_v18 = vld [vmem:[%s2994_s30 + $0x58] sm:$0xf] }
  0x8a   : > { %v612_v34 = vsel %vm3041_vm5, %v607_v23, %v611_v15  ;;  %v2694_v35 = vcombine.low %v1831_v16, %v1834_v28  ;;  %v620_v36 = vor.u32 %v619_v25, %v616_v24  ;;  %v629_v40 = vrot.slane %v627_v30, 4  ;;  %v2857_v15 = vld [vmem:[%s2994_s30 + $0x54] sm:$0xff]   ;;  %v2582_v24 = vld [vmem:[%s2994_s30 + $0x60] sm:$0xe]  ;;  %v2583_v25 = vld [vmem:[%s2994_s30 + $0x64] sm:$0xf] }
  0x8b   : > { %v2487_v39 = vcombine.low %v602_v33, %v612_v34  ;;  %v635_v41 = vrot.slane %v633_v31, 5  ;;  %v789_v45 = vrot.slane %v713_v19, 5  ;;  %v792_v46 = vrot.slane %v714_v20, 5  ;;  %v3366_v7 = vpop.permute.xlu1 %1441  ;;  %v3368_v8 = vpop.permute.xlu0 %1439  ;;  %v2581_v19 = vld [vmem:[%s2994_s30 + $0x5c] sm:$0x1] }
  0x8c   : > { %v621_v44 = vrot.slane %v620_v36, 4  ;;  %v2496_v47 = vrot.slane %v715_v21, 9  ;;  %1883 = vrot.lane.b32.xlu0 %v2694_v35, %s2921_s27  ;;  %v630_v49 = vor.u32 %v629_v40, %v625_v29  ;;  %v796_v50 = vrot.slane %v716_v26, 5  ;;  %v2584_v26 = vld [vmem:[%s2994_s30 + $0x68] sm:$0x1] }
  0x8d   : > { %673 = vrot.lane.b32.xlu1 %v2487_v39, %s2918_s10  ;;  %v799_v51 = vrot.slane %v717_v27, 5  ;;  %v1117_v52 = vshrl.u32 %v2547_v32, 16  ;;  %v790_v54 = vsel %vm2996_vm2, %v2495_v42, %v789_v45  ;;  %v791_v56 = vrot.slane %v789_v45, 4 }
  0x8e   : > { %v626_v53 = vsel %vm3041_vm5, %v621_v44, %v625_v29  ;;  %v1120_v57 = vshll.u32 %v2547_v32, 16  ;;  %v631_v59 = vrot.slane %v630_v49, 4  ;;  %v797_v60 = vsel %vm2996_vm2, %v2496_v47, %v796_v50  ;;  %v2858_v47 = vld [vmem:[%s2994_s30 + $0x60] sm:$0xff]  }
  0x8f   : > { %v798_v61 = vrot.slane %v796_v50, 4  ;;  %v1119_v62 = vrot.slane %v1117_v52, 4  ;;  %v793_v2 = vsel %vm2996_vm2, %v791_v56, %v792_v46  ;;  %v1126_v4 = vshll.u32 %v2548_v43, 16  ;;  %v2643_v52 = vld [vmem:[%s2994_s30 + $0x60] sm:$0xf] }
  0x90   : > { %v1122_v3 = vrot.slane %v1120_v57, 5  ;;  %v1130_v5 = vshrl.u32 %v2548_v43, 16  ;;  %v636_v9 = vsel %vm3041_vm5, %v631_v59, %v635_v41  ;;  %v2503_v10 = vcombine.low %v790_v54, %v793_v2  ;;  %v3384_v41 = vpop.permute.xlu0 %1349  ;;  %v2645_v2 = vld [vmem:[%s2994_s30 + $0x68] sm:$0x1] }
  0x91   : > { %v800_v11 = vsel %vm2996_vm2, %v798_v61, %v799_v51  ;;  %v1136_v12 = vshll.u32 %v2549_v48, 16  ;;  %v2488_v13 = vcombine.low %v626_v53, %v636_v9  ;;  %v1128_v17 = vrot.slane %v1126_v4, 5  ;;  %v3386_v42 = vpop.permute.xlu1 %825 }
  0x92   : > { %v2504_v14 = vcombine.low %v797_v60, %v800_v11  ;;  %v1123_v16 = vor.u32 %v1122_v3, %v1119_v62  ;;  %837 = vrot.lane.b32.xlu0 %v2503_v10, %s2917_s9  ;;  %v1132_v20 = vrot.slane %v1130_v5, 4  ;;  %v1141_v22 = vshrl.u32 %v2550_v58, 16  ;;  %v2646_v5 = vld [vmem:[%s2994_s30 + $0x6c] sm:$0xf] }
  0x93   : > { %v1138_v21 = vrot.slane %v1136_v12, 5  ;;  %v1144_v23 = vshll.u32 %v2550_v58, 16  ;;  %675 = vrot.lane.b32.xlu1 %v2488_v13, %s2918_s10  ;;  %v1150_v28 = vshll.u32 %v2551_v63, 16  ;;  %v1154_v29 = vshrl.u32 %v2551_v63, 16  ;;  %v2644_v58 = vld [vmem:[%s2994_s30 + $0x64] sm:$0xf] }
  0x94   : > { %v1124_v27 = vrot.slane %v1123_v16, 4  ;;  %v1160_v30 = vshll.u32 %v2552_v1, 16  ;;  %v1133_v31 = vor.u32 %v1132_v20, %v1128_v17  ;;  %v1143_v32 = vrot.slane %v1141_v22, 4  ;;  %v2647_v12 = vld [vmem:[%s2994_s30 + $0x70] sm:$0xf] }
  0x95   : > { %v1146_v33 = vrot.slane %v1144_v23, 5  ;;  %v2591_v34 = vrot.slane %v2579_v6, 9  ;;  %v1152_v36 = vrot.slane %v1150_v28, 5  ;;  %v1156_v39 = vrot.slane %v1154_v29, 4  ;;  %v3414_v13 = vpop.permute.xlu1 %827  ;;  %v2675_v20 = vld [vmem:[%s2994_s30 + $0x60] sm:$0xe] }
  0x96   : > { %v1129_v35 = vsel %vm3041_vm5, %v1124_v27, %v1128_v17  ;;  %v1162_v40 = vrot.slane %v1160_v30, 5  ;;  %927 = vrot.lane.b32.xlu0 %v2857_v15, %s2914_s6  ;;  %v1134_v43 = vrot.slane %v1133_v31, 4  ;;  %v1313_v45 = vrot.slane %v2580_v18, 5  ;;  %v2677_v31 = vld [vmem:[%s2994_s30 + $0x68] sm:$0x1] }
  0x97   : > { %v1147_v44 = vor.u32 %v1146_v33, %v1143_v32  ;;  %v1316_v46 = vrot.slane %v2581_v19, 5  ;;  %839 = vrot.lane.b32.xlu1 %v2504_v14, %s2917_s9  ;;  %v1157_v48 = vor.u32 %v1156_v39, %v1152_v36  ;;  %v2592_v49 = vrot.slane %v2582_v24, 9  ;;  %v2648_v19 = vld [vmem:[%s2994_s30 + $0x74] sm:$0x1] }
  0x98   : > { %v1320_v50 = vrot.slane %v2583_v25, 5  ;;  %v1323_v51 = vrot.slane %v2584_v26, 5  ;;  %v1139_v53 = vsel %vm3041_vm5, %v1134_v43, %v1138_v21  ;;  %v1314_v56 = vsel %vm2996_vm2, %v2591_v34, %v1313_v45  ;;  %v2676_v25 = vld [vmem:[%s2994_s30 + $0x64] sm:$0xf] }
  0x99   : > { %v1148_v54 = vrot.slane %v1147_v44, 4  ;;  %v1315_v57 = vrot.slane %v1313_v45, 4  ;;  %v2559_v59 = vcombine.low %v1129_v35, %v1139_v53  ;;  %v1158_v60 = vrot.slane %v1157_v48, 4  ;;  %v2859_v26 = vld [vmem:[%s2994_s30 + $0x60] sm:$0xff]   ;;  %v2679_v45 = vld [vmem:[%s2994_s30 + $0x70] sm:$0xf] }
  0x9a   : > { %v3399_v61 = vsel %vm2996_vm2, %v2592_v49, %v1320_v50  ;;  %v1322_v62 = vrot.slane %v1320_v50, 4  ;;  %v1641_v3 = vshrl.u32 %v2643_v52, 16  ;;  %v1644_v4 = vshll.u32 %v2643_v52, 16  ;;  %v2866_v48 = vld [vmem:[%s2994_s30 + $0x18] sm:$0xff]   ;;  %v2868_v49 = vld [vmem:[%s2994_s30 + $0x24] sm:$0xff]  }
  0x9b   : > { %v1153_v63 = vsel %vm3041_vm5, %v1148_v54, %v1152_v36  ;;  %v1317_v1 = vsel %vm2996_vm2, %v1315_v57, %v1316_v46  ;;  %929 = vrot.lane.b32.xlu1 %v2858_v47, %s2914_s6  ;;  %1200 = vrot.lane.b32.xlu0 %v2559_v59, %s2919_s11  ;;  %v1163_v6 = vsel %vm3041_vm5, %v1158_v60, %v1162_v40  ;;  %v1650_v11 = vshll.u32 %v2644_v58, 16  ;;  %v3416_v14 = vpop.permute.xlu0 %661  ;;  %v3427_v36 = vld [vmem:[%s2994_s30 + $0x6c] sm:$0xe]  ;;  %v2861_v46 = vld [vmem:[%s2994_s30] sm:$0xff]  }
  0x9c   : > { %v2599_v9 = vcombine.low %v1314_v56, %v1317_v1  ;;  %v1324_v10 = vsel %vm2996_vm2, %v1322_v62, %v1323_v51  ;;  %v2560_v15 = vcombine.low %v1153_v63, %v1163_v6  ;;  %v1643_v17 = vrot.slane %v1641_v3, 4  ;;  %v2862_v47 = vld [vmem:[%s2994_s30 + $0xc] sm:$0xff]   ;;  %v2680_v54 = vld [vmem:[%s2994_s30 + $0x74] sm:$0x1]  ;;  %v3435_v56 = vpop.permute.xlu1 %1351  ;;  %v2871_v63 = vld [vmem:[%s2994_s30 + $0x3c] sm:$0xff]   ;;  %410 = vst.msk [vmem:[#allocation2] sm:$0xff] %vm409_vm6, %v2861_v46 }
  0x9d   : > { %v2600_v16 = vcombine.low %v3399_v61, %v1324_v10  ;;  %v1646_v18 = vrot.slane %v1644_v4, 5  ;;  %v1652_v21 = vrot.slane %v1650_v11, 5  ;;  %v1654_v22 = vshrl.u32 %v2644_v58, 16  ;;  %v2870_v58 = vld [vmem:[%s2994_s30 + $0x30] sm:$0xff]   ;;  %v2872_v1 = vld [vmem:[%s2994_s30 + $0x48] sm:$0xff]   ;;  %411 = vst.msk [vmem:[#allocation2 + $0x8] sm:$0xff] %vm409_vm6, %v2862_v47 }
  0x9e   : > { %v1660_v23 = vshll.u32 %v2645_v2, 16  ;;  %v1665_v24 = vshrl.u32 %v2646_v5, 16  ;;  %v1668_v28 = vshll.u32 %v2646_v5, 16  ;;  %v1674_v29 = vshll.u32 %v2647_v12, 16  ;;  %v2873_v2 = vld [vmem:[%s2994_s30 + $0x54] sm:$0xff]   ;;  %v2860_v3 = vld [vmem:[%s2994_s30 + $0x6c] sm:$0xff]  }
  0x9f   : > { %v1647_v27 = vor.u32 %v1646_v18, %v1643_v17  ;;  %v1678_v30 = vshrl.u32 %v2647_v12, 16  ;;  %1202 = vrot.lane.b32.xlu1 %v2560_v15, %s2919_s11  ;;  %1361 = vrot.lane.b32.xlu0 %v2599_v9, %s2916_s8  ;;  %v1656_v32 = vrot.slane %v1654_v22, 4  ;;  %v1684_v35 = vshll.u32 %v2648_v19, 16  ;;  %412 = vst.msk [vmem:[#allocation2 + $0x10] sm:$0xff] %vm409_vm6, %v2866_v48  ;;  %413 = vst.msk [vmem:[#allocation2 + $0x18] sm:$0xff] %vm409_vm6, %v2868_v49 }
  0xa0   : > { %v1662_v33 = vrot.slane %v1660_v23, 5  ;;  %v1667_v34 = vrot.slane %v1665_v24, 4  ;;  %v1670_v40 = vrot.slane %v1668_v28, 5  ;;  %v1676_v43 = vrot.slane %v1674_v29, 5  ;;  %v664_v57 = vpop.permute.xlu0 %663  ;;  %414 = vst.msk [vmem:[#allocation2 + $0x20] sm:$0xff] %vm409_vm6, %v2870_v58  ;;  %415 = vst.msk [vmem:[#allocation2 + $0x28] sm:$0xff] %vm409_vm6, %v2871_v63 }
  0xa1   : > { %v1648_v39 = vrot.slane %v1647_v27, 4  ;;  %v1680_v44 = vrot.slane %v1678_v30, 4  ;;  %v1657_v50 = vor.u32 %v1656_v32, %v1652_v21  ;;  %v1686_v51 = vrot.slane %v1684_v35, 5  ;;  %416 = vst.msk [vmem:[#allocation2 + $0x30] sm:$0xff] %vm409_vm6, %v2872_v1  ;;  %417 = vst.msk [vmem:[#allocation2 + $0x38] sm:$0xff] %vm409_vm6, %v2873_v2 }
  0xa2   : > { %v2687_v52 = vrot.slane %v2675_v20, 9  ;;  %v1837_v53 = vrot.slane %v2676_v25, 5  ;;  %v1671_v60 = vor.u32 %v1670_v40, %v1667_v34  ;;  %v1840_v62 = vrot.slane %v2677_v31, 5  ;;  %686 = vst.msk [vmem:[#allocation2] sm:$0xff] %vm685_vm7, %v3416_v14  ;;  %687 = vst.msk [vmem:[#allocation2 + $0x8] sm:$0xff] %vm685_vm7, %v664_v57 }
  0xa3   : > { %v1653_v59 = vsel %vm3041_vm5, %v1648_v39, %v1652_v21  ;;  %v1681_v61 = vor.u32 %v1680_v44, %v1676_v43  ;;  %1363 = vrot.lane.b32.xlu1 %v2600_v16, %s2916_s8  ;;  %1451 = vrot.lane.b32.xlu0 %v2859_v26, %s2915_s7  ;;  %v1658_v4 = vrot.slane %v1657_v50, 4  ;;  %v2688_v9 = vrot.slane %v3427_v36, 9  ;;  %v2869_v21 = vld [vmem:[%s3667_s1 + $0x20] ss:$0 sps:$4 sm:$0xff]   ;;  %850 = vst.msk [vmem:[#allocation2] sm:$0xff] %vm849_vm8, %v3386_v42  ;;  %s2469_s8 = sshll.u32 %s3689_s19, 5 }
  0xa4   : > { %v1838_v5 = vsel %vm2996_vm2, %v2687_v52, %v1837_v53  ;;  %v1839_v6 = vrot.slane %v1837_v53, 4  ;;  %v1672_v10 = vrot.slane %v1671_v60, 4  ;;  %v1844_v12 = vrot.slane %v2679_v45, 5  ;;  %v1191_v55 = vpop.permute.xlu1 %1190  ;;  %851 = vst.msk [vmem:[#allocation2 + $0x8] sm:$0xff] %vm849_vm8, %v3414_v13  ;;  %2794 = vmatprep.subr.msk.bf16.mxu0 %vm1985_vm13, %v2869_v21  ;;  %2795 = vmatprep.subr.msk.bf16.mxu1 %vm1985_vm13, %v2869_v21 }
  0xa5   : > { %v1682_v11 = vrot.slane %v1681_v61, 4  ;;  %v1847_v15 = vrot.slane %v2680_v54, 5  ;;  %v1663_v17 = vsel %vm3041_vm5, %v1658_v4, %v1662_v33  ;;  %941 = vst.msk [vmem:[#allocation2 + $0x8] sm:$0xff] %vm939_vm9, %v3346_v37  ;;  %940 = vst.msk [vmem:[#allocation2] sm:$0xff] %vm939_vm9, %v3348_v38  ;;  %v1987_v42 = vsel %vm1985_vm13, %v2869_v21, 0 }
  0xa6   : > { %v1841_v16 = vsel %vm2996_vm2, %v1839_v6, %v1840_v62  ;;  %v2655_v18 = vcombine.low %v1653_v59, %v1663_v17  ;;  %v1677_v19 = vsel %vm3041_vm5, %v1672_v10, %v1676_v43  ;;  %v1846_v24 = vrot.slane %v1844_v12, 4  ;;  %1214 = vst.msk [vmem:[#allocation2 + $0x8] sm:$0xff] %vm1212_vm10, %v1191_v55  ;;  %2767 = vmatpush3.bf16.msra.mxu0 %v1987_v42 }
  0xa7   : > { %v1687_v20 = vsel %vm3041_vm5, %v1682_v11, %v1686_v51  ;;  %1453 = vrot.lane.b32.xlu1 %v2860_v3, %s2915_s7  ;;  %v2695_v23 = vcombine.low %v1838_v5, %v1841_v16  ;;  %v1845_v26 = vsel %vm2996_vm2, %v2688_v9, %v1844_v12  ;;  %1375 = vst.msk [vmem:[#allocation2 + $0x8] sm:$0xff] %vm1373_vm11, %v3435_v56  ;;  %s2468_s7 = sshll.u32 %s2896_s18, 4 }
  0xa8   : > { %v2656_v22 = vcombine.low %v1677_v19, %v1687_v20  ;;  %v1189_v25 = vpop.permute.xlu0 %1188  ;;  %1724 = vrot.lane.b32.xlu0 %v2655_v18, %s2920_s25  ;;  %v1848_v14 = vsel %vm2996_vm2, %v1846_v24, %v1847_v15  ;;  %1465 = vst.msk [vmem:[#allocation2 + $0x8] sm:$0xff] %vm1463_vm12, %v3366_v7  ;;  %2793 = vmatpush3.bf16.msra.mxu1 %v1987_v42  ;;  %p314_p7 = scmp.lt.s32.totalorder %s2468_s7, 31  ;;  %vm2086_vm2 = vcmask 261120  }
  0xa9   : > { %1213 = vst.msk [vmem:[#allocation2] sm:$0xff] %vm1212_vm10, %v1189_v25  ;;  %v2696_v0 = vcombine.low %v1845_v26, %v1848_v14  ;;  %v3556_v26 = vld [vmem:[%s3668_s2] ss:$0 sm:$0xff] }
  0xaa   : > { %1374 = vst.msk [vmem:[#allocation2] sm:$0xff] %vm1373_vm11, %v3384_v41  ;;  %s3691_s7 = smov (!%p314_p7, %s2468_s7), 31 }
  0xab   : > { %1726 = vrot.lane.b32.xlu1 %v2656_v22, %s2920_s25  ;;  %1464 = vst.msk [vmem:[#allocation2] sm:$0xff] %vm1463_vm12, %v3368_v8  ;;  %s320_s9 = sadd.s32 %s2469_s8, %s3691_s7 }
  0xac   : > { %1885 = vrot.lane.b32.xlu0 %v2695_v23, %s2921_s27  ;;  %s2470_s12 = sshll.u32 %s320_s9, 2 }
  0xad   : > { %v1713_v37 = vpop.permute.xlu0 %1712  ;;  %s3562_s18 = scalar_lea.vmem %s3669_s3, %s2470_s12 }
  0xae   : > { %1737 = vst.msk [vmem:[#allocation2] sm:$0xff] %vm1736_vm14, %v1713_v37 }
  0xaf   : > { %1887 = vrot.lane.b32.xlu1 %v2696_v0, %s2921_s27  ;;  %s341_s27 = scalar_lea.vmem %s3671_s5, %s3687_s26 }
  0xb1   : > { %v1874_v38 = vpop.permute.xlu0 %1873  ;;  %v1715_v13 = vpop.permute.xlu1 %1714 }
  0xb2   : > { %1898 = vst.msk [vmem:[#allocation2] sm:$0xff] %vm1897_vm15, %v1874_v38 }
  0xb3   : > { %1738 = vst.msk [vmem:[#allocation2 + $0x8] sm:$0xff] %vm1736_vm14, %v1715_v13 }
  0xb5   : > { %v1876_v41 = vpop.permute.xlu0 %1875 }
  0xb6   : > { %1899 = vst.msk [vmem:[#allocation2 + $0x8] sm:$0xff] %vm1897_vm15, %v1876_v41 }
  0xb7   : > { %v666_v27 = vpop.permute.xlu1 %665 }
  0xb8   : > { %688 = vst.msk [vmem:[#allocation2 + $0x10] sm:$0xff] %vm685_vm7, %v666_v27 }
  0xb9   : > { %v1906_v7 = vld [vmem:[#allocation2] sm:$0xff] }
  0xba   : > { %2768 = vmatprep.mubr.msk.bf16.mxu0 %vm1960_vm0, %v1906_v7 }
  0xbc   : > { %v830_v28 = vpop.permute.xlu0 %829 }
  0xbd   : > { %v668_v8 = vpop.permute.xlu1 %667  ;;  %852 = vst.msk [vmem:[#allocation2 + $0x10] sm:$0xff] %vm849_vm8, %v830_v28  ;;  %v1907_v29 = vld [vmem:[#allocation2 + $0x8] sm:$0xff] }
  0xbe   : > { %689 = vst.msk [vmem:[#allocation2 + $0x18] sm:$0xff] %vm685_vm7, %v668_v8  ;;  %2769 = vmatmul.mubr.msk.bf16.vlgmr.msra.gmra.mrb[0].mxu0 %vm1960_vm0, %v1907_v29 }
  0xc0   : > { %v920_v31 = vpop.permute.xlu0 %919 }
  0xc1   : > { %v832_v30 = vpop.permute.xlu1 %831  ;;  %942 = vst.msk [vmem:[#allocation2 + $0x10] sm:$0xff] %vm939_vm9, %v920_v31 }
  0xc2   : > { %853 = vst.msk [vmem:[#allocation2 + $0x18] sm:$0xff] %vm849_vm8, %v832_v30 }
  0xc5   : > { %v922_v32 = vpop.permute.xlu1 %921 }
  0xc6   : > { %943 = vst.msk [vmem:[#allocation2 + $0x18] sm:$0xff] %vm939_vm9, %v922_v32  ;;  %v1193_v33 = vpop.permute.xlu0 %1192 }
  0xc7   : > { %1215 = vst.msk [vmem:[#allocation2 + $0x10] sm:$0xff] %vm1212_vm10, %v1193_v33 }
  0xc9   : > { %v1195_v34 = vpop.permute.xlu1 %1194 }
  0xca   : > { %1216 = vst.msk [vmem:[#allocation2 + $0x18] sm:$0xff] %vm1212_vm10, %v1195_v34  ;;  %v1354_v35 = vpop.permute.xlu0 %1353 }
  0xcb   : > { %1376 = vst.msk [vmem:[#allocation2 + $0x10] sm:$0xff] %vm1373_vm11, %v1354_v35 }
  0xcd   : > { %v1356_v36 = vpop.permute.xlu1 %1355 }
  0xce   : > { %1377 = vst.msk [vmem:[#allocation2 + $0x18] sm:$0xff] %vm1373_vm11, %v1356_v36  ;;  %v1444_v39 = vpop.permute.xlu0 %1443 }
  0xcf   : > { %1466 = vst.msk [vmem:[#allocation2 + $0x10] sm:$0xff] %vm1463_vm12, %v1444_v39 }
  0xd1   : > { %v1446_v40 = vpop.permute.xlu1 %1445 }
  0xd2   : > { %1467 = vst.msk [vmem:[#allocation2 + $0x18] sm:$0xff] %vm1463_vm12, %v1446_v40  ;;  %v1717_v43 = vpop.permute.xlu0 %1716 }
  0xd3   : > { %1739 = vst.msk [vmem:[#allocation2 + $0x10] sm:$0xff] %vm1736_vm14, %v1717_v43 }
  0xd5   : > { %v1719_v44 = vpop.permute.xlu1 %1718 }
  0xd6   : > { %1740 = vst.msk [vmem:[#allocation2 + $0x18] sm:$0xff] %vm1736_vm14, %v1719_v44  ;;  %v1878_v45 = vpop.permute.xlu0 %1877 }
  0xd7   : > { %1900 = vst.msk [vmem:[#allocation2 + $0x10] sm:$0xff] %vm1897_vm15, %v1878_v45 }
  0xda   : > { %v1880_v47 = vpop.permute.xlu0 %1879 }
  0xdb   : > { %v670_v46 = vpop.permute.xlu1 %669  ;;  %1901 = vst.msk [vmem:[#allocation2 + $0x18] sm:$0xff] %vm1897_vm15, %v1880_v47 }
  0xdc   : > { %690 = vst.msk [vmem:[#allocation2 + $0x20] sm:$0xff] %vm685_vm7, %v670_v46 }
  0xde   : > { %v1908_v48 = vld [vmem:[#allocation2 + $0x10] sm:$0xff] }
  0xdf   : > { %2772 = vmatprep.mubr.msk.bf16.mxu0 %vm1960_vm0, %v1908_v48 }
  0xe0   : > { %v834_v49 = vpop.permute.xlu0 %833 }
  0xe1   : > { %v672_v50 = vpop.permute.xlu1 %671  ;;  %854 = vst.msk [vmem:[#allocation2 + $0x20] sm:$0xff] %vm849_vm8, %v834_v49 }
  0xe2   : > { %691 = vst.msk [vmem:[#allocation2 + $0x28] sm:$0xff] %vm685_vm7, %v672_v50  ;;  %v1909_v51 = vld [vmem:[#allocation2 + $0x18] sm:$0xff] }
  0xe3   : > { %2773 = vmatmul.mubr.msk.bf16.gmra.mrb[4].mxu0 %vm1960_vm0, %v1909_v51 }
  0xe4   : > { %v924_v52 = vpop.permute.xlu0 %923 }
  0xe5   : > { %v836_v53 = vpop.permute.xlu1 %835  ;;  %944 = vst.msk [vmem:[#allocation2 + $0x20] sm:$0xff] %vm939_vm9, %v924_v52 }
  0xe6   : > { %855 = vst.msk [vmem:[#allocation2 + $0x28] sm:$0xff] %vm849_vm8, %v836_v53 }
  0xe9   : > { %v926_v54 = vpop.permute.xlu1 %925  ;;  %v1197_v56 = vpop.permute.xlu0 %1196 }
  0xea   : > { %945 = vst.msk [vmem:[#allocation2 + $0x28] sm:$0xff] %vm939_vm9, %v926_v54 }
  0xeb   : > { %1217 = vst.msk [vmem:[#allocation2 + $0x20] sm:$0xff] %vm1212_vm10, %v1197_v56 }
  0xed   : > { %v1199_v57 = vpop.permute.xlu1 %1198  ;;  %v1358_v58 = vpop.permute.xlu0 %1357 }
  0xee   : > { %1218 = vst.msk [vmem:[#allocation2 + $0x28] sm:$0xff] %vm1212_vm10, %v1199_v57 }
  0xef   : > { %1378 = vst.msk [vmem:[#allocation2 + $0x20] sm:$0xff] %vm1373_vm11, %v1358_v58 }
  0xf1   : > { %v1360_v59 = vpop.permute.xlu1 %1359  ;;  %v1448_v60 = vpop.permute.xlu0 %1447 }
  0xf2   : > { %1379 = vst.msk [vmem:[#allocation2 + $0x28] sm:$0xff] %vm1373_vm11, %v1360_v59 }
  0xf3   : > { %1468 = vst.msk [vmem:[#allocation2 + $0x20] sm:$0xff] %vm1463_vm12, %v1448_v60 }
  0xf5   : > { %v1450_v61 = vpop.permute.xlu1 %1449 }
  0xf6   : > { %1469 = vst.msk [vmem:[#allocation2 + $0x28] sm:$0xff] %vm1463_vm12, %v1450_v61  ;;  %v1721_v62 = vpop.permute.xlu0 %1720 }
  0xf7   : > { %1741 = vst.msk [vmem:[#allocation2 + $0x20] sm:$0xff] %vm1736_vm14, %v1721_v62 }
  0xf9   : > { %v1723_v63 = vpop.permute.xlu1 %1722 }
  0xfa   : > { %1742 = vst.msk [vmem:[#allocation2 + $0x28] sm:$0xff] %vm1736_vm14, %v1723_v63  ;;  %v1882_v1 = vpop.permute.xlu0 %1881 }
  0xfb   : > { %1902 = vst.msk [vmem:[#allocation2 + $0x20] sm:$0xff] %vm1897_vm15, %v1882_v1 }
  0xfe   : > { %v1884_v3 = vpop.permute.xlu0 %1883 }
  0xff   : > { %v674_v2 = vpop.permute.xlu1 %673  ;;  %1903 = vst.msk [vmem:[#allocation2 + $0x28] sm:$0xff] %vm1897_vm15, %v1884_v3 }
 0x100   : > { %692 = vst.msk [vmem:[#allocation2 + $0x30] sm:$0xff] %vm685_vm7, %v674_v2 }
 0x102   : > { %v1910_v4 = vld [vmem:[#allocation2 + $0x20] sm:$0xff] }
 0x103   : > { %2776 = vmatprep.mubr.msk.bf16.mxu1 %vm1960_vm0, %v1910_v4 }
 0x104   : > { %v838_v5 = vpop.permute.xlu0 %837 }
 0x105   : > { %v676_v6 = vpop.permute.xlu1 %675  ;;  %856 = vst.msk [vmem:[#allocation2 + $0x30] sm:$0xff] %vm849_vm8, %v838_v5 }
 0x106   : > { %693 = vst.msk [vmem:[#allocation2 + $0x38] sm:$0xff] %vm685_vm7, %v676_v6  ;;  %v1911_v9 = vld [vmem:[#allocation2 + $0x28] sm:$0xff] }
 0x107   : > { %2777 = vmatmul.mubr.msk.bf16.vlgmr.msra.gmra.mrb[0].mxu1 %vm1960_vm0, %v1911_v9 }
 0x108   : > { %v928_v10 = vpop.permute.xlu0 %927 }
 0x109   : > { %v840_v11 = vpop.permute.xlu1 %839  ;;  %946 = vst.msk [vmem:[#allocation2 + $0x30] sm:$0xff] %vm939_vm9, %v928_v10 }
 0x10a   : > { %857 = vst.msk [vmem:[#allocation2 + $0x38] sm:$0xff] %vm849_vm8, %v840_v11 }
 0x10d   : > { %v930_v12 = vpop.permute.xlu1 %929  ;;  %v1201_v15 = vpop.permute.xlu0 %1200 }
 0x10e   : > { %947 = vst.msk [vmem:[#allocation2 + $0x38] sm:$0xff] %vm939_vm9, %v930_v12 }
 0x10f   : > { %1219 = vst.msk [vmem:[#allocation2 + $0x30] sm:$0xff] %vm1212_vm10, %v1201_v15 }
 0x111   : > { %v1203_v17 = vpop.permute.xlu1 %1202  ;;  %v1362_v16 = vpop.permute.xlu0 %1361 }
 0x112   : > { %1220 = vst.msk [vmem:[#allocation2 + $0x38] sm:$0xff] %vm1212_vm10, %v1203_v17 }
 0x113   : > { %1380 = vst.msk [vmem:[#allocation2 + $0x30] sm:$0xff] %vm1373_vm11, %v1362_v16 }
 0x115   : > { %v1364_v18 = vpop.permute.xlu1 %1363  ;;  %v1452_v19 = vpop.permute.xlu0 %1451 }
 0x116   : > { %1381 = vst.msk [vmem:[#allocation2 + $0x38] sm:$0xff] %vm1373_vm11, %v1364_v18 }
 0x117   : > { %1470 = vst.msk [vmem:[#allocation2 + $0x30] sm:$0xff] %vm1463_vm12, %v1452_v19 }
 0x119   : > { %v1454_v20 = vpop.permute.xlu1 %1453 }
 0x11a   : > { %1471 = vst.msk [vmem:[#allocation2 + $0x38] sm:$0xff] %vm1463_vm12, %v1454_v20  ;;  %v1725_v21 = vpop.permute.xlu0 %1724 }
 0x11b   : > { %1743 = vst.msk [vmem:[#allocation2 + $0x30] sm:$0xff] %vm1736_vm14, %v1725_v21 }
 0x11d   : > { %v1727_v22 = vpop.permute.xlu1 %1726 }
 0x11e   : > { %1744 = vst.msk [vmem:[#allocation2 + $0x38] sm:$0xff] %vm1736_vm14, %v1727_v22  ;;  %v1886_v23 = vpop.permute.xlu0 %1885 }
 0x11f   : > { %1904 = vst.msk [vmem:[#allocation2 + $0x30] sm:$0xff] %vm1897_vm15, %v1886_v23 }
 0x121   : > { %v1888_v24 = vpop.permute.xlu1 %1887 }
 0x122   : > { %1905 = vst.msk [vmem:[#allocation2 + $0x38] sm:$0xff] %vm1897_vm15, %v1888_v24 }
 0x126   : > { %v1912_v55 = vld [vmem:[#allocation2 + $0x30] sm:$0xff] }
 0x127   : > { %2780 = vmatprep.mubr.msk.bf16.mxu1 %vm1960_vm0, %v1912_v55 }
 0x129   : > { %v1913_v25 = vld [vmem:[#allocation2 + $0x38] sm:$0xff] }
 0x12a   : > { %2781 = vmatmul.mubr.msk.bf16.gmra.mrb[4].mxu1 %vm1960_vm0, %v1913_v25 }
 0x191   : > { %v2770_v14 = vpop.f32.mrb[0].mxu0 }
 0x192   : > { %v2032_v42 = vadd.f32 %v2770_v14, %v3556_v26  ;;  %v2023_v0 = vpop.f32.mrb[1].mxu0 }
 0x193   : > { %v2024_v37 = vadd.f32 %v3556_v26, %v2023_v0  ;;  %v2771_v38 = vpop.f32.mrb[2].mxu0 }
 0x194   : > { %v2731_v13 = vpack.c.bf16 %v2032_v42, %v2032_v42  ;;  %v2035_v41 = vadd.f32 %v2771_v38, %v3556_v26  ;;  %v2026_v27 = vpop.f32.mrb[3].mxu0  ;;  %v2128_v29 = vmul.f32 %v2032_v42, %v2032_v42  ;;  %v2090_v36 = vsel %vm2086_vm2, %v2032_v42, 0.0 }
 0x195   : > { %v2126_v7 = vmul.f32 %v2024_v37, %v2024_v37  ;;  %v2729_v8 = vpack.c.bf16 %v2024_v37, %v2024_v37  ;;  %v2027_v28 = vadd.f32 %v3556_v26, %v2026_v27  ;;  %v2087_v31 = vsel %vm2086_vm2, %v2024_v37, 0.0 }
 0x196   : > { %2247 = vst.msk [vmem:[%s3562_s18 + $0x8] sm:$0xf] %vm2244_vm1, %v2731_v13  ;;  %v2732_v30 = vpack.c.bf16 %v2035_v41, %v2035_v41  ;;  %v2129_v40 = vmul.f32 %v2035_v41, %v2035_v41  ;;  %v2145_v46 = vsel %vm2086_vm2, %v2128_v29, 0.0  ;;  %v2092_v47 = vsel %vm2086_vm2, %v2035_v41, 0.0 }
 0x197   : > { %2245 = vst.msk [vmem:[%s3562_s18] sm:$0xf] %vm2244_vm1, %v2729_v8  ;;  %v2088_v32 = vsel %vm2086_vm2, %v2027_v28, 0.0  ;;  %v2127_v33 = vmul.f32 %v2027_v28, %v2027_v28  ;;  %v2730_v34 = vpack.c.bf16 %v2027_v28, %v2027_v28  ;;  %v2142_v39 = vsel %vm2086_vm2, %v2126_v7, 0.0 }
 0x198   : > { %2248 = vst.msk [vmem:[%s3562_s18 + $0xc] sm:$0xf] %vm2244_vm1, %v2732_v30  ;;  %v2089_v35 = vadd.f32 %v2088_v32, %v2087_v31  ;;  %v2147_v50 = vsel %vm2086_vm2, %v2129_v40, 0.0 }
 0x199   : > { %v2143_v43 = vsel %vm2086_vm2, %v2127_v33, 0.0  ;;  %2246 = vst.msk [vmem:[%s3562_s18 + $0x4] sm:$0xf] %vm2244_vm1, %v2730_v34 }
 0x19a   : > { %v2091_v44 = vadd.f32 %v2090_v36, %v2089_v35  ;;  %v2144_v45 = vadd.f32 %v2143_v43, %v2142_v39 }
 0x19c   : > { %v2146_v48 = vadd.f32 %v2145_v46, %v2144_v45  ;;  %v2093_v49 = vadd.f32 %v2092_v47, %v2091_v44 }
 0x19e   : > { %v2148_v51 = vadd.f32 %v2147_v50, %v2146_v48 }
 0x1b6   : > { %v2774_v52 = vpop.f32.mrb[4].mxu0 }
 0x1b7   : > { %v2048_v53 = vadd.f32 %v2774_v52, %v3556_v26  ;;  %v2039_v54 = vpop.f32.mrb[5].mxu0 }
 0x1b8   : > { %v2040_v56 = vadd.f32 %v3556_v26, %v2039_v54  ;;  %v2775_v57 = vpop.f32.mrb[6].mxu0 }
 0x1b9   : > { %v2735_v58 = vpack.c.bf16 %v2048_v53, %v2048_v53  ;;  %v2051_v59 = vadd.f32 %v2775_v57, %v3556_v26  ;;  %v2042_v60 = vpop.f32.mrb[7].mxu0  ;;  %v2132_v2 = vmul.f32 %v2048_v53, %v2048_v53  ;;  %v2098_v15 = vsel %vm2086_vm2, %v2048_v53, 0.0 }
 0x1ba   : > { %v2094_v61 = vsel %vm2086_vm2, %v2040_v56, 0.0  ;;  %v2130_v62 = vmul.f32 %v2040_v56, %v2040_v56  ;;  %v2733_v63 = vpack.c.bf16 %v2040_v56, %v2040_v56  ;;  %v2043_v1 = vadd.f32 %v3556_v26, %v2042_v60 }
 0x1bb   : > { %2251 = vst.msk [vmem:[%s3562_s18 + $0x18] sm:$0xf] %vm2244_vm1, %v2735_v58  ;;  %v2095_v3 = vadd.f32 %v2094_v61, %v2093_v49  ;;  %v2736_v5 = vpack.c.bf16 %v2051_v59, %v2051_v59  ;;  %v2133_v17 = vmul.f32 %v2051_v59, %v2051_v59  ;;  %v2153_v20 = vsel %vm2086_vm2, %v2132_v2, 0.0 }
 0x1bc   : > { %v2149_v4 = vsel %vm2086_vm2, %v2130_v62, 0.0  ;;  %2249 = vst.msk [vmem:[%s3562_s18 + $0x10] sm:$0xf] %vm2244_vm1, %v2733_v63  ;;  %v2096_v6 = vsel %vm2086_vm2, %v2043_v1, 0.0  ;;  %v2131_v9 = vmul.f32 %v2043_v1, %v2043_v1  ;;  %v2734_v12 = vpack.c.bf16 %v2043_v1, %v2043_v1 }
 0x1bd   : > { %v2150_v10 = vadd.f32 %v2149_v4, %v2148_v51  ;;  %v2097_v11 = vadd.f32 %v2096_v6, %v2095_v3  ;;  %2252 = vst.msk [vmem:[%s3562_s18 + $0x1c] sm:$0xf] %vm2244_vm1, %v2736_v5  ;;  %v2100_v21 = vsel %vm2086_vm2, %v2051_v59, 0.0  ;;  %v2155_v24 = vsel %vm2086_vm2, %v2133_v17, 0.0 }
 0x1be   : > { %v2151_v16 = vsel %vm2086_vm2, %v2131_v9, 0.0  ;;  %2250 = vst.msk [vmem:[%s3562_s18 + $0x14] sm:$0xf] %vm2244_vm1, %v2734_v12 }
 0x1bf   : > { %v2099_v18 = vadd.f32 %v2098_v15, %v2097_v11  ;;  %v2152_v19 = vadd.f32 %v2151_v16, %v2150_v10 }
 0x1c1   : > { %v2154_v22 = vadd.f32 %v2153_v20, %v2152_v19  ;;  %v2101_v23 = vadd.f32 %v2100_v21, %v2099_v18 }
 0x1c3   : > { %v2156_v55 = vadd.f32 %v2155_v24, %v2154_v22 }
 0x1da   : > { %v2778_v25 = vpop.f32.mrb[0].mxu1 }
 0x1db   : > { %v2064_v14 = vadd.f32 %v2778_v25, %v3556_v26  ;;  %v2055_v42 = vpop.f32.mrb[1].mxu1 }
 0x1dc   : > { %v2056_v0 = vadd.f32 %v3556_v26, %v2055_v42  ;;  %v2779_v37 = vpop.f32.mrb[2].mxu1 }
 0x1dd   : > { %v2739_v38 = vpack.c.bf16 %v2064_v14, %v2064_v14  ;;  %v2067_v13 = vadd.f32 %v2779_v37, %v3556_v26  ;;  %v2058_v41 = vpop.f32.mrb[3].mxu1  ;;  %v2136_v29 = vmul.f32 %v2064_v14, %v2064_v14  ;;  %v2106_v40 = vsel %vm2086_vm2, %v2064_v14, 0.0 }
 0x1de   : > { %v2102_v27 = vsel %vm2086_vm2, %v2056_v0, 0.0  ;;  %v2134_v7 = vmul.f32 %v2056_v0, %v2056_v0  ;;  %v2737_v8 = vpack.c.bf16 %v2056_v0, %v2056_v0  ;;  %v2059_v28 = vadd.f32 %v3556_v26, %v2058_v41 }
 0x1df   : > { %2255 = vst.msk [vmem:[%s3562_s18 + $0x28] sm:$0xf] %vm2244_vm1, %v2739_v38  ;;  %v2103_v30 = vadd.f32 %v2102_v27, %v2101_v23  ;;  %v2740_v32 = vpack.c.bf16 %v2067_v13, %v2067_v13  ;;  %v2137_v43 = vmul.f32 %v2067_v13, %v2067_v13  ;;  %v2161_v47 = vsel %vm2086_vm2, %v2136_v29, 0.0 }
 0x1e0   : > { %v2157_v31 = vsel %vm2086_vm2, %v2134_v7, 0.0  ;;  %2253 = vst.msk [vmem:[%s3562_s18 + $0x20] sm:$0xf] %vm2244_vm1, %v2737_v8  ;;  %v2104_v33 = vsel %vm2086_vm2, %v2059_v28, 0.0  ;;  %v2135_v34 = vmul.f32 %v2059_v28, %v2059_v28  ;;  %v2738_v39 = vpack.c.bf16 %v2059_v28, %v2059_v28 }
 0x1e1   : > { %v2158_v35 = vadd.f32 %v2157_v31, %v2156_v55  ;;  %v2105_v36 = vadd.f32 %v2104_v33, %v2103_v30  ;;  %2256 = vst.msk [vmem:[%s3562_s18 + $0x2c] sm:$0xf] %vm2244_vm1, %v2740_v32  ;;  %v2108_v48 = vsel %vm2086_vm2, %v2067_v13, 0.0  ;;  %v2163_v51 = vsel %vm2086_vm2, %v2137_v43, 0.0 }
 0x1e2   : > { %v2159_v44 = vsel %vm2086_vm2, %v2135_v34, 0.0  ;;  %2254 = vst.msk [vmem:[%s3562_s18 + $0x24] sm:$0xf] %vm2244_vm1, %v2738_v39 }
 0x1e3   : > { %v2107_v45 = vadd.f32 %v2106_v40, %v2105_v36  ;;  %v2160_v46 = vadd.f32 %v2159_v44, %v2158_v35 }
 0x1e5   : > { %v2162_v49 = vadd.f32 %v2161_v47, %v2160_v46  ;;  %v2109_v50 = vadd.f32 %v2108_v48, %v2107_v45 }
 0x1e7   : > { %v2164_v52 = vadd.f32 %v2163_v51, %v2162_v49 }
 0x1fd   : > { %v2782_v53 = vpop.f32.mrb[4].mxu1 }
 0x1fe   : > { %v2080_v54 = vadd.f32 %v2782_v53, %v3556_v26  ;;  %v2071_v56 = vpop.f32.mrb[5].mxu1 }
 0x1ff   : > { %v2072_v57 = vadd.f32 %v3556_v26, %v2071_v56  ;;  %v2783_v58 = vpop.f32.mrb[6].mxu1 }
 0x200   : > { %v2743_v59 = vpack.c.bf16 %v2080_v54, %v2080_v54  ;;  %v2083_v60 = vadd.f32 %v2783_v58, %v3556_v26  ;;  %v2074_v61 = vpop.f32.mrb[7].mxu1  ;;  %v2140_v3 = vmul.f32 %v2080_v54, %v2080_v54  ;;  %v2114_v17 = vsel %vm2086_vm2, %v2080_v54, 0.0 }
 0x201   : > { %v2110_v62 = vsel %vm2086_vm2, %v2072_v57, 0.0  ;;  %v2138_v63 = vmul.f32 %v2072_v57, %v2072_v57  ;;  %v2741_v1 = vpack.c.bf16 %v2072_v57, %v2072_v57  ;;  %v2075_v2 = vadd.f32 %v3556_v26, %v2074_v61 }
 0x202   : > { %2259 = vst.msk [vmem:[%s3562_s18 + $0x38] sm:$0xf] %vm2244_vm1, %v2743_v59  ;;  %v2111_v4 = vadd.f32 %v2110_v62, %v2109_v50  ;;  %v2744_v6 = vpack.c.bf16 %v2083_v60, %v2083_v60  ;;  %v2141_v16 = vmul.f32 %v2083_v60, %v2083_v60  ;;  %v2169_v20 = vsel %vm2086_vm2, %v2140_v3, 0.0 }
 0x203   : > { %v2165_v5 = vsel %vm2086_vm2, %v2138_v63, 0.0  ;;  %2257 = vst.msk [vmem:[%s3562_s18 + $0x30] sm:$0xf] %vm2244_vm1, %v2741_v1  ;;  %v2112_v9 = vsel %vm2086_vm2, %v2075_v2, 0.0  ;;  %v2139_v10 = vmul.f32 %v2075_v2, %v2075_v2  ;;  %v2742_v15 = vpack.c.bf16 %v2075_v2, %v2075_v2 }
 0x204   : > { %v2166_v11 = vadd.f32 %v2165_v5, %v2164_v52  ;;  %v2113_v12 = vadd.f32 %v2112_v9, %v2111_v4  ;;  %2260 = vst.msk [vmem:[%s3562_s18 + $0x3c] sm:$0xf] %vm2244_vm1, %v2744_v6  ;;  %v2116_v21 = vsel %vm2086_vm2, %v2083_v60, 0.0  ;;  %v2171_v24 = vsel %vm2086_vm2, %v2141_v16, 0.0 }
 0x205   : > { %v2167_v26 = vsel %vm2086_vm2, %v2139_v10, 0.0  ;;  %2258 = vst.msk [vmem:[%s3562_s18 + $0x34] sm:$0xf] %vm2244_vm1, %v2742_v15 }
 0x206   : > { %v2115_v18 = vadd.f32 %v2114_v17, %v2113_v12  ;;  %v2168_v19 = vadd.f32 %v2167_v26, %v2166_v11 }
 0x208   : > { %v2117_v22 = vadd.f32 %v2116_v21, %v2115_v18  ;;  %v2170_v23 = vadd.f32 %v2169_v20, %v2168_v19 }
 0x20a   : > { %v2118_v55 = vrot.slane %v2117_v22, 4  ;;  %v2172_v25 = vadd.f32 %v2171_v24, %v2170_v23 }
 0x20c   : > { %v2119_v14 = vadd.f32 %v2118_v55, %v2117_v22  ;;  %v2173_v42 = vrot.slane %v2172_v25, 4 }
 0x20e   : > { %v2120_v0 = vrot.slane %v2119_v14, 2  ;;  %v2174_v37 = vadd.f32 %v2173_v42, %v2172_v25 }
 0x210   : > { %v2121_v38 = vadd.f32 %v2120_v0, %v2119_v14  ;;  %v2175_v13 = vrot.slane %v2174_v37, 2 }
 0x212   : > { %v2122_v41 = vrot.slane %v2121_v38, 1  ;;  %v2176_v27 = vadd.f32 %v2175_v13, %v2174_v37 }
 0x214   : > { %v2123_v7 = vadd.f32 %v2122_v41, %v2121_v38  ;;  %v2177_v8 = vrot.slane %v2176_v27, 1 }
 0x216   : > { %2125 = vst.msk [vmem:[%s331_s16] sm:$0x1] %vm2124_vm3, %v2123_v7  ;;  %v2178_v28 = vadd.f32 %v2177_v8, %v2176_v27 }
 0x218   : > { %2179 = vst.msk [vmem:[%s341_s27] sm:$0x1] %vm2124_vm3, %v2178_v28 }
 0x219 PF: > { %s16_s22 = sadd.s32 1, %s2912_s22   ;;  %s3676_s18 = smov %s2904_s20 }
 0x21a   : > { %p13_p8 = scmp.ge.s32.totalorder %s16_s22, 6   ;;  %s3677_s19 = smov %s2908_s21 }
 0x21b   : > { %s3678_s20 = smov %s3681_s23  ;;  %s3679_s21 = smov %s3685_s24 }
 0x21c   :  { %15 = sbr.rel (!%p13_p8) target bundleno = 3 (0x3), region = 92 }

// kernel: vgg_block.6
= control target key start
LH: loop header
LB: loop body
LE: loop exit
PB: predicated region body
PF: predicated region fallthrough
CT: control target
= control target key end

     0   :  { %s3206_s18 = smov 0   ;;  %s3208_s19 = smov 0   ;;  %s4017_s0 = inlined_call_operand.vmem [shape: bf16[4,10,18,32], index: 0, kind: input, shape index: {}]   ;;  %s4018_s1 = inlined_call_operand.vmem [shape: bf16[1,288,32], index: 1, kind: input, shape index: {}]   ;;  %s4019_s2 = inlined_call_operand.vmem [shape: f32[1,1,32], index: 2, kind: input, shape index: {}]   ;;  %s4020_s3 = inlined_call_operand.vmem [shape: bf16[2,256,32], index: 3, kind: output, shape index: {0}]   ;;  %s4021_s4 = inlined_call_operand.vmem [shape: f32[4,1,32], index: 4, kind: output, shape index: {1}]   ;;  %s4022_s5 = inlined_call_operand.vmem [shape: f32[4,1,32], index: 5, kind: output, shape index: {2}]  }
   0x1   :  { %s3210_s20 = smov 0   ;;  %s3212_s21 = smov 0  }
   0x2   :  { %s3214_s22 = smov 0  }
   0x3 LB: > { %s31_s23 = sadd.s32 1, %s3163_s20  ;;  %s35_s24 = sadd.s32 1, %s3167_s21  ;;  %s3171_s22 = sphi %s3214_s22, %s16_s22   ;;  %s3167_s21 = sphi %s3212_s21, %s4030_s21   ;;  %s3163_s20 = sphi %s3210_s20, %s4029_s20   ;;  %s3159_s19 = sphi %s3208_s19, %s4028_s19   ;;  %s3155_s18 = sphi %s3206_s18, %s4027_s18  }
   0x4   : > { %p33_p0 = scmp.ge.s32.totalorder %s31_s23, 2  ;;  %p2643_p1 = scmp.ge.s32.totalorder %s3171_s22, 1 }
   0x5   : > { %p243_p2 = scmp.lt.s32.totalorder %s3171_s22, 5 }
   0x6   : > { %s4032_s23 = smov (%p33_p0, %s31_s23), 0  ;;  %s4034_s24 = smov (!%p33_p0, %s35_s24), %s3167_s21 }
   0x7   : > { %p244_p3 = pnand %p2643_p1, %p243_p2  ;;  %p37_p4 = scmp.ge.s32.totalorder %s4034_s24, 2 }
   0x8   : > { %s2644_s25 = sshll.u32 (!%p244_p3), %s3159_s19, 1  ;;  %vm742_vm0 = vcmask (!%p244_p3), 1042432   ;;  %vm743_vm1 = vcmask (!%p244_p3), 1046532   ;;  %v3106_v0 = vld [vmem:[%s4018_s1 + $0x40] sm:$0xff] (!%p244_p3)   ;;  %v3108_v3 = vld [vmem:[%s4018_s1 + $0x48] sm:$0xff] (!%p244_p3)   ;;  %v3110_v5 = vld [vmem:[%s4018_s1 + $0x50] sm:$0xff] (!%p244_p3)  }
   0x9   : > { %s4036_s24 = smov (%p37_p4, %s4034_s24), 0  ;;  %247 = sbr.rel (%p244_p3) target bundleno = 500 (0x1f4), region = 32 }
   0xa   : > { %s300_s26 = sadd.s32 (!%p244_p3), %s3155_s18, %s2644_s25  ;;  %2936 = vmatprep.subr.bf16.mxu0 (!%p244_p3), %v3106_v0  ;;  %v3107_v1 = vld [vmem:[%s4018_s1] sm:$0xff] (!%p244_p3)   ;;  %3030 = vmatprep.subr.bf16.mxu1 (!%p244_p3), %v3106_v0  ;;  %vm3250_vm2 = vmor (!%p244_p3), %vm742_vm0, %vm743_vm1  ;;  %v3109_v4 = vld [vmem:[%s4018_s1 + $0x8] sm:$0xff] (!%p244_p3)   ;;  %s3173_s28 = smov (!%p244_p3), 64   ;;  %vm442_vm3 = vsmask.f32 (!%p244_p3), 3328  ;;  %vm409_vm6 = vcmask (!%p244_p3), 261120  }
   0xb   : > { %p301_p5 = scmp.lt.s32.totalorder (!%p244_p3), %s300_s26, 3  ;;  %2937 = vmatpush3.bf16.msra.mxu0 (!%p244_p3), %v3107_v1  ;;  %3038 = vmatpush3.bf16.msra.mxu1 (!%p244_p3), %v3107_v1  ;;  %v3111_v6 = vld [vmem:[%s4018_s1 + $0x10] sm:$0xff] (!%p244_p3)   ;;  %v3112_v7 = vld [vmem:[%s4018_s1 + $0x58] sm:$0xff] (!%p244_p3)   ;;  %vm443_vm4 = vsmask.f32 (!%p244_p3), 7440  ;;  %s3174_s29 = smov (!%p244_p3), 96  }
   0xc   : > { %2938 = vmatprep.subr.bf16.mxu0 (!%p244_p3), %v3108_v3  ;;  %3031 = vmatprep.subr.bf16.mxu1 (!%p244_p3), %v3108_v3  ;;  %s3175_s30 = smov (!%p244_p3), 32   ;;  %vm3317_vm5 = vmor (!%p244_p3), %vm442_vm3, %vm443_vm4  ;;  %vm685_vm7 = vcmask (!%p244_p3), 523520   ;;  %vm849_vm8 = vcmask (!%p244_p3), 785920   ;;  %vm939_vm9 = vcmask (!%p244_p3), 1048320   ;;  %s2646_s13 = sshll.u32 (!%p244_p3), %s3155_s18, 4  ;;  %vm2422_vm10 = vcmask (!%p244_p3), 257024  }
   0xd   : > { %p312_p6 = scmp.lt.s32.totalorder (!%p244_p3), %s3159_s19, 1  ;;  %p314_p7 = scmp.lt.s32.totalorder (!%p244_p3), %s2646_s13, 31  ;;  %vm2302_vm11 = vcmask (!%p244_p3), 253952  }
   0xf   : > { %2939 = vmatpush3.bf16.msra.mxu0 (!%p244_p3), %v3109_v4  ;;  %3039 = vmatpush3.bf16.msra.mxu1 (!%p244_p3), %v3109_v4 }
  0x10   : > { %s4038_s26 = smov (!%p301_p5, %s300_s26), 3  ;;  %2940 = vmatprep.subr.bf16.mxu0 %v3110_v5  ;;  %3032 = vmatprep.subr.bf16.mxu1 %v3110_v5  ;;  %s4040_s19 = smov (!%p312_p6, %s3159_s19), 1 }
  0x11   : > { %s3046_s10 = smul.u32 120, %s4038_s26  ;;  %s4042_s13 = smov (!%p314_p7, %s2646_s13), 31 }
  0x12   : > { %s2647_s14 = sshll.u32 %s4040_s19, 5  ;;  %s331_s9 = scalar_lea.vmem %s4021_s4, %s4038_s26 }
  0x13   : > { %s3270_s17 = scalar_lea.vmem %s4017_s0, %s3046_s10  ;;  %2941 = vmatpush3.bf16.msra.mxu0 %v3111_v6  ;;  %3040 = vmatpush3.bf16.msra.mxu1 %v3111_v6  ;;  %s320_s15 = sadd.s32 %s2647_s14, %s4042_s13 }
  0x14   : > { %v3090_v8 = vld [vmem:[%s3270_s17 + $0x18] sm:$0xff]   ;;  %v3091_v9 = vld [vmem:[%s3270_s17 + $0x24] sm:$0xff]   ;;  %v3092_v10 = vld [vmem:[%s3270_s17 + $0xc] sm:$0xff]   ;;  %2942 = vmatprep.subr.bf16.mxu0 %v3112_v7  ;;  %3033 = vmatprep.subr.bf16.mxu1 %v3112_v7  ;;  %s2648_s25 = sshll.u32 %s320_s15, 2  ;;  %s341_s12 = scalar_lea.vmem %s4022_s5, %s4038_s26 }
  0x15   : > { %1421 = vrot.lane.b32.xlu1 %v3090_v8, %s3173_s28  ;;  %1423 = vrot.lane.b32.xlu0 %v3091_v9, %s3173_s28  ;;  %v2739_v11 = vld [vmem:[%s3270_s17 + $0xc] sm:$0xe]  ;;  %v2740_v12 = vld [vmem:[%s3270_s17 + $0x10] sm:$0xf]  ;;  %s3891_s6 = scalar_lea.vmem %s4020_s3, %s2648_s25 }
  0x16   : > { %v2741_v13 = vld [vmem:[%s3270_s17 + $0x14] sm:$0x1]  ;;  %v2763_v14 = vrot.slane %v2739_v11, 9  ;;  %v1254_v15 = vrot.slane %v2740_v12, 5  ;;  %v2742_v17 = vld [vmem:[%s3270_s17 + $0x18] sm:$0xe] }
  0x17   : > { %v1257_v16 = vrot.slane %v2741_v13, 5  ;;  %v2743_v18 = vld [vmem:[%s3270_s17 + $0x1c] sm:$0xf]  ;;  %v3093_v21 = vld [vmem:[%s3270_s17 + $0x60] sm:$0xff]   ;;  %v2764_v23 = vrot.slane %v2742_v17, 9 }
  0x18   : > { %v1255_v19 = vsel %vm3250_vm2, %v2763_v14, %v1254_v15  ;;  %v1256_v20 = vrot.slane %v1254_v15, 4  ;;  %v2744_v22 = vld [vmem:[%s3270_s17 + $0x20] sm:$0x1]  ;;  %v1261_v24 = vrot.slane %v2743_v18, 5  ;;  %v694_v26 = vld [vmem:[%s3270_s17] sm:$0xe] }
  0x19   : > { %915 = vrot.lane.b32.xlu1 %v3092_v10, %s3174_s29  ;;  %v1264_v25 = vrot.slane %v2744_v22, 5  ;;  %v695_v27 = vld [vmem:[%s3270_s17 + $0x4] sm:$0xf]  ;;  %v696_v31 = vld [vmem:[%s3270_s17 + $0x8] sm:$0x1]  ;;  %v2667_v32 = vrot.slane %v694_v26, 9 }
  0x1a   : > { %v1258_v28 = vsel %vm3250_vm2, %v1256_v20, %v1257_v16  ;;  %v1262_v29 = vsel %vm3250_vm2, %v2764_v23, %v1261_v24  ;;  %v1263_v30 = vrot.slane %v1261_v24, 4  ;;  %v418_v33 = vld [vmem:[%s3270_s17] sm:$0xf]  ;;  %v747_v35 = vrot.slane %v695_v27, 5  ;;  %v419_v37 = vld [vmem:[%s3270_s17 + $0x4] sm:$0xf] }
  0x1b   : > { %v2771_v34 = vcombine.low %v1255_v19, %v1258_v28  ;;  %v750_v36 = vrot.slane %v696_v31, 5  ;;  %v420_v38 = vld [vmem:[%s3270_s17 + $0x8] sm:$0x1]  ;;  %v446_v40 = vshrl.u32 %v418_v33, 16  ;;  %v449_v41 = vshll.u32 %v418_v33, 16 }
  0x1c   : > { %v1265_v39 = vsel %vm3250_vm2, %v1263_v30, %v1264_v25  ;;  %v455_v42 = vshll.u32 %v419_v37, 16  ;;  %v2757_v43 = vld [vmem:[%s3270_s17 + $0x54] sm:$0xe]  ;;  %v748_v45 = vsel %vm3250_vm2, %v2667_v32, %v747_v35  ;;  %v749_v46 = vrot.slane %v747_v35, 4  ;;  %v2758_v48 = vld [vmem:[%s3270_s17 + $0x58] sm:$0xf] }
  0x1d   : > { %1433 = vrot.lane.b32.xlu1 %v3093_v21, %s3173_s28  ;;  %1332 = vrot.lane.b32.xlu0 %v2771_v34, %s3175_s30  ;;  %v2772_v44 = vcombine.low %v1262_v29, %v1265_v39  ;;  %v459_v47 = vshrl.u32 %v419_v37, 16  ;;  %v2759_v49 = vld [vmem:[%s3270_s17 + $0x5c] sm:$0x1]  ;;  %v448_v50 = vrot.slane %v446_v40, 4  ;;  %v451_v51 = vrot.slane %v449_v41, 5 }
  0x1e   : > { %v457_v52 = vrot.slane %v455_v42, 5  ;;  %v465_v53 = vshll.u32 %v420_v38, 16  ;;  %v2803_v54 = vld [vmem:[%s3270_s17 + $0x18] sm:$0xf]  ;;  %v751_v55 = vsel %vm3250_vm2, %v749_v46, %v750_v36  ;;  %v2769_v57 = vrot.slane %v2757_v43, 9 }
  0x1f   : > { %v461_v56 = vrot.slane %v459_v47, 4  ;;  %v1296_v58 = vrot.slane %v2758_v48, 5  ;;  %v2804_v59 = vld [vmem:[%s3270_s17 + $0x1c] sm:$0xf]  ;;  %v2675_v60 = vcombine.low %v748_v45, %v751_v55  ;;  %v452_v61 = vor.u32 %v451_v51, %v448_v50  ;;  %v2805_v0 = vld [vmem:[%s3270_s17 + $0x20] sm:$0x1] }
  0x20   : > { %v467_v62 = vrot.slane %v465_v53, 5  ;;  %v1299_v63 = vrot.slane %v2759_v49, 5  ;;  %v1478_v6 = vshrl.u32 %v2803_v54, 16  ;;  %v1481_v8 = vshll.u32 %v2803_v54, 16  ;;  %v436_v11 = vld [vmem:[%s3270_s17 + $0x48] sm:$0xf] }
  0x21   : > { %1334 = vrot.lane.b32.xlu0 %v2772_v44, %s3175_s30  ;;  %v462_v3 = vor.u32 %v461_v56, %v457_v52  ;;  %v1297_v4 = vsel %vm3250_vm2, %v2769_v57, %v1296_v58  ;;  %v1298_v5 = vrot.slane %v1296_v58, 4  ;;  %825 = vrot.lane.b32.xlu1 %v2675_v60, %s3173_s28  ;;  %v453_v7 = vrot.slane %v452_v61, 4  ;;  %v437_v16 = vld [vmem:[%s3270_s17 + $0x4c] sm:$0xf]  ;;  %v438_v21 = vld [vmem:[%s3270_s17 + $0x50] sm:$0x1] }
  0x22   : > { %v1487_v9 = vshll.u32 %v2804_v59, 16  ;;  %v1491_v10 = vshrl.u32 %v2804_v59, 16  ;;  %v1480_v14 = vrot.slane %v1478_v6, 4  ;;  %v1497_v15 = vshll.u32 %v2805_v0, 16  ;;  %v421_v26 = vld [vmem:[%s3270_s17 + $0xc] sm:$0xf] }
  0x23   : > { %v463_v12 = vrot.slane %v462_v3, 4  ;;  %v1300_v13 = vsel %vm3250_vm2, %v1298_v5, %v1299_v63  ;;  %v458_v17 = vsel %vm3317_vm5, %v453_v7, %v457_v52  ;;  %v1483_v19 = vrot.slane %v1481_v8, 5  ;;  %v422_v35 = vld [vmem:[%s3270_s17 + $0x10] sm:$0xf]  ;;  %v423_v39 = vld [vmem:[%s3270_s17 + $0x14] sm:$0x1] }
  0x24   : > { %v2777_v18 = vcombine.low %v1297_v4, %v1300_v13  ;;  %v1489_v20 = vrot.slane %v1487_v9, 5  ;;  %v1493_v23 = vrot.slane %v1491_v10, 4  ;;  %v1499_v24 = vrot.slane %v1497_v15, 5  ;;  %v712_v45 = vld [vmem:[%s3270_s17 + $0x48] sm:$0xe] }
  0x25   : > { %v468_v22 = vsel %vm3317_vm5, %v463_v12, %v467_v62  ;;  %v590_v25 = vshrl.u32 %v436_v11, 16  ;;  %v1484_v28 = vor.u32 %v1483_v19, %v1480_v14  ;;  %v593_v29 = vshll.u32 %v436_v11, 16  ;;  %v713_v50 = vld [vmem:[%s3270_s17 + $0x4c] sm:$0xf]  ;;  %v714_v51 = vld [vmem:[%s3270_s17 + $0x50] sm:$0x1] }
  0x26   : > { %v2659_v27 = vcombine.low %v458_v17, %v468_v22  ;;  %1344 = vrot.lane.b32.xlu1 %v2777_v18, %s3175_s30  ;;  %v599_v30 = vshll.u32 %v437_v16, 16  ;;  %v1494_v31 = vor.u32 %v1493_v23, %v1489_v20  ;;  %v603_v33 = vshrl.u32 %v437_v16, 16  ;;  %v697_v56 = vld [vmem:[%s3270_s17 + $0xc] sm:$0xe]  ;;  %v698_v57 = vld [vmem:[%s3270_s17 + $0x10] sm:$0xf] }
  0x27   : > { %v592_v32 = vrot.slane %v590_v25, 4  ;;  %v609_v34 = vshll.u32 %v438_v21, 16  ;;  %v1485_v36 = vrot.slane %v1484_v28, 4  ;;  %v595_v37 = vrot.slane %v593_v29, 5  ;;  %v699_v62 = vld [vmem:[%s3270_s17 + $0x14] sm:$0x1] }
  0x28   : > { %661 = vrot.lane.b32.xlu0 %v2659_v27, %s3175_s30  ;;  %v601_v38 = vrot.slane %v599_v30, 5  ;;  %v470_v40 = vshrl.u32 %v421_v26, 16  ;;  %v1495_v41 = vrot.slane %v1494_v31, 4  ;;  %v605_v42 = vrot.slane %v603_v33, 4  ;;  %v2821_v63 = vld [vmem:[%s3270_s17 + $0x60] sm:$0xf] }
  0x29   : > { %v611_v43 = vrot.slane %v609_v34, 5  ;;  %v473_v44 = vshll.u32 %v421_v26, 16  ;;  %v1490_v46 = vsel %vm3317_vm5, %v1485_v36, %v1489_v20  ;;  %v596_v47 = vor.u32 %v595_v37, %v592_v32  ;;  %v2822_v18 = vld [vmem:[%s3270_s17 + $0x64] sm:$0xf]  ;;  %v2823_v26 = vld [vmem:[%s3270_s17 + $0x68] sm:$0x1] }
  0x2a   : > { %v472_v48 = vrot.slane %v470_v40, 4  ;;  %v479_v49 = vshll.u32 %v422_v35, 16  ;;  %v1500_v52 = vsel %vm3317_vm5, %v1495_v41, %v1499_v24  ;;  %v606_v53 = vor.u32 %v605_v42, %v601_v38  ;;  %v2806_v28 = vld [vmem:[%s3270_s17 + $0x24] sm:$0xf]  ;;  %v2807_v33 = vld [vmem:[%s3270_s17 + $0x28] sm:$0xf] }
  0x2b   : > { %v475_v54 = vrot.slane %v473_v44, 5  ;;  %v483_v55 = vshrl.u32 %v422_v35, 16  ;;  %v2827_v58 = vcombine.low %v1490_v46, %v1500_v52  ;;  %v597_v59 = vrot.slane %v596_v47, 4  ;;  %v2808_v34 = vld [vmem:[%s3270_s17 + $0x2c] sm:$0x1] }
  0x2c   : > { %v481_v60 = vrot.slane %v479_v49, 5  ;;  %v489_v61 = vshll.u32 %v423_v39, 16  ;;  %v607_v0 = vrot.slane %v606_v53, 4  ;;  %v2673_v5 = vrot.slane %v712_v45, 9  ;;  %v2760_v39 = vld [vmem:[%s3270_s17 + $0x60] sm:$0xe] }
  0x2d   : > { %v476_v3 = vor.u32 %v475_v54, %v472_v48  ;;  %v485_v4 = vrot.slane %v483_v55, 4  ;;  %1693 = vrot.lane.b32.xlu0 %v2827_v58, %s3174_s29  ;;  %v602_v6 = vsel %vm3317_vm5, %v597_v59, %v601_v38  ;;  %v789_v8 = vrot.slane %v713_v50, 5  ;;  %v2761_v40 = vld [vmem:[%s3270_s17 + $0x64] sm:$0xf]  ;;  %v2762_v45 = vld [vmem:[%s3270_s17 + $0x68] sm:$0x1] }
  0x2e   : > { %v491_v7 = vrot.slane %v489_v61, 5  ;;  %v792_v9 = vrot.slane %v714_v51, 5  ;;  %v612_v10 = vsel %vm3317_vm5, %v607_v0, %v611_v43  ;;  %v2668_v13 = vrot.slane %v697_v56, 9  ;;  %v2745_v50 = vld [vmem:[%s3270_s17 + $0x24] sm:$0xe]  ;;  %v3113_v51 = vld [vmem:[%s4018_s1 + $0x18] sm:$0xff]  }
  0x2f   : > { %v477_v11 = vrot.slane %v476_v3, 4  ;;  %v486_v12 = vor.u32 %v485_v4, %v481_v60  ;;  %v2665_v14 = vcombine.low %v602_v6, %v612_v10  ;;  %v790_v15 = vsel %vm3250_vm2, %v2673_v5, %v789_v8  ;;  %v2746_v56 = vld [vmem:[%s3270_s17 + $0x28] sm:$0xf]  ;;  %2943 = vmatpush3.bf16.msra.mxu0 %v3113_v51  ;;  %3041 = vmatpush3.bf16.msra.mxu1 %v3113_v51 }
  0x30   : > { %v791_v16 = vrot.slane %v789_v8, 4  ;;  %v754_v17 = vrot.slane %v698_v57, 5  ;;  %v757_v21 = vrot.slane %v699_v62, 5  ;;  %v1622_v22 = vshrl.u32 %v2821_v63, 16  ;;  %v2747_v57 = vld [vmem:[%s3270_s17 + $0x2c] sm:$0x1] }
  0x31   : > { %v482_v19 = vsel %vm3317_vm5, %v477_v11, %v481_v60  ;;  %v487_v20 = vrot.slane %v486_v12, 4  ;;  %673 = vrot.lane.b32.xlu1 %v2665_v14, %s3175_s30  ;;  %v1625_v27 = vshll.u32 %v2821_v63, 16  ;;  %v1631_v32 = vshll.u32 %v2822_v18, 16  ;;  %v439_v62 = vld [vmem:[%s3270_s17 + $0x54] sm:$0xf]  ;;  %v3114_v63 = vld [vmem:[%s4018_s1 + $0x60] sm:$0xff]  }
  0x32   : > { %v793_v23 = vsel %vm3250_vm2, %v791_v16, %v792_v9  ;;  %v755_v24 = vsel %vm3250_vm2, %v2668_v13, %v754_v17  ;;  %v756_v25 = vrot.slane %v754_v17, 4  ;;  %v1624_v31 = vrot.slane %v1622_v22, 4  ;;  %2944 = vmatprep.subr.bf16.mxu0 %v3114_v63  ;;  %3034 = vmatprep.subr.bf16.mxu1 %v3114_v63  ;;  %v3094_v22 = vld [vmem:[%s3270_s17 + $0x54] sm:$0xff]   ;;  %v3118_v51 = vld [vmem:[%s4018_s1 + $0x28] sm:$0xff]  }
  0x33   : > { %v492_v29 = vsel %vm3317_vm5, %v487_v20, %v491_v7  ;;  %v2681_v30 = vcombine.low %v790_v15, %v793_v23  ;;  %v1627_v37 = vrot.slane %v1625_v27, 5  ;;  %v1635_v38 = vshrl.u32 %v2822_v18, 16  ;;  %v440_v18 = vld [vmem:[%s3270_s17 + $0x58] sm:$0xf]  ;;  %v3119_v63 = vld [vmem:[%s4018_s1 + $0x70] sm:$0xff]  }
  0x34   : > { %v2660_v35 = vcombine.low %v482_v19, %v492_v29  ;;  %v758_v36 = vsel %vm3250_vm2, %v756_v25, %v757_v21  ;;  %v1633_v42 = vrot.slane %v1631_v32, 5  ;;  %v1641_v43 = vshll.u32 %v2823_v26, 16  ;;  %v3115_v19 = vld [vmem:[%s4018_s1 + $0x20] sm:$0xff]  }
  0x35   : > { %v2676_v41 = vcombine.low %v755_v24, %v758_v36  ;;  %v1502_v44 = vshrl.u32 %v2806_v28, 16  ;;  %837 = vrot.lane.b32.xlu1 %v2681_v30, %s3173_s28  ;;  %v1628_v46 = vor.u32 %v1627_v37, %v1624_v31  ;;  %v1637_v47 = vrot.slane %v1635_v38, 4  ;;  %v441_v24 = vld [vmem:[%s3270_s17 + $0x5c] sm:$0x1]  ;;  %v424_v30 = vld [vmem:[%s3270_s17 + $0x18] sm:$0xf]  ;;  %2945 = vmatpush3.bf16.msra.mxu0 %v3115_v19 }
  0x36   : > { %663 = vrot.lane.b32.xlu0 %v2660_v35, %s3175_s30  ;;  %v1505_v48 = vshll.u32 %v2806_v28, 16  ;;  %v1511_v49 = vshll.u32 %v2807_v33, 16  ;;  %v1643_v52 = vrot.slane %v1641_v43, 5  ;;  %v1515_v54 = vshrl.u32 %v2807_v33, 16  ;;  %v425_v31 = vld [vmem:[%s3270_s17 + $0x1c] sm:$0xf]  ;;  %3042 = vmatpush3.bf16.msra.mxu1 %v3115_v19 }
  0x37   : > { %v1504_v53 = vrot.slane %v1502_v44, 4  ;;  %v1521_v55 = vshll.u32 %v2808_v34, 16  ;;  %v1629_v58 = vrot.slane %v1628_v46, 4  ;;  %v1638_v59 = vor.u32 %v1637_v47, %v1633_v42  ;;  %v3116_v32 = vld [vmem:[%s3270_s17] sm:$0xff]   ;;  %v3117_v38 = vld [vmem:[%s4018_s1 + $0x68] sm:$0xff]  }
  0x38   : > { %v1507_v60 = vrot.slane %v1505_v48, 5  ;;  %v1513_v61 = vrot.slane %v1511_v49, 5  ;;  %v1517_v0 = vrot.slane %v1515_v54, 4  ;;  %v2770_v4 = vrot.slane %v2760_v39, 9  ;;  %v426_v37 = vld [vmem:[%s3270_s17 + $0x20] sm:$0x1]  ;;  %2946 = vmatprep.subr.bf16.mxu0 %v3117_v38  ;;  %3035 = vmatprep.subr.bf16.mxu1 %v3117_v38 }
  0x39   : > { %v1523_v3 = vrot.slane %v1521_v55, 5  ;;  %v1303_v5 = vrot.slane %v2761_v40, 5  ;;  %v1634_v6 = vsel %vm3317_vm5, %v1629_v58, %v1633_v42  ;;  %v1639_v7 = vrot.slane %v1638_v59, 4  ;;  %v3095_v40 = vld [vmem:[%s3270_s17 + $0x18] sm:$0xff]   ;;  %v715_v44 = vld [vmem:[%s3270_s17 + $0x54] sm:$0xe]  ;;  %2947 = vmatpush3.bf16.msra.mxu0 %v3118_v51 }
  0x3a   : > { %827 = vrot.lane.b32.xlu0 %v2676_v41, %s3173_s28  ;;  %v1508_v8 = vor.u32 %v1507_v60, %v1504_v53  ;;  %v1306_v9 = vrot.slane %v2762_v45, 5  ;;  %v1518_v10 = vor.u32 %v1517_v0, %v1513_v61  ;;  %v2765_v13 = vrot.slane %v2745_v50, 9  ;;  %v716_v45 = vld [vmem:[%s3270_s17 + $0x58] sm:$0xf]  ;;  %410 = vst.msk [vmem:[#allocation2] sm:$0xff] %vm409_vm6, %v3116_v32  ;;  %3043 = vmatpush3.bf16.msra.mxu1 %v3118_v51 }
  0x3b   : > { %v3392_v11 = vsel %vm3250_vm2, %v2770_v4, %v1303_v5  ;;  %v1305_v12 = vrot.slane %v1303_v5, 4  ;;  %v1644_v14 = vsel %vm3317_vm5, %v1639_v7, %v1643_v52  ;;  %v1268_v16 = vrot.slane %v2746_v56, 5  ;;  %v717_v50 = vld [vmem:[%s3270_s17 + $0x5c] sm:$0x1]  ;;  %v700_v56 = vld [vmem:[%s3270_s17 + $0x18] sm:$0xe]  ;;  %2948 = vmatprep.subr.bf16.mxu0 %v3119_v63  ;;  %3036 = vmatprep.subr.bf16.mxu1 %v3119_v63 }
  0x3c   : > { %v1509_v15 = vrot.slane %v1508_v8, 4  ;;  %v1271_v17 = vrot.slane %v2747_v57, 5  ;;  %v2833_v20 = vcombine.low %v1634_v6, %v1644_v14  ;;  %v1519_v21 = vrot.slane %v1518_v10, 4  ;;  %v3449_v6 = vld [vmem:[%s3270_s17 + $0x6c] sm:$0xf]  ;;  %v3120_v7 = vld [vmem:[%s4018_s1 + $0x30] sm:$0xff]  }
  0x3d   : > { %v3403_v23 = vsel %vm3250_vm2, %v1305_v12, %v1306_v9  ;;  %v614_v25 = vshrl.u32 %v439_v62, 16  ;;  %v3412_v28 = vsel %vm3250_vm2, %v2765_v13, %v1268_v16  ;;  %v1270_v29 = vrot.slane %v1268_v16, 4  ;;  %2949 = vmatpush3.bf16.msra.mxu0 %v3120_v7  ;;  %v2811_v51 = vld [vmem:[%s3270_s17 + $0x38] sm:$0x1] }
  0x3e   : > { %v1514_v26 = vsel %vm3317_vm5, %v1509_v15, %v1513_v61  ;;  %v2778_v27 = vcombine.low %v3392_v11, %v3403_v23  ;;  %1705 = vrot.lane.b32.xlu1 %v2833_v20, %s3174_s29  ;;  %v1524_v33 = vsel %vm3317_vm5, %v1519_v21, %v1523_v3  ;;  %v617_v35 = vshll.u32 %v439_v62, 16  ;;  %v701_v61 = vld [vmem:[%s3270_s17 + $0x1c] sm:$0xf]  ;;  %v3443_v62 = vld [vmem:[%s3270_s17 + $0x20] sm:$0x1]  ;;  %3044 = vmatpush3.bf16.msra.mxu1 %v3120_v7 }
  0x3f   : > { %v616_v34 = vrot.slane %v614_v25, 4  ;;  %v623_v36 = vshll.u32 %v440_v18, 16  ;;  %v2828_v39 = vcombine.low %v1514_v26, %v1524_v33  ;;  %v3427_v41 = vsel %vm3250_vm2, %v1270_v29, %v1271_v17  ;;  %v3121_v17 = vld [vmem:[%s3270_s17 + $0x48] sm:$0xff]   ;;  %v2825_v26 = vld [vmem:[%s3270_s17 + $0x70] sm:$0xf] }
  0x40   : > { %v627_v42 = vshrl.u32 %v440_v18, 16  ;;  %v633_v43 = vshll.u32 %v441_v24, 16  ;;  %v2773_v46 = vcombine.low %v3412_v28, %v3427_v41  ;;  %v619_v47 = vrot.slane %v617_v35, 5  ;;  %416 = vst.msk [vmem:[#allocation2 + $0x90] sm:$0xff] %vm409_vm6, %v3121_v17  ;;  %v2826_v33 = vld [vmem:[%s3270_s17 + $0x74] sm:$0x1] }
  0x41   : > { %v625_v48 = vrot.slane %v623_v36, 5  ;;  %v494_v49 = vshrl.u32 %v424_v30, 16  ;;  %1695 = vrot.lane.b32.xlu0 %v2828_v39, %s3174_s29  ;;  %v497_v54 = vshll.u32 %v424_v30, 16  ;;  %v503_v55 = vshll.u32 %v425_v31, 16  ;;  %v2809_v35 = vld [vmem:[%s3270_s17 + $0x30] sm:$0xf] }
  0x42   : > { %v629_v52 = vrot.slane %v627_v42, 4  ;;  %v635_v53 = vrot.slane %v633_v43, 5  ;;  %927 = vrot.lane.b32.xlu1 %v3094_v22, %s3174_s29  ;;  %v620_v57 = vor.u32 %v619_v47, %v616_v34  ;;  %v507_v59 = vshrl.u32 %v425_v31, 16  ;;  %v3122_v22 = vld [vmem:[%s3270_s17 + $0xc] sm:$0xff]   ;;  %v3124_v28 = vld [vmem:[%s4018_s1 + $0x38] sm:$0xff]  }
  0x43   : > { %v496_v58 = vrot.slane %v494_v49, 4  ;;  %v513_v60 = vshll.u32 %v426_v37, 16  ;;  %v499_v3 = vrot.slane %v497_v54, 5  ;;  %v505_v4 = vrot.slane %v503_v55, 5  ;;  %v3096_v31 = vld [vmem:[%s3270_s17 + $0x6c] sm:$0xff]   ;;  %411 = vst.msk [vmem:[#allocation2 + $0x18] sm:$0xff] %vm409_vm6, %v3122_v22 }
  0x44   : > { %v630_v0 = vor.u32 %v629_v52, %v625_v48  ;;  %v2674_v5 = vrot.slane %v715_v44, 9  ;;  %v621_v8 = vrot.slane %v620_v57, 4  ;;  %v509_v9 = vrot.slane %v507_v59, 4  ;;  %v3097_v47 = vld [vmem:[%s3270_s17 + $0x30] sm:$0xff]   ;;  %v2750_v63 = vld [vmem:[%s3270_s17 + $0x38] sm:$0x1] }
  0x45   : > { %v515_v10 = vrot.slane %v513_v60, 5  ;;  %v796_v12 = vrot.slane %v716_v45, 5  ;;  %917 = vrot.lane.b32.xlu0 %v3095_v40, %s3174_s29  ;;  %v500_v14 = vor.u32 %v499_v3, %v496_v58  ;;  %v799_v15 = vrot.slane %v717_v50, 5  ;;  %v2810_v40 = vld [vmem:[%s3270_s17 + $0x34] sm:$0xf]  ;;  %v3126_v58 = vld [vmem:[%s3270_s17 + $0x18] sm:$0xff]  }
  0x46   : > { %v631_v13 = vrot.slane %v630_v0, 4  ;;  %v2669_v16 = vrot.slane %v700_v56, 9  ;;  %1346 = vrot.lane.b32.xlu1 %v2778_v27, %s3175_s30  ;;  %v626_v18 = vsel %vm3317_vm5, %v621_v8, %v625_v48  ;;  %v510_v19 = vor.u32 %v509_v9, %v505_v4  ;;  %v3123_v27 = vld [vmem:[%s4018_s1 + $0x78] sm:$0xff]   ;;  %v2748_v52 = vld [vmem:[%s3270_s17 + $0x30] sm:$0xe]  ;;  %412 = vst.msk [vmem:[#allocation2 + $0x30] sm:$0xff] %vm409_vm6, %v3126_v58 }
  0x47   : > { %v3464_v20 = vsel %vm3250_vm2, %v2674_v5, %v796_v12  ;;  %v798_v21 = vrot.slane %v796_v12, 4  ;;  %v501_v25 = vrot.slane %v500_v14, 4  ;;  %v761_v11 = vrot.slane %v701_v61, 5  ;;  %2950 = vmatprep.subr.bf16.mxu0 %v3123_v27  ;;  %3037 = vmatprep.subr.bf16.mxu1 %v3123_v27  ;;  %v3125_v45 = vld [vmem:[%s3270_s17 + $0x54] sm:$0xff]   ;;  %v428_v12 = vld [vmem:[%s3270_s17 + $0x28] sm:$0xf] }
  0x48   : > { %v636_v24 = vsel %vm3317_vm5, %v631_v13, %v635_v53  ;;  %v764_v23 = vrot.slane %v3443_v62, 5  ;;  %v511_v30 = vrot.slane %v510_v19, 4  ;;  %v1646_v34 = vshrl.u32 %v3449_v6, 16  ;;  %2951 = vmatpush3.bf16.msra.mxu0 %v3124_v28  ;;  %3045 = vmatpush3.bf16.msra.mxu1 %v3124_v28  ;;  %v2749_v57 = vld [vmem:[%s3270_s17 + $0x34] sm:$0xf]  ;;  %417 = vst.msk [vmem:[#allocation2 + $0xa8] sm:$0xff] %vm409_vm6, %v3125_v45 }
  0x49   : > { %v2666_v29 = vcombine.low %v626_v18, %v636_v24  ;;  %v3478_v32 = vsel %vm3250_vm2, %v798_v21, %v799_v15  ;;  %1336 = vrot.lane.b32.xlu0 %v2773_v46, %s3175_s30  ;;  %v506_v36 = vsel %vm3317_vm5, %v501_v25, %v505_v4  ;;  %v3494_v38 = vsel %vm3250_vm2, %v2669_v16, %v761_v11 }
  0x4a   : > { %v2682_v37 = vcombine.low %v3464_v20, %v3478_v32  ;;  %v763_v39 = vrot.slane %v761_v11, 4  ;;  %v516_v41 = vsel %vm3317_vm5, %v511_v30, %v515_v10  ;;  %v1648_v42 = vrot.slane %v1646_v34, 4  ;;  %v429_v11 = vld [vmem:[%s3270_s17 + $0x2c] sm:$0x1]  ;;  %v3098_v34 = vld [vmem:[%s3270_s17 + $0x60] sm:$0xff]  }
  0x4b   : > { %675 = vrot.lane.b32.xlu1 %v2666_v29, %s3175_s30  ;;  %v1649_v43 = vshll.u32 %v3449_v6, 16  ;;  %v1655_v44 = vshll.u32 %v2825_v26, 16  ;;  %v2661_v46 = vcombine.low %v506_v36, %v516_v41  ;;  %v1659_v49 = vshrl.u32 %v2825_v26, 16  ;;  %v427_v6 = vld [vmem:[%s3270_s17 + $0x24] sm:$0xf] }
  0x4c   : > { %v765_v48 = vsel %vm3250_vm2, %v763_v39, %v764_v23  ;;  %v1665_v50 = vshll.u32 %v2826_v33, 16  ;;  %v1526_v56 = vshrl.u32 %v2809_v35, 16  ;;  %v1529_v61 = vshll.u32 %v2809_v35, 16  ;;  %v3127_v23 = vld [vmem:[%s3270_s17 + $0x24] sm:$0xff]  }
  0x4d   : > { %v2677_v53 = vcombine.low %v3494_v38, %v765_v48  ;;  %v1651_v54 = vrot.slane %v1649_v43, 5  ;;  %v1657_v55 = vrot.slane %v1655_v44, 5  ;;  %665 = vrot.lane.b32.xlu0 %v2661_v46, %s3175_s30  ;;  %v1661_v59 = vrot.slane %v1659_v49, 4  ;;  %v705_v38 = vld [vmem:[%s3270_s17 + $0x2c] sm:$0x1]  ;;  %413 = vst.msk [vmem:[#allocation2 + $0x48] sm:$0xff] %vm409_vm6, %v3127_v23 }
  0x4e   : > { %v1667_v60 = vrot.slane %v1665_v50, 5  ;;  %v1535_v62 = vshll.u32 %v2810_v40, 16  ;;  %v1528_v3 = vrot.slane %v1526_v56, 4  ;;  %v1539_v4 = vshrl.u32 %v2810_v40, 16  ;;  %v3099_v49 = vld [vmem:[%s3270_s17 + $0x24] sm:$0xff]  }
  0x4f   : > { %1435 = vrot.lane.b32.xlu1 %v3096_v31, %s3173_s28  ;;  %v1652_v0 = vor.u32 %v1651_v54, %v1648_v42  ;;  %v1545_v5 = vshll.u32 %v2811_v51, 16  ;;  %v1662_v7 = vor.u32 %v1661_v59, %v1657_v55  ;;  %v1531_v8 = vrot.slane %v1529_v61, 5  ;;  %v703_v31 = vld [vmem:[%s3270_s17 + $0x24] sm:$0xe]  ;;  %v2812_v42 = vld [vmem:[%s3270_s17 + $0x3c] sm:$0xf] }
  0x50   : > { %v1537_v9 = vrot.slane %v1535_v62, 5  ;;  %v2766_v10 = vrot.slane %v2748_v52, 9  ;;  %v1541_v14 = vrot.slane %v1539_v4, 4  ;;  %v1275_v16 = vrot.slane %v2749_v57, 5  ;;  %v2814_v56 = vld [vmem:[%s3270_s17 + $0x44] sm:$0x1] }
  0x51   : > { %v1653_v13 = vrot.slane %v1652_v0, 4  ;;  %v1547_v15 = vrot.slane %v1545_v5, 5  ;;  %1425 = vrot.lane.b32.xlu0 %v3097_v47, %s3173_s28  ;;  %v1663_v17 = vrot.slane %v1662_v7, 4  ;;  %v1532_v18 = vor.u32 %v1531_v8, %v1528_v3  ;;  %v3128_v47 = vld [vmem:[%s4018_s1 + $0x80] sm:$0xff]  }
  0x52   : > { %v1278_v19 = vrot.slane %v2750_v63, 5  ;;  %v518_v20 = vshrl.u32 %v427_v6, 16  ;;  %v1542_v22 = vor.u32 %v1541_v14, %v1537_v9  ;;  %v3526_v24 = vsel %vm3250_vm2, %v2766_v10, %v1275_v16  ;;  %3010 = vmatprep.subr.bf16.mxu1 %v3128_v47  ;;  %v2751_v63 = vld [vmem:[%s3270_s17 + $0x3c] sm:$0xe]  ;;  %v2752_v0 = vld [vmem:[%s3270_s17 + $0x40] sm:$0xf] }
  0x53   : > { %839 = vrot.lane.b32.xlu1 %v2682_v37, %s3173_s28  ;;  %v1658_v21 = vsel %vm3317_vm5, %v1653_v13, %v1657_v55  ;;  %v1277_v25 = vrot.slane %v1275_v16, 4  ;;  %v1668_v26 = vsel %vm3317_vm5, %v1663_v17, %v1667_v60  ;;  %v1533_v27 = vrot.slane %v1532_v18, 4  ;;  %v704_v37 = vld [vmem:[%s3270_s17 + $0x28] sm:$0xf]  ;;  %v2753_v7 = vld [vmem:[%s3270_s17 + $0x44] sm:$0x1] }
  0x54   : > { %v520_v29 = vrot.slane %v518_v20, 4  ;;  %v521_v30 = vshll.u32 %v427_v6, 16  ;;  %v2834_v32 = vcombine.low %v1658_v21, %v1668_v26  ;;  %v1543_v33 = vrot.slane %v1542_v22, 4  ;;  %v430_v17 = vld [vmem:[%s3270_s17 + $0x30] sm:$0xf] }
  0x55   : > { %v3536_v35 = vsel %vm3250_vm2, %v1277_v25, %v1278_v19  ;;  %v527_v36 = vshll.u32 %v428_v12, 16  ;;  %829 = vrot.lane.b32.xlu0 %v2677_v53, %s3173_s28  ;;  %v1538_v39 = vsel %vm3317_vm5, %v1533_v27, %v1537_v9  ;;  %v531_v41 = vshrl.u32 %v428_v12, 16  ;;  %v2813_v53 = vld [vmem:[%s3270_s17 + $0x40] sm:$0xf]  ;;  %v431_v22 = vld [vmem:[%s3270_s17 + $0x34] sm:$0xf] }
  0x56   : > { %v2774_v40 = vcombine.low %v3526_v24, %v3536_v35  ;;  %v523_v28 = vrot.slane %v521_v30, 5  ;;  %v1548_v43 = vsel %vm3317_vm5, %v1543_v33, %v1547_v15  ;;  %v537_v45 = vshll.u32 %v429_v11, 16  ;;  %v432_v27 = vld [vmem:[%s3270_s17 + $0x38] sm:$0x1] }
  0x57   : > { %1707 = vrot.lane.b32.xlu1 %v2834_v32, %s3174_s29  ;;  %v529_v44 = vrot.slane %v527_v36, 5  ;;  %v2670_v46 = vrot.slane %v703_v31, 9  ;;  %v2829_v48 = vcombine.low %v1538_v39, %v1548_v43  ;;  %v533_v51 = vrot.slane %v531_v41, 4  ;;  %v708_v36 = vld [vmem:[%s3270_s17 + $0x38] sm:$0x1]  ;;  %v3100_v43 = vld [vmem:[%s3270_s17 + $0x3c] sm:$0xff]  }
  0x58   : > { %v524_v50 = vor.u32 %v523_v28, %v520_v29  ;;  %v768_v52 = vrot.slane %v704_v37, 5  ;;  %v539_v54 = vrot.slane %v537_v45, 5  ;;  %v771_v55 = vrot.slane %v705_v38, 5  ;;  %v706_v29 = vld [vmem:[%s3270_s17 + $0x30] sm:$0xe] }
  0x59   : > { %v1550_v57 = vshrl.u32 %v2812_v42, 16  ;;  %v1553_v58 = vshll.u32 %v2812_v42, 16  ;;  %1697 = vrot.lane.b32.xlu0 %v2829_v48, %s3174_s29  ;;  %v534_v60 = vor.u32 %v533_v51, %v529_v44  ;;  %v1559_v5 = vshll.u32 %v2813_v53, 16  ;;  %v2815_v37 = vld [vmem:[%s3270_s17 + $0x48] sm:$0xf]  ;;  %v3130_v38 = vld [vmem:[%s3270_s17 + $0x30] sm:$0xff]  }
  0x5a   : > { %v525_v59 = vrot.slane %v524_v50, 4  ;;  %v769_v61 = vsel %vm3250_vm2, %v2670_v46, %v768_v52  ;;  %v770_v62 = vrot.slane %v768_v52, 4  ;;  %v1563_v6 = vshrl.u32 %v2813_v53, 16  ;;  %414 = vst.msk [vmem:[#allocation2 + $0x60] sm:$0xff] %vm409_vm6, %v3130_v38  ;;  %v711_v38 = vld [vmem:[%s3270_s17 + $0x44] sm:$0x1] }
  0x5b   : > { %929 = vrot.lane.b32.xlu1 %v3098_v34, %s3174_s29  ;;  %v1552_v3 = vrot.slane %v1550_v57, 4  ;;  %v1555_v4 = vrot.slane %v1553_v58, 5  ;;  %v535_v9 = vrot.slane %v534_v60, 4  ;;  %v1569_v12 = vshll.u32 %v2814_v56, 16  ;;  %v707_v34 = vld [vmem:[%s3270_s17 + $0x34] sm:$0xf] }
  0x5c   : > { %v530_v8 = vsel %vm3317_vm5, %v525_v59, %v529_v44  ;;  %v772_v10 = vsel %vm3250_vm2, %v770_v62, %v771_v55  ;;  %v1561_v15 = vrot.slane %v1559_v5, 5  ;;  %v1565_v16 = vrot.slane %v1563_v6, 4  ;;  %v3101_v55 = vld [vmem:[%s3270_s17 + $0x30] sm:$0xff]   ;;  %v2754_v60 = vld [vmem:[%s3270_s17 + $0x48] sm:$0xe] }
  0x5d   : > { %v2678_v13 = vcombine.low %v769_v61, %v772_v10  ;;  %v1556_v14 = vor.u32 %v1555_v4, %v1552_v3  ;;  %919 = vrot.lane.b32.xlu0 %v3099_v49, %s3174_s29  ;;  %v540_v18 = vsel %vm3317_vm5, %v535_v9, %v539_v54  ;;  %v1571_v19 = vrot.slane %v1569_v12, 5  ;;  %v2816_v49 = vld [vmem:[%s3270_s17 + $0x4c] sm:$0xf]  ;;  %v2817_v54 = vld [vmem:[%s3270_s17 + $0x50] sm:$0x1] }
  0x5e   : > { %v2767_v20 = vrot.slane %v2751_v63, 9  ;;  %v1282_v21 = vrot.slane %v2752_v0, 5  ;;  %v2662_v25 = vcombine.low %v530_v8, %v540_v18  ;;  %v1566_v23 = vor.u32 %v1565_v16, %v1561_v15  ;;  %v2755_v3 = vld [vmem:[%s3270_s17 + $0x4c] sm:$0xf]  ;;  %v2756_v4 = vld [vmem:[%s3270_s17 + $0x50] sm:$0x1] }
  0x5f   : > { %v1557_v11 = vrot.slane %v1556_v14, 4  ;;  %v1285_v26 = vrot.slane %v2753_v7, 5  ;;  %v542_v32 = vshrl.u32 %v430_v17, 16  ;;  %v545_v33 = vshll.u32 %v430_v17, 16  ;;  %v433_v5 = vld [vmem:[%s3270_s17 + $0x3c] sm:$0xf] }
  0x60   : > { %v3576_v30 = vsel %vm3250_vm2, %v2767_v20, %v1282_v21  ;;  %v1284_v31 = vrot.slane %v1282_v21, 4  ;;  %667 = vrot.lane.b32.xlu1 %v2662_v25, %s3175_s30  ;;  %v1567_v28 = vrot.slane %v1566_v23, 4  ;;  %v551_v41 = vshll.u32 %v431_v22, 16 }
  0x61   : > { %v1562_v39 = vsel %vm3317_vm5, %v1557_v11, %v1561_v15  ;;  %v555_v42 = vshrl.u32 %v431_v22, 16  ;;  %1338 = vrot.lane.b32.xlu0 %v2774_v40, %s3175_s30  ;;  %v544_v45 = vrot.slane %v542_v32, 4  ;;  %v547_v46 = vrot.slane %v545_v33, 5  ;;  %v435_v11 = vld [vmem:[%s3270_s17 + $0x44] sm:$0x1]  ;;  %v3102_v32 = vld [vmem:[%s3270_s17 + $0x48] sm:$0xff]  }
  0x62   : > { %v3592_v44 = vsel %vm3250_vm2, %v1284_v31, %v1285_v26  ;;  %v561_v47 = vshll.u32 %v432_v27, 16  ;;  %v1572_v48 = vsel %vm3317_vm5, %v1567_v28, %v1571_v19  ;;  %v553_v35 = vrot.slane %v551_v41, 5  ;;  %v434_v19 = vld [vmem:[%s3270_s17 + $0x40] sm:$0xf] }
  0x63   : > { %v2775_v24 = vcombine.low %v3576_v30, %v3592_v44  ;;  %v557_v40 = vrot.slane %v555_v42, 4  ;;  %v2830_v50 = vcombine.low %v1562_v39, %v1572_v48  ;;  %v548_v51 = vor.u32 %v547_v46, %v544_v45  ;;  %v709_v30 = vld [vmem:[%s3270_s17 + $0x3c] sm:$0xe]  ;;  %v710_v31 = vld [vmem:[%s3270_s17 + $0x40] sm:$0xf] }
  0x64   : > { %v563_v52 = vrot.slane %v561_v47, 5  ;;  %v2671_v53 = vrot.slane %v706_v29, 9  ;;  %831 = vrot.lane.b32.xlu1 %v2678_v13, %s3173_s28  ;;  %v775_v57 = vrot.slane %v707_v34, 5  ;;  %v778_v58 = vrot.slane %v708_v36, 5  ;;  %v2818_v39 = vld [vmem:[%s3270_s17 + $0x54] sm:$0xf] }
  0x65   : > { %v558_v56 = vor.u32 %v557_v40, %v553_v35  ;;  %v1574_v59 = vshrl.u32 %v2815_v37, 16  ;;  %1427 = vrot.lane.b32.xlu0 %v3100_v43, %s3173_s28  ;;  %v549_v61 = vrot.slane %v548_v51, 4  ;;  %v1577_v62 = vshll.u32 %v2815_v37, 16  ;;  %v3131_v44 = vld [vmem:[%s3270_s17 + $0x3c] sm:$0xff]  }
  0x66   : > { %v1583_v63 = vshll.u32 %v2816_v49, 16  ;;  %v1587_v0 = vshrl.u32 %v2816_v49, 16  ;;  %v776_v7 = vsel %vm3250_vm2, %v2671_v53, %v775_v57  ;;  %v777_v8 = vrot.slane %v775_v57, 4  ;;  %415 = vst.msk [vmem:[#allocation2 + $0x78] sm:$0xff] %vm409_vm6, %v3131_v44 }
  0x67   : > { %v559_v6 = vrot.slane %v558_v56, 4  ;;  %v1576_v9 = vrot.slane %v1574_v59, 4  ;;  %v554_v10 = vsel %vm3317_vm5, %v549_v61, %v553_v35  ;;  %v1579_v12 = vrot.slane %v1577_v62, 5  ;;  %v2819_v35 = vld [vmem:[%s3270_s17 + $0x58] sm:$0xf]  ;;  %v3103_v56 = vld [vmem:[%s3270_s17 + $0x3c] sm:$0xff]  }
  0x68   : > { %v1585_v13 = vrot.slane %v1583_v63, 5  ;;  %v1589_v14 = vrot.slane %v1587_v0, 4  ;;  %921 = vrot.lane.b32.xlu1 %v3101_v55, %s3174_s29  ;;  %v779_v16 = vsel %vm3250_vm2, %v777_v8, %v778_v58  ;;  %v1593_v17 = vshll.u32 %v2817_v54, 16  ;;  %v2707_v61 = vld [vmem:[%s3270_s17 + $0xc] sm:$0xf] }
  0x69   : > { %v564_v15 = vsel %vm3317_vm5, %v559_v6, %v563_v52  ;;  %v2768_v18 = vrot.slane %v2754_v60, 9  ;;  %1699 = vrot.lane.b32.xlu0 %v2830_v50, %s3174_s29  ;;  %v2679_v21 = vcombine.low %v776_v7, %v779_v16  ;;  %v1580_v22 = vor.u32 %v1579_v12, %v1576_v9  ;;  %v2820_v52 = vld [vmem:[%s3270_s17 + $0x5c] sm:$0x1] }
  0x6a   : > { %v2663_v20 = vcombine.low %v554_v10, %v564_v15  ;;  %v1590_v25 = vor.u32 %v1589_v14, %v1585_v13  ;;  %v1595_v23 = vrot.slane %v1593_v17, 5  ;;  %v1289_v26 = vrot.slane %v2755_v3, 5  ;;  %v2709_v14 = vld [vmem:[%s3270_s17 + $0x14] sm:$0x1] }
  0x6b   : > { %v1292_v27 = vrot.slane %v2756_v4, 5  ;;  %v566_v29 = vshrl.u32 %v433_v5, 16  ;;  %v1581_v33 = vrot.slane %v1580_v22, 4  ;;  %v569_v36 = vshll.u32 %v433_v5, 16 }
  0x6c   : > { %v1591_v34 = vrot.slane %v1590_v25, 4  ;;  %v575_v37 = vshll.u32 %v434_v19, 16  ;;  %669 = vrot.lane.b32.xlu1 %v2663_v20, %s3175_s30  ;;  %v3628_v28 = vsel %vm3250_vm2, %v2768_v18, %v1289_v26  ;;  %v1291_v41 = vrot.slane %v1289_v26, 4 }
  0x6d   : > { %v568_v42 = vrot.slane %v566_v29, 4  ;;  %v579_v43 = vshrl.u32 %v434_v19, 16  ;;  %1340 = vrot.lane.b32.xlu0 %v2775_v24, %s3175_s30  ;;  %v1586_v45 = vsel %vm3317_vm5, %v1581_v33, %v1585_v13  ;;  %v571_v47 = vrot.slane %v569_v36, 5  ;;  %v2708_v13 = vld [vmem:[%s3270_s17 + $0x10] sm:$0xf] }
  0x6e   : > { %v1596_v46 = vsel %vm3317_vm5, %v1591_v34, %v1595_v23  ;;  %v577_v48 = vrot.slane %v575_v37, 5  ;;  %v1293_v49 = vsel %vm3250_vm2, %v1291_v41, %v1292_v27  ;;  %v585_v51 = vshll.u32 %v435_v11, 16  ;;  %v2710_v19 = vld [vmem:[%s3270_s17 + $0x18] sm:$0xf]  ;;  %v2711_v11 = vld [vmem:[%s3270_s17 + $0x1c] sm:$0xf] }
  0x6f   : > { %v2831_v40 = vcombine.low %v1586_v45, %v1596_v46  ;;  %v581_v50 = vrot.slane %v579_v43, 4  ;;  %v2776_v24 = vcombine.low %v3628_v28, %v1293_v49  ;;  %v572_v53 = vor.u32 %v571_v47, %v568_v42  ;;  %v2725_v28 = vld [vmem:[%s3270_s17 + $0x54] sm:$0xf]  ;;  %v2726_v46 = vld [vmem:[%s3270_s17 + $0x58] sm:$0xf] }
  0x70   : > { %v2672_v54 = vrot.slane %v709_v30, 9  ;;  %v782_v55 = vrot.slane %v710_v31, 5  ;;  %833 = vrot.lane.b32.xlu1 %v2679_v21, %s3173_s28  ;;  %v587_v58 = vrot.slane %v585_v51, 5  ;;  %v785_v59 = vrot.slane %v711_v38, 5  ;;  %v2712_v30 = vld [vmem:[%s3270_s17 + $0x20] sm:$0x1] }
  0x71   : > { %v582_v57 = vor.u32 %v581_v50, %v577_v48  ;;  %v1598_v60 = vshrl.u32 %v2818_v39, 16  ;;  %1429 = vrot.lane.b32.xlu0 %v3102_v32, %s3173_s28  ;;  %v573_v62 = vrot.slane %v572_v53, 4  ;;  %v1601_v3 = vshll.u32 %v2818_v39, 16  ;;  %v3104_v41 = vld [vmem:[%s3270_s17 + $0x54] sm:$0xff]   ;;  %v3105_v53 = vld [vmem:[%s3270_s17 + $0x48] sm:$0xff]  }
  0x72   : > { %v783_v63 = vsel %vm3250_vm2, %v2672_v54, %v782_v55  ;;  %v784_v0 = vrot.slane %v782_v55, 4  ;;  %v1607_v6 = vshll.u32 %v2819_v35, 16  ;;  %v1611_v7 = vshrl.u32 %v2819_v35, 16 }
  0x73   : > { %v583_v4 = vrot.slane %v582_v57, 4  ;;  %v1600_v5 = vrot.slane %v1598_v60, 4  ;;  %v578_v8 = vsel %vm3317_vm5, %v573_v62, %v577_v48  ;;  %v1603_v10 = vrot.slane %v1601_v3, 5  ;;  %v2728_v3 = vld [vmem:[%s3270_s17 + $0x60] sm:$0xf] }
  0x74   : > { %v786_v9 = vsel %vm3250_vm2, %v784_v0, %v785_v59  ;;  %v1617_v12 = vshll.u32 %v2820_v52, 16  ;;  %923 = vrot.lane.b32.xlu1 %v3103_v56, %s3174_s29  ;;  %v1609_v17 = vrot.slane %v1607_v6, 5  ;;  %v1613_v18 = vrot.slane %v1611_v7, 4  ;;  %v2727_v52 = vld [vmem:[%s3270_s17 + $0x5c] sm:$0x1] }
  0x75   : > { %v588_v15 = vsel %vm3317_vm5, %v583_v4, %v587_v58  ;;  %v2680_v16 = vcombine.low %v783_v63, %v786_v9  ;;  %1701 = vrot.lane.b32.xlu0 %v2831_v40, %s3174_s29  ;;  %v1604_v21 = vor.u32 %v1603_v10, %v1600_v5  ;;  %v973_v25 = vshrl.u32 %v2707_v61, 16 }
  0x76   : > { %v2664_v20 = vcombine.low %v578_v8, %v588_v15  ;;  %v1619_v22 = vrot.slane %v1617_v12, 5  ;;  %v1614_v23 = vor.u32 %v1613_v18, %v1609_v17  ;;  %v976_v26 = vshll.u32 %v2707_v61, 16  ;;  %v2729_v8 = vld [vmem:[%s3270_s17 + $0x64] sm:$0xf] }
  0x77   : > { %v982_v27 = vshll.u32 %v2708_v13, 16  ;;  %v986_v29 = vshrl.u32 %v2708_v13, 16  ;;  %v1605_v31 = vrot.slane %v1604_v21, 4  ;;  %v975_v32 = vrot.slane %v973_v25, 4  ;;  %v2713_v15 = vld [vmem:[%s3270_s17 + $0x24] sm:$0xf] }
  0x78   : > { %v992_v33 = vshll.u32 %v2709_v14, 16  ;;  %v997_v34 = vshrl.u32 %v2710_v19, 16  ;;  %671 = vrot.lane.b32.xlu1 %v2664_v20, %s3175_s30  ;;  %v1615_v36 = vrot.slane %v1614_v23, 4  ;;  %v978_v37 = vrot.slane %v976_v26, 5  ;;  %v2730_v14 = vld [vmem:[%s3270_s17 + $0x68] sm:$0x1] }
  0x79   : > { %v984_v38 = vrot.slane %v982_v27, 5  ;;  %v988_v39 = vrot.slane %v986_v29, 4  ;;  %1342 = vrot.lane.b32.xlu0 %v2776_v24, %s3175_s30  ;;  %v1610_v42 = vsel %vm3317_vm5, %v1605_v31, %v1609_v17  ;;  %v1000_v45 = vshll.u32 %v2710_v19, 16  ;;  %v2714_v20 = vld [vmem:[%s3270_s17 + $0x28] sm:$0xf] }
  0x7a   : > { %v994_v43 = vrot.slane %v992_v33, 5  ;;  %v999_v44 = vrot.slane %v997_v34, 4  ;;  %v1620_v47 = vsel %vm3317_vm5, %v1615_v36, %v1619_v22  ;;  %v979_v48 = vor.u32 %v978_v37, %v975_v32 }
  0x7b   : > { %v989_v35 = vor.u32 %v988_v39, %v984_v38  ;;  %v1006_v40 = vshll.u32 %v2711_v11, 16  ;;  %v1002_v49 = vrot.slane %v1000_v45, 5  ;;  %v1010_v50 = vshrl.u32 %v2711_v11, 16  ;;  %v2715_v39 = vld [vmem:[%s3270_s17 + $0x2c] sm:$0x1] }
  0x7c   : > { %v1016_v51 = vshll.u32 %v2712_v30, 16  ;;  %835 = vrot.lane.b32.xlu1 %v2680_v16, %s3173_s28  ;;  %v2832_v24 = vcombine.low %v1610_v42, %v1620_v47  ;;  %v980_v54 = vrot.slane %v979_v48, 4  ;;  %v1117_v60 = vshrl.u32 %v2725_v28, 16  ;;  %v2716_v45 = vld [vmem:[%s3270_s17 + $0x30] sm:$0xf] }
  0x7d   : > { %v990_v55 = vrot.slane %v989_v35, 4  ;;  %v1008_v56 = vrot.slane %v1006_v40, 5  ;;  %1431 = vrot.lane.b32.xlu0 %v3104_v41, %s3173_s28  ;;  %v1003_v57 = vor.u32 %v1002_v49, %v999_v44  ;;  %v1012_v58 = vrot.slane %v1010_v50, 4  ;;  %v2717_v40 = vld [vmem:[%s3270_s17 + $0x34] sm:$0xf] }
  0x7e   : > { %v1018_v59 = vrot.slane %v1016_v51, 5  ;;  %v985_v61 = vsel %vm3317_vm5, %v980_v54, %v984_v38  ;;  %v1120_v63 = vshll.u32 %v2725_v28, 16  ;;  %v1126_v0 = vshll.u32 %v2726_v46, 16 }
  0x7f   : > { %v995_v62 = vsel %vm3317_vm5, %v990_v55, %v994_v43  ;;  %v1004_v5 = vrot.slane %v1003_v57, 4  ;;  %v1013_v6 = vor.u32 %v1012_v58, %v1008_v56  ;;  %v1119_v7 = vrot.slane %v1117_v60, 4 }
  0x80   : > { %v2731_v4 = vcombine.low %v985_v61, %v995_v62  ;;  %925 = vrot.lane.b32.xlu1 %v3105_v53, %s3174_s29  ;;  %v1122_v9 = vrot.slane %v1120_v63, 5  ;;  %v1128_v10 = vrot.slane %v1126_v0, 5  ;;  %v1130_v12 = vshrl.u32 %v2726_v46, 16  ;;  %v2718_v53 = vld [vmem:[%s3270_s17 + $0x38] sm:$0x1] }
  0x81   : > { %v1136_v13 = vshll.u32 %v2727_v52, 16  ;;  %1703 = vrot.lane.b32.xlu0 %v2832_v24, %s3174_s29  ;;  %v1009_v16 = vsel %vm3317_vm5, %v1004_v5, %v1008_v56  ;;  %v1014_v17 = vrot.slane %v1013_v6, 4  ;;  %v1141_v18 = vshrl.u32 %v2728_v3, 16 }
  0x82   : > { %1196 = vst.msk [vmem:[#allocation2 + $0x8] sm:$0xff] %vm409_vm6, %v2731_v4  ;;  %v1144_v19 = vshll.u32 %v2728_v3, 16  ;;  %v1123_v21 = vor.u32 %v1122_v9, %v1119_v7  ;;  %v1132_v22 = vrot.slane %v1130_v12, 4  ;;  %v1150_v11 = vshll.u32 %v2729_v8, 16  ;;  %v2835_v9 = vld [vmem:[%s3270_s17 + $0x18] sm:$0xe] }
  0x83   : > { %v1138_v25 = vrot.slane %v1136_v13, 5  ;;  %v1019_v23 = vsel %vm3317_vm5, %v1014_v17, %v1018_v59  ;;  %v1143_v26 = vrot.slane %v1141_v18, 4  ;;  %v1154_v29 = vshrl.u32 %v2729_v8, 16 }
  0x84   : > { %v1146_v27 = vrot.slane %v1144_v19, 5  ;;  %v2732_v30 = vcombine.low %v1009_v16, %v1019_v23  ;;  %v1124_v31 = vrot.slane %v1123_v21, 4  ;;  %v1133_v32 = vor.u32 %v1132_v22, %v1128_v10  ;;  %v2836_v16 = vld [vmem:[%s3270_s17 + $0x1c] sm:$0xf] }
  0x85   : > { %v1152_v33 = vrot.slane %v1150_v11, 5  ;;  %v1156_v37 = vrot.slane %v1154_v29, 4  ;;  %v1160_v38 = vshll.u32 %v2730_v14, 16  ;;  %v1021_v28 = vshrl.u32 %v2713_v15, 16  ;;  %v2720_v29 = vld [vmem:[%s3270_s17 + $0x40] sm:$0xf] }
  0x86   : > { %v1147_v36 = vor.u32 %v1146_v27, %v1143_v26  ;;  %1197 = vst.msk [vmem:[#allocation2 + $0x20] sm:$0xff] %vm409_vm6, %v2732_v30  ;;  %v1129_v41 = vsel %vm3317_vm5, %v1124_v31, %v1128_v10  ;;  %v1134_v42 = vrot.slane %v1133_v32, 4  ;;  %v1024_v43 = vshll.u32 %v2713_v15, 16  ;;  %v2719_v27 = vld [vmem:[%s3270_s17 + $0x3c] sm:$0xf] }
  0x87   : > { %v3690_v34 = vpop.permute.xlu1 %1421  ;;  %v1030_v44 = vshll.u32 %v2714_v20, 16  ;;  %v1157_v47 = vor.u32 %v1156_v37, %v1152_v33  ;;  %v1162_v48 = vrot.slane %v1160_v38, 5  ;;  %v1023_v35 = vrot.slane %v1021_v28, 4  ;;  %v3698_v49 = vpop.permute.xlu0 %1423  ;;  %v2838_v37 = vld [vmem:[%s3270_s17 + $0x24] sm:$0xe] }
  0x88   : > { %v1148_v46 = vrot.slane %v1147_v36, 4  ;;  %v1139_v50 = vsel %vm3317_vm5, %v1134_v42, %v1138_v25  ;;  %v1026_v51 = vrot.slane %v1024_v43, 5  ;;  %v1034_v24 = vshrl.u32 %v2714_v20, 16  ;;  %v2837_v20 = vld [vmem:[%s3270_s17 + $0x20] sm:$0x1] }
  0x89   : > { %v1032_v52 = vrot.slane %v1030_v44, 5  ;;  %v2737_v55 = vcombine.low %v1129_v41, %v1139_v50  ;;  %v1158_v57 = vrot.slane %v1157_v47, 4  ;;  %v1040_v58 = vshll.u32 %v2715_v39, 16  ;;  %v2839_v42 = vld [vmem:[%s3270_s17 + $0x28] sm:$0xf] }
  0x8a   : > { %v1153_v56 = vsel %vm3317_vm5, %v1148_v46, %v1152_v33  ;;  %v1027_v59 = vor.u32 %v1026_v51, %v1023_v35  ;;  %v1036_v60 = vrot.slane %v1034_v24, 4  ;;  %v1045_v61 = vshrl.u32 %v2716_v45, 16  ;;  %v2721_v33 = vld [vmem:[%s3270_s17 + $0x44] sm:$0x1]  ;;  %v2840_v47 = vld [vmem:[%s3270_s17 + $0x2c] sm:$0x1] }
  0x8b   : > { %v3703_v54 = vpop.permute.xlu1 %915  ;;  %v1048_v62 = vshll.u32 %v2716_v45, 16  ;;  %1202 = vst.msk [vmem:[#allocation2 + $0x98] sm:$0xff] %vm409_vm6, %v2737_v55  ;;  %v1163_v63 = vsel %vm3317_vm5, %v1158_v57, %v1162_v48  ;;  %v1042_v0 = vrot.slane %v1040_v58, 5  ;;  %v1054_v3 = vshll.u32 %v2717_v40, 16 }
  0x8c   : > { %v1058_v4 = vshrl.u32 %v2717_v40, 16  ;;  %v2738_v5 = vcombine.low %v1153_v56, %v1163_v63  ;;  %v1028_v6 = vrot.slane %v1027_v59, 4  ;;  %v1037_v7 = vor.u32 %v1036_v60, %v1032_v52  ;;  %v2841_v56 = vld [vmem:[%s3270_s17 + $0x30] sm:$0xe] }
  0x8d   : > { %v1047_v8 = vrot.slane %v1045_v61, 4  ;;  %v1050_v12 = vrot.slane %v1048_v62, 5  ;;  %v1056_v13 = vrot.slane %v1054_v3, 5  ;;  %v1064_v15 = vshll.u32 %v2718_v53, 16  ;;  %v2842_v61 = vld [vmem:[%s3270_s17 + $0x34] sm:$0xf] }
  0x8e   : > { %v1060_v14 = vrot.slane %v1058_v4, 4  ;;  %1203 = vst.msk [vmem:[#allocation2 + $0xb0] sm:$0xff] %vm409_vm6, %v2738_v5  ;;  %v1033_v18 = vsel %vm3317_vm5, %v1028_v6, %v1032_v52  ;;  %v1038_v19 = vrot.slane %v1037_v7, 4  ;;  %v2859_v21 = vrot.slane %v2835_v9, 9  ;;  %v2844_v9 = vld [vmem:[%s3270_s17 + $0x3c] sm:$0xe] }
  0x8f   : > { %v3711_v10 = vpop.permute.xlu1 %1433  ;;  %v1333_v17 = vpop.permute.xlu0 %1332  ;;  %v1775_v22 = vrot.slane %v2836_v16, 5  ;;  %v1051_v25 = vor.u32 %v1050_v12, %v1047_v8  ;;  %v1066_v23 = vrot.slane %v1064_v15, 5  ;;  %v1778_v26 = vrot.slane %v2837_v20, 5  ;;  %v2845_v15 = vld [vmem:[%s3270_s17 + $0x40] sm:$0xf] }
  0x90   : > { %1356 = vst.msk [vmem:[#allocation2 + $0x8] sm:$0xff] %vm685_vm7, %v1333_v17  ;;  %v1061_v11 = vor.u32 %v1060_v14, %v1056_v13  ;;  %v1043_v30 = vsel %vm3317_vm5, %v1038_v19, %v1042_v0  ;;  %v1069_v36 = vshrl.u32 %v2719_v27, 16  ;;  %v1072_v41 = vshll.u32 %v2719_v27, 16  ;;  %v2846_v16 = vld [vmem:[%s3270_s17 + $0x44] sm:$0x1] }
  0x91   : > { %1445 = vst.msk [vmem:[#allocation2 + $0x8] sm:$0xff] %vm849_vm8, %v3690_v34  ;;  %v1776_v31 = vsel %vm3250_vm2, %v2859_v21, %v1775_v22  ;;  %v1777_v32 = vrot.slane %v1775_v22, 4  ;;  %v2733_v38 = vcombine.low %v1033_v18, %v1043_v30  ;;  %v1052_v39 = vrot.slane %v1051_v25, 4  ;;  %v2722_v22 = vld [vmem:[%s3270_s17 + $0x48] sm:$0xf] }
  0x92   : > { %v1062_v28 = vrot.slane %v1061_v11, 4  ;;  %v1071_v44 = vrot.slane %v1069_v36, 4  ;;  %v1078_v45 = vshll.u32 %v2720_v29, 16  ;;  %v1082_v46 = vshrl.u32 %v2720_v29, 16  ;;  %v2723_v25 = vld [vmem:[%s3270_s17 + $0x4c] sm:$0xf] }
  0x93   : > { %v1335_v43 = vpop.permute.xlu0 %1334  ;;  %v1779_v34 = vsel %vm3250_vm2, %v1777_v32, %v1778_v26  ;;  %v826_v48 = vpop.permute.xlu1 %825  ;;  %1198 = vst.msk [vmem:[#allocation2 + $0x38] sm:$0xff] %vm409_vm6, %v2733_v38  ;;  %v1057_v35 = vsel %vm3317_vm5, %v1052_v39, %v1056_v13  ;;  %v1074_v51 = vrot.slane %v1072_v41, 5  ;;  %v1088_v55 = vshll.u32 %v2721_v33, 16  ;;  %v2724_v27 = vld [vmem:[%s3270_s17 + $0x50] sm:$0x1] }
  0x94   : > { %1357 = vst.msk [vmem:[#allocation2 + $0x20] sm:$0xff] %vm685_vm7, %v1335_v43  ;;  %v1067_v40 = vsel %vm3317_vm5, %v1062_v28, %v1066_v23  ;;  %v2867_v50 = vcombine.low %v1776_v31, %v1779_v34  ;;  %v1080_v24 = vrot.slane %v1078_v45, 5  ;;  %v1084_v53 = vrot.slane %v1082_v46, 4  ;;  %v2847_v33 = vld [vmem:[%s3270_s17 + $0x48] sm:$0xe] }
  0x95   : > { %1446 = vst.msk [vmem:[#allocation2 + $0x20] sm:$0xff] %vm849_vm8, %v3698_v49  ;;  %v2734_v52 = vcombine.low %v1057_v35, %v1067_v40  ;;  %v1075_v57 = vor.u32 %v1074_v51, %v1071_v44  ;;  %v2860_v58 = vrot.slane %v2838_v37, 9  ;;  %v1782_v59 = vrot.slane %v2839_v42, 5  ;;  %v2843_v49 = vld [vmem:[%s3270_s17 + $0x38] sm:$0x1] }
  0x96   : > { %1861 = vst.msk [vmem:[#allocation2 + $0x10] sm:$0xff] %vm409_vm6, %v2867_v50  ;;  %v1785_v60 = vrot.slane %v2840_v47, 5  ;;  %v1085_v62 = vor.u32 %v1084_v53, %v1080_v24  ;;  %v1090_v63 = vrot.slane %v1088_v55, 5  ;;  %v2861_v0 = vrot.slane %v2841_v56, 9  ;;  %v2848_v42 = vld [vmem:[%s3270_s17 + $0x4c] sm:$0xf] }
  0x97   : > { %1199 = vst.msk [vmem:[#allocation2 + $0x50] sm:$0xff] %vm409_vm6, %v2734_v52  ;;  %v1789_v3 = vrot.slane %v2842_v61, 5  ;;  %v1076_v5 = vrot.slane %v1075_v57, 4  ;;  %v1783_v6 = vsel %vm3250_vm2, %v2860_v58, %v1782_v59  ;;  %v1784_v7 = vrot.slane %v1782_v59, 4  ;;  %v2849_v43 = vld [vmem:[%s3270_s17 + $0x50] sm:$0x1] }
  0x98   : > { %v1345_v4 = vpop.permute.xlu1 %1344  ;;  %v1792_v8 = vrot.slane %v2843_v49, 5  ;;  %v1086_v12 = vrot.slane %v1085_v62, 4  ;;  %v2862_v20 = vrot.slane %v2844_v9, 9  ;;  %v1796_v21 = vrot.slane %v2845_v15, 5  ;;  %v2850_v47 = vld [vmem:[%s3270_s17 + $0x54] sm:$0xe] }
  0x99   : > { %1362 = vst.msk [vmem:[#allocation2 + $0x98] sm:$0xff] %vm685_vm7, %v1345_v4  ;;  %v1790_v13 = vsel %vm3250_vm2, %v2861_v0, %v1789_v3  ;;  %v1791_v14 = vrot.slane %v1789_v3, 4  ;;  %v1081_v18 = vsel %vm3317_vm5, %v1076_v5, %v1080_v24  ;;  %v1786_v19 = vsel %vm3250_vm2, %v1784_v7, %v1785_v60  ;;  %v2851_v52 = vld [vmem:[%s3270_s17 + $0x58] sm:$0xf]  ;;  %v2852_v53 = vld [vmem:[%s3270_s17 + $0x5c] sm:$0x1] }
  0x9a   : > { %v662_v17 = vpop.permute.xlu0 %661  ;;  %1451 = vst.msk [vmem:[#allocation2 + $0x98] sm:$0xff] %vm849_vm8, %v3711_v10  ;;  %v1091_v11 = vsel %vm3317_vm5, %v1086_v12, %v1090_v63  ;;  %v2868_v23 = vcombine.low %v1783_v6, %v1786_v19  ;;  %v1799_v26 = vrot.slane %v2846_v16, 5  ;;  %v1797_v31 = vsel %vm3250_vm2, %v2862_v20, %v1796_v21  ;;  %v2853_v57 = vld [vmem:[%s3270_s17 + $0x60] sm:$0xe]  ;;  %v2854_v62 = vld [vmem:[%s3270_s17 + $0x64] sm:$0xf] }
  0x9b   : > { %686 = vst.msk [vmem:[#allocation2] sm:$0xff] %vm685_vm7, %v662_v17  ;;  %v1793_v10 = vsel %vm3250_vm2, %v1791_v14, %v1792_v8  ;;  %v2735_v29 = vcombine.low %v1081_v18, %v1091_v11  ;;  %v1798_v32 = vrot.slane %v1796_v21, 4  ;;  %v1093_v36 = vshrl.u32 %v2722_v22, 16  ;;  %v2855_v63 = vld [vmem:[%s3270_s17 + $0x68] sm:$0x1] }
  0x9c   : > { %850 = vst.msk [vmem:[#allocation2] sm:$0xff] %vm849_vm8, %v826_v48  ;;  %v2869_v30 = vcombine.low %v1790_v13, %v1793_v10  ;;  %v1096_v37 = vshll.u32 %v2722_v22, 16  ;;  %v1102_v38 = vshll.u32 %v2723_v25, 16  ;;  %v1106_v39 = vshrl.u32 %v2723_v25, 16  ;;  %v2856_v5 = vld [vmem:[%s3270_s17 + $0x6c] sm:$0xe] }
  0x9d   : > { %940 = vst.msk [vmem:[#allocation2] sm:$0xff] %vm939_vm9, %v3703_v54  ;;  %v1800_v28 = vsel %vm3250_vm2, %v1798_v32, %v1799_v26  ;;  %v1112_v41 = vshll.u32 %v2724_v27, 16  ;;  %v2863_v54 = vrot.slane %v2847_v33, 9  ;;  %v1095_v44 = vrot.slane %v1093_v36, 4  ;;  %v2857_v16 = vld [vmem:[%s3270_s17 + $0x70] sm:$0xf] }
  0x9e   : > { %1862 = vst.msk [vmem:[#allocation2 + $0x28] sm:$0xff] %vm409_vm6, %v2868_v23  ;;  %1200 = vst.msk [vmem:[#allocation2 + $0x68] sm:$0xff] %vm409_vm6, %v2735_v29  ;;  %v2870_v34 = vcombine.low %v1797_v31, %v1800_v28  ;;  %v1098_v45 = vrot.slane %v1096_v37, 5  ;;  %v1104_v46 = vrot.slane %v1102_v38, 5  ;;  %v1108_v35 = vrot.slane %v1106_v39, 4 }
  0x9f   : > { %1863 = vst.msk [vmem:[#allocation2 + $0x40] sm:$0xff] %vm409_vm6, %v2869_v30  ;;  %v1694_v48 = vpop.permute.xlu0 %1693  ;;  %v1114_v40 = vrot.slane %v1112_v41, 5  ;;  %v1803_v50 = vrot.slane %v2848_v42, 5  ;;  %v1806_v51 = vrot.slane %v2849_v43, 5  ;;  %v2864_v55 = vrot.slane %v2850_v47, 9 }
  0xa0   : > { %1717 = vst.msk [vmem:[#allocation2 + $0x8] sm:$0xff] %vm939_vm9, %v1694_v48  ;;  %v1099_v24 = vor.u32 %v1098_v45, %v1095_v44  ;;  %v1810_v56 = vrot.slane %v2851_v52, 5  ;;  %v1109_v58 = vor.u32 %v1108_v35, %v1104_v46  ;;  %v1813_v61 = vrot.slane %v2852_v53, 5  ;;  %v2858_v17 = vld [vmem:[%s3270_s17 + $0x74] sm:$0x1] }
  0xa1   : > { %1864 = vst.msk [vmem:[#allocation2 + $0x58] sm:$0xff] %vm409_vm6, %v2870_v34  ;;  %v1804_v59 = vsel %vm3250_vm2, %v2863_v54, %v1803_v50  ;;  %v1805_v60 = vrot.slane %v1803_v50, 4  ;;  %v2865_v4 = vrot.slane %v2853_v57, 9  ;;  %v1817_v9 = vrot.slane %v2854_v62, 5  ;;  %v3129_v34 = vld [vmem:[%s4018_s1 + $0x88] sm:$0xff]  }
  0xa2   : > { %v1100_v49 = vrot.slane %v1099_v24, 4  ;;  %v1811_v0 = vsel %vm3250_vm2, %v2864_v55, %v1810_v56  ;;  %v1812_v3 = vrot.slane %v1810_v56, 4  ;;  %v1110_v7 = vrot.slane %v1109_v58, 4 }
  0xa3   : > { %v674_v6 = vpop.permute.xlu1 %673  ;;  %v1807_v8 = vsel %vm3250_vm2, %v1805_v60, %v1806_v51  ;;  %v1820_v12 = vrot.slane %v2855_v63, 5  ;;  %v2866_v18 = vrot.slane %v2856_v5, 9  ;;  %v1818_v21 = vsel %vm3250_vm2, %v2865_v4, %v1817_v9  ;;  %v1871_v60 = vld [vmem:[#allocation2 + $0x10] sm:$0xff] }
  0xa4   : > { %692 = vst.msk [vmem:[#allocation2 + $0x90] sm:$0xff] %vm685_vm7, %v674_v6  ;;  %v1105_v13 = vsel %vm3317_vm5, %v1100_v49, %v1104_v46  ;;  %v2871_v14 = vcombine.low %v1804_v59, %v1807_v8  ;;  %v1814_v15 = vsel %vm3250_vm2, %v1812_v3, %v1813_v61  ;;  %v1115_v19 = vsel %vm3317_vm5, %v1110_v7, %v1114_v40  ;;  %v1869_v1 = vld [vmem:[#allocation2] sm:$0xff] }
  0xa5   : > { %v2872_v20 = vcombine.low %v1811_v0, %v1814_v15  ;;  %v1819_v22 = vrot.slane %v1817_v9, 4  ;;  %v2736_v25 = vcombine.low %v1105_v13, %v1115_v19  ;;  %v1824_v11 = vrot.slane %v2857_v16, 5  ;;  %v3132_v46 = vld [vmem:[%s4018_s1 + $0x80] sm:$0xff]   ;;  %v1874_v3 = vld [vmem:[#allocation2 + $0x28] sm:$0xff] }
  0xa6   : > { %1865 = vst.msk [vmem:[#allocation2 + $0x70] sm:$0xff] %vm409_vm6, %v2871_v14  ;;  %v1827_v23 = vrot.slane %v2858_v17, 5  ;;  %v1877_v5 = vld [vmem:[#allocation2 + $0x40] sm:$0xff] }
  0xa7   : > { %v838_v26 = vpop.permute.xlu1 %837  ;;  %v1870_v27 = vld [vmem:[#allocation2 + $0x8] sm:$0xff]  ;;  %1866 = vst.msk [vmem:[#allocation2 + $0x88] sm:$0xff] %vm409_vm6, %v2872_v20  ;;  %v1821_v29 = vsel %vm3250_vm2, %v1819_v22, %v1820_v12  ;;  %1201 = vst.msk [vmem:[#allocation2 + $0x80] sm:$0xff] %vm409_vm6, %v2736_v25  ;;  %v1825_v31 = vsel %vm3250_vm2, %v2866_v18, %v1824_v11  ;;  %v1826_v32 = vrot.slane %v1824_v11, 4 }
  0xa8   : > { %v664_v10 = vpop.permute.xlu0 %663  ;;  %856 = vst.msk [vmem:[#allocation2 + $0x90] sm:$0xff] %vm849_vm8, %v838_v26  ;;  %2103 = vmatprep.mubr.bf16.mxu0 %v1870_v27  ;;  %v2873_v30 = vcombine.low %v1818_v21, %v1821_v29  ;;  %v1880_v12 = vld [vmem:[#allocation2 + $0x58] sm:$0xff] }
  0xa9   : > { %687 = vst.msk [vmem:[#allocation2 + $0x18] sm:$0xff] %vm685_vm7, %v664_v10  ;;  %2104 = vmatmul.mubr.bf16.vlgmr.msra.gmra.mrb[0].mxu0 %v1869_v1  ;;  %v1828_v33 = vsel %vm3250_vm2, %v1826_v32, %v1827_v23 }
  0xaa   : > { %1867 = vst.msk [vmem:[#allocation2 + $0xa0] sm:$0xff] %vm409_vm6, %v2873_v30  ;;  %v2874_v37 = vcombine.low %v1825_v31, %v1828_v33 }
  0xac   : > { %v828_v36 = vpop.permute.xlu0 %827  ;;  %1868 = vst.msk [vmem:[#allocation2 + $0xb8] sm:$0xff] %vm409_vm6, %v2874_v37 }
  0xad   : > { %851 = vst.msk [vmem:[#allocation2 + $0x18] sm:$0xff] %vm849_vm8, %v828_v36  ;;  %v1883_v15 = vld [vmem:[#allocation2 + $0x70] sm:$0xff] }
  0xae   : > { %v1886_v19 = vld [vmem:[#allocation2 + $0x88] sm:$0xff] }
  0xb0   : > { %v1706_v38 = vpop.permute.xlu1 %1705 }
  0xb1   : > { %1723 = vst.msk [vmem:[#allocation2 + $0x98] sm:$0xff] %vm939_vm9, %v1706_v38  ;;  %v1889_v21 = vld [vmem:[#allocation2 + $0xa0] sm:$0xff] }
  0xb3   : > { %v1696_v39 = vpop.permute.xlu0 %1695  ;;  %v1892_v26 = vld [vmem:[#allocation2 + $0xb8] sm:$0xff] }
  0xb4   : > { %1718 = vst.msk [vmem:[#allocation2 + $0x20] sm:$0xff] %vm939_vm9, %v1696_v39  ;;  %v928_v28 = vpop.permute.xlu1 %927 }
  0xb5   : > { %946 = vst.msk [vmem:[#allocation2 + $0x90] sm:$0xff] %vm939_vm9, %v928_v28 }
  0xb7   : > { %v918_v41 = vpop.permute.xlu0 %917 }
  0xb8   : > { %941 = vst.msk [vmem:[#allocation2 + $0x18] sm:$0xff] %vm939_vm9, %v918_v41  ;;  %v1347_v2 = vpop.permute.xlu1 %1346  ;;  %v1888_v42 = vld [vmem:[#allocation2 + $0x98] sm:$0xff] }
  0xb9   : > { %1363 = vst.msk [vmem:[#allocation2 + $0xb0] sm:$0xff] %vm685_vm7, %v1347_v2  ;;  %2151 = vmatprep.mubr.bf16.mxu1 %v1888_v42 }
  0xbb   : > { %v1337_v43 = vpop.permute.xlu0 %1336  ;;  %v1873_v54 = vld [vmem:[#allocation2 + $0x20] sm:$0xff] }
  0xbc   : > { %1358 = vst.msk [vmem:[#allocation2 + $0x38] sm:$0xff] %vm685_vm7, %v1337_v43  ;;  %2111 = vmatprep.mubr.bf16.mxu0 %v1873_v54  ;;  %v1887_v45 = vld [vmem:[#allocation2 + $0x90] sm:$0xff] }
  0xbd   : > { %v676_v44 = vpop.permute.xlu1 %675  ;;  %2152 = vmatmul.mubr.bf16.vlgmr.msra.gmra.mrb[0].mxu1 %v1887_v45 }
  0xbe   : > { %693 = vst.msk [vmem:[#allocation2 + $0xa8] sm:$0xff] %vm685_vm7, %v676_v44  ;;  %3011 = vmatpush3.bf16.msra.mxu1 %v3132_v46 }
  0xbf   : > { %v666_v47 = vpop.permute.xlu0 %665  ;;  %v1872_v48 = vld [vmem:[#allocation2 + $0x18] sm:$0xff]  ;;  %3012 = vmatprep.subr.bf16.mxu1 %v3129_v34 }
  0xc0   : > { %688 = vst.msk [vmem:[#allocation2 + $0x30] sm:$0xff] %vm685_vm7, %v666_v47  ;;  %2112 = vmatmul.mubr.bf16.gmra.mrb[4].mxu0 %v1872_v48 }
  0xc1   : > { %v1436_v35 = vpop.permute.xlu1 %1435 }
  0xc2   : > { %1452 = vst.msk [vmem:[#allocation2 + $0xb0] sm:$0xff] %vm849_vm8, %v1436_v35  ;;  %3013 = vmatpush3.bf16.msra.mxu1 %v3129_v34 }
  0xc3   : > { %v1426_v40 = vpop.permute.xlu0 %1425 }
  0xc4   : > { %1447 = vst.msk [vmem:[#allocation2 + $0x38] sm:$0xff] %vm849_vm8, %v1426_v40 }
  0xc5   : > { %v840_v50 = vpop.permute.xlu1 %839 }
  0xc6   : > { %857 = vst.msk [vmem:[#allocation2 + $0xa8] sm:$0xff] %vm849_vm8, %v840_v50 }
  0xc7   : > { %v830_v51 = vpop.permute.xlu0 %829 }
  0xc8   : > { %852 = vst.msk [vmem:[#allocation2 + $0x30] sm:$0xff] %vm849_vm8, %v830_v51 }
  0xc9   : > { %v1708_v52 = vpop.permute.xlu1 %1707 }
  0xca   : > { %1724 = vst.msk [vmem:[#allocation2 + $0xb0] sm:$0xff] %vm939_vm9, %v1708_v52 }
  0xcb   : > { %v1698_v24 = vpop.permute.xlu0 %1697 }
  0xcc   : > { %1719 = vst.msk [vmem:[#allocation2 + $0x38] sm:$0xff] %vm939_vm9, %v1698_v24 }
  0xcd   : > { %v930_v53 = vpop.permute.xlu1 %929 }
  0xce   : > { %947 = vst.msk [vmem:[#allocation2 + $0xa8] sm:$0xff] %vm939_vm9, %v930_v53 }
  0xcf   : > { %v920_v55 = vpop.permute.xlu0 %919 }
  0xd0   : > { %942 = vst.msk [vmem:[#allocation2 + $0x30] sm:$0xff] %vm939_vm9, %v920_v55 }
  0xd1   : > { %v1891_v56 = vld [vmem:[#allocation2 + $0xb0] sm:$0xff] }
  0xd2   : > { %2159 = vmatprep.mubr.bf16.mxu1 %v1891_v56  ;;  %v668_v57 = vpop.permute.xlu1 %667  ;;  %v3883_v56 = vld [vmem:[%s4019_s2] ss:$0 sm:$0xff] }
  0xd3   : > { %v1339_v58 = vpop.permute.xlu0 %1338  ;;  %689 = vst.msk [vmem:[#allocation2 + $0x48] sm:$0xff] %vm685_vm7, %v668_v57  ;;  %v1876_v59 = vld [vmem:[#allocation2 + $0x38] sm:$0xff] }
  0xd4   : > { %1359 = vst.msk [vmem:[#allocation2 + $0x50] sm:$0xff] %vm685_vm7, %v1339_v58  ;;  %2119 = vmatprep.mubr.bf16.mxu0 %v1876_v59 }
  0xd5   : > { %v1890_v61 = vld [vmem:[#allocation2 + $0xa8] sm:$0xff] }
  0xd6   : > { %2160 = vmatmul.mubr.bf16.gmra.mrb[4].mxu1 %v1890_v61  ;;  %v832_v62 = vpop.permute.xlu1 %831 }
  0xd7   : > { %3014 = vmatprep.mubr.msk.bf16.mxu1 %vm409_vm6, %v1871_v60  ;;  %v1428_v63 = vpop.permute.xlu0 %1427  ;;  %853 = vst.msk [vmem:[#allocation2 + $0x48] sm:$0xff] %vm849_vm8, %v832_v62  ;;  %v1875_v49 = vld [vmem:[#allocation2 + $0x30] sm:$0xff] }
  0xd8   : > { %1448 = vst.msk [vmem:[#allocation2 + $0x50] sm:$0xff] %vm849_vm8, %v1428_v63  ;;  %2120 = vmatmul.mubr.bf16.gmra.mrb[8].mxu0 %v1875_v49 }
  0xda   : > { %v922_v0 = vpop.permute.xlu1 %921 }
  0xdb   : > { %v1700_v4 = vpop.permute.xlu0 %1699  ;;  %943 = vst.msk [vmem:[#allocation2 + $0x48] sm:$0xff] %vm939_vm9, %v922_v0 }
  0xdc   : > { %1720 = vst.msk [vmem:[#allocation2 + $0x50] sm:$0xff] %vm939_vm9, %v1700_v4 }
  0xde   : > { %3015 = vmatmul.mubr.msk.bf16.vlgmr.msra.gmra.mrb[8].mxu1 %vm409_vm6, %v1874_v3  ;;  %v670_v6 = vpop.permute.xlu1 %669 }
  0xdf   : > { %3018 = vmatprep.mubr.msk.bf16.mxu1 %vm409_vm6, %v1877_v5  ;;  %v1341_v7 = vpop.permute.xlu0 %1340  ;;  %690 = vst.msk [vmem:[#allocation2 + $0x60] sm:$0xff] %vm685_vm7, %v670_v6 }
  0xe0   : > { %1360 = vst.msk [vmem:[#allocation2 + $0x68] sm:$0xff] %vm685_vm7, %v1341_v7 }
  0xe2   : > { %v834_v8 = vpop.permute.xlu1 %833  ;;  %v1878_v9 = vld [vmem:[#allocation2 + $0x48] sm:$0xff] }
  0xe3   : > { %v1430_v13 = vpop.permute.xlu0 %1429  ;;  %854 = vst.msk [vmem:[#allocation2 + $0x60] sm:$0xff] %vm849_vm8, %v834_v8  ;;  %v1879_v14 = vld [vmem:[#allocation2 + $0x50] sm:$0xff] }
  0xe4   : > { %1449 = vst.msk [vmem:[#allocation2 + $0x68] sm:$0xff] %vm849_vm8, %v1430_v13  ;;  %2127 = vmatprep.mubr.bf16.mxu0 %v1879_v14 }
  0xe5   : > { %2128 = vmatmul.mubr.bf16.gmra.mrb[12].mxu0 %v1878_v9 }
  0xe6   : > { %3019 = vmatmul.mubr.msk.bf16.gmra.mrb[12].mxu1 %vm409_vm6, %v1880_v12  ;;  %v924_v16 = vpop.permute.xlu1 %923 }
  0xe7   : > { %3022 = vmatprep.mubr.msk.bf16.mxu1 %vm409_vm6, %v1883_v15  ;;  %v1702_v17 = vpop.permute.xlu0 %1701  ;;  %944 = vst.msk [vmem:[#allocation2 + $0x60] sm:$0xff] %vm939_vm9, %v924_v16 }
  0xe8   : > { %1721 = vst.msk [vmem:[#allocation2 + $0x68] sm:$0xff] %vm939_vm9, %v1702_v17 }
  0xea   : > { %v672_v18 = vpop.permute.xlu1 %671 }
  0xeb   : > { %v1343_v20 = vpop.permute.xlu0 %1342  ;;  %691 = vst.msk [vmem:[#allocation2 + $0x78] sm:$0xff] %vm685_vm7, %v672_v18 }
  0xec   : > { %1361 = vst.msk [vmem:[#allocation2 + $0x80] sm:$0xff] %vm685_vm7, %v1343_v20 }
  0xee   : > { %3023 = vmatmul.mubr.msk.bf16.gmra.mrb[16].mxu1 %vm409_vm6, %v1886_v19  ;;  %v836_v22 = vpop.permute.xlu1 %835  ;;  %v1881_v25 = vld [vmem:[#allocation2 + $0x60] sm:$0xff] }
  0xef   : > { %3026 = vmatprep.mubr.msk.bf16.mxu1 %vm409_vm6, %v1889_v21  ;;  %v1432_v11 = vpop.permute.xlu0 %1431  ;;  %855 = vst.msk [vmem:[#allocation2 + $0x78] sm:$0xff] %vm849_vm8, %v836_v22  ;;  %v1882_v23 = vld [vmem:[#allocation2 + $0x68] sm:$0xff] }
  0xf0   : > { %1450 = vst.msk [vmem:[#allocation2 + $0x80] sm:$0xff] %vm849_vm8, %v1432_v11  ;;  %2135 = vmatprep.mubr.bf16.mxu0 %v1882_v23 }
  0xf1   : > { %2136 = vmatmul.mubr.bf16.gmra.mrb[16].mxu0 %v1881_v25 }
  0xf2   : > { %v926_v10 = vpop.permute.xlu1 %925 }
  0xf3   : > { %v1704_v27 = vpop.permute.xlu0 %1703  ;;  %945 = vst.msk [vmem:[#allocation2 + $0x78] sm:$0xff] %vm939_vm9, %v926_v10 }
  0xf4   : > { %1722 = vst.msk [vmem:[#allocation2 + $0x80] sm:$0xff] %vm939_vm9, %v1704_v27 }
  0xf6   : > { %3027 = vmatmul.mubr.msk.bf16.gmra.mrb[20].mxu1 %vm409_vm6, %v1892_v26 }
  0xfa   : > { %v1884_v29 = vld [vmem:[#allocation2 + $0x78] sm:$0xff] }
  0xfb   : > { %v1885_v1 = vld [vmem:[#allocation2 + $0x80] sm:$0xff] }
  0xfc   : > { %2143 = vmatprep.mubr.bf16.mxu0 %v1885_v1 }
  0xfd   : > { %2144 = vmatmul.mubr.bf16.gmra.mrb[20].mxu0 %v1884_v29 }
 0x17c   : > { %v2952_v30 = vpop.f32.mrb[0].mxu0 }
 0x17d   : > { %v2953_v31 = vpop.f32.mrb[1].mxu0 }
 0x17e   : > { %v2954_v32 = vadd.f32 %v2953_v31, %v2952_v30  ;;  %v2955_v33 = vpop.f32.mrb[2].mxu0 }
 0x17f   : > { %v2956_v36 = vpop.f32.mrb[3].mxu0 }
 0x180   : > { %v2957_v37 = vadd.f32 %v2956_v36, %v2955_v33  ;;  %v2106_v61 = vadd.f32 %v2954_v32, %v3883_v56 }
 0x182   : > { %v2109_v4 = vadd.f32 %v2957_v37, %v3883_v56 }
 0x190   : > { %v2988_v38 = vpop.f32.mrb[0].mxu1 }
 0x191   : > { %v2989_v39 = vpop.f32.mrb[1].mxu1 }
 0x192   : > { %v3869_v28 = vadd.f32 %v2989_v39, %v2988_v38  ;;  %v2991_v41 = vpop.f32.mrb[2].mxu1 }
 0x193   : > { %v2958_v2 = vpop.f32.mrb[4].mxu0  ;;  %v2992_v42 = vpop.f32.mrb[3].mxu1 }
 0x194   : > { %v2959_v43 = vpop.f32.mrb[5].mxu0  ;;  %v3871_v54 = vadd.f32 %v2992_v42, %v2991_v41 }
 0x195   : > { %v2960_v34 = vadd.f32 %v2959_v43, %v2958_v2  ;;  %v2961_v44 = vpop.f32.mrb[6].mxu0 }
 0x196   : > { %v2962_v45 = vpop.f32.mrb[7].mxu0 }
 0x197   : > { %v2963_v46 = vadd.f32 %v2962_v45, %v2961_v44  ;;  %v2114_v59 = vadd.f32 %v2960_v34, %v3883_v56 }
 0x199   : > { %v2117_v49 = vadd.f32 %v2963_v46, %v3883_v56 }
 0x1a9   : > { %v2994_v47 = vpop.f32.mrb[4].mxu1 }
 0x1aa   : > { %v2995_v48 = vpop.f32.mrb[5].mxu1 }
 0x1ab   : > { %v3876_v35 = vadd.f32 %v2995_v48, %v2994_v47  ;;  %v2997_v40 = vpop.f32.mrb[6].mxu1  ;;  %v2964_v50 = vpop.f32.mrb[8].mxu0 }
 0x1ac   : > { %v2998_v51 = vpop.f32.mrb[7].mxu1  ;;  %v2965_v52 = vpop.f32.mrb[9].mxu0 }
 0x1ad   : > { %v3878_v24 = vadd.f32 %v2998_v51, %v2997_v40  ;;  %v2966_v53 = vadd.f32 %v2965_v52, %v2964_v50  ;;  %v2967_v55 = vpop.f32.mrb[10].mxu0 }
 0x1ae   : > { %v2968_v57 = vpop.f32.mrb[11].mxu0 }
 0x1af   : > { %v2969_v58 = vadd.f32 %v2968_v57, %v2967_v55  ;;  %v2122_v10 = vadd.f32 %v2966_v53, %v3883_v56 }
 0x1b1   : > { %v3016_v60 = vpop.f32.mrb[8].mxu1  ;;  %v2125_v42 = vadd.f32 %v2969_v58, %v3883_v56 }
 0x1b2   : > { %v2211_v62 = vadd.f32 %v3016_v60, %v2114_v59  ;;  %v2202_v63 = vpop.f32.mrb[9].mxu1 }
 0x1b3   : > { %v2203_v0 = vadd.f32 %v2202_v63, %v2106_v61  ;;  %v3017_v3 = vpop.f32.mrb[10].mxu1 }
 0x1b4   : > { %v2922_v5 = vpack.c.bf16 %v2211_v62, %v2211_v62  ;;  %v2214_v6 = vadd.f32 %v3017_v3, %v2117_v49  ;;  %v2205_v7 = vpop.f32.mrb[11].mxu1  ;;  %v2306_v13 = vmul.f32 %v2211_v62, %v2211_v62  ;;  %v2268_v21 = vsel %vm409_vm6, %v2211_v62, 0.0 }
 0x1b5   : > { %v2304_v8 = vmul.f32 %v2203_v0, %v2203_v0  ;;  %v2920_v9 = vpack.c.bf16 %v2203_v0, %v2203_v0  ;;  %v2206_v12 = vadd.f32 %v2205_v7, %v2109_v4  ;;  %v2265_v15 = vsel %vm409_vm6, %v2203_v0, 0.0 }
 0x1b6   : > { %2425 = vst.msk [vmem:[%s3891_s6 + $0x8] sm:$0xf] %vm2422_vm10, %v2922_v5  ;;  %v2923_v14 = vpack.c.bf16 %v2214_v6, %v2214_v6  ;;  %v2307_v19 = vmul.f32 %v2214_v6, %v2214_v6  ;;  %v2323_v30 = vsel %vm409_vm6, %v2306_v13, 0.0  ;;  %v2270_v31 = vsel %vm409_vm6, %v2214_v6, 0.0 }
 0x1b7   : > { %2423 = vst.msk [vmem:[%s3891_s6] sm:$0xf] %vm2422_vm10, %v2920_v9  ;;  %v2266_v16 = vsel %vm409_vm6, %v2206_v12, 0.0  ;;  %v2305_v17 = vmul.f32 %v2206_v12, %v2206_v12  ;;  %v2921_v18 = vpack.c.bf16 %v2206_v12, %v2206_v12  ;;  %v2320_v22 = vsel %vm409_vm6, %v2304_v8, 0.0 }
 0x1b8   : > { %2426 = vst.msk [vmem:[%s3891_s6 + $0xc] sm:$0xf] %vm2422_vm10, %v2923_v14  ;;  %v2267_v20 = vadd.f32 %v2266_v16, %v2265_v15  ;;  %v2970_v11 = vpop.f32.mrb[12].mxu0  ;;  %v2325_v38 = vsel %vm409_vm6, %v2307_v19, 0.0 }
 0x1b9   : > { %v2321_v25 = vsel %vm409_vm6, %v2305_v17, 0.0  ;;  %2424 = vst.msk [vmem:[%s3891_s6 + $0x4] sm:$0xf] %vm2422_vm10, %v2921_v18  ;;  %v3020_v23 = vpop.f32.mrb[12].mxu1  ;;  %v2971_v29 = vpop.f32.mrb[13].mxu0 }
 0x1ba   : > { %v2269_v26 = vadd.f32 %v2268_v21, %v2267_v20  ;;  %v2322_v27 = vadd.f32 %v2321_v25, %v2320_v22  ;;  %v2218_v1 = vpop.f32.mrb[13].mxu1  ;;  %v2972_v32 = vadd.f32 %v2971_v29, %v2970_v11  ;;  %v2973_v33 = vpop.f32.mrb[14].mxu0  ;;  %v2162_v11 = vadd.f32 %v3876_v35, %v3883_v56 }
 0x1bb   : > { %v2219_v36 = vadd.f32 %v2218_v1, %v2122_v10  ;;  %v3021_v37 = vpop.f32.mrb[14].mxu1  ;;  %v2974_v41 = vpop.f32.mrb[15].mxu0 }
 0x1bc   : > { %v2324_v39 = vadd.f32 %v2323_v30, %v2322_v27  ;;  %v2271_v2 = vadd.f32 %v2270_v31, %v2269_v26  ;;  %v2221_v43 = vpop.f32.mrb[15].mxu1  ;;  %v2130_v34 = vadd.f32 %v2972_v32, %v3883_v56  ;;  %v2975_v44 = vadd.f32 %v2974_v41, %v2973_v33 }
 0x1bd   : > { %v2272_v45 = vsel %vm409_vm6, %v2219_v36, 0.0  ;;  %v2308_v46 = vmul.f32 %v2219_v36, %v2219_v36  ;;  %v2924_v40 = vpack.c.bf16 %v2219_v36, %v2219_v36  ;;  %v2222_v50 = vadd.f32 %v2221_v43, %v2125_v42 }
 0x1be   : > { %v2273_v47 = vadd.f32 %v2272_v45, %v2271_v2  ;;  %v2326_v48 = vadd.f32 %v2325_v38, %v2324_v39  ;;  %v2227_v51 = vadd.f32 %v3020_v23, %v2130_v34  ;;  %v2133_v53 = vadd.f32 %v2975_v44, %v3883_v56 }
 0x1bf   : > { %v2327_v52 = vsel %vm409_vm6, %v2308_v46, 0.0  ;;  %2427 = vst.msk [vmem:[%s3891_s6 + $0x10] sm:$0xf] %vm2422_vm10, %v2924_v40  ;;  %v2274_v57 = vsel %vm409_vm6, %v2222_v50, 0.0  ;;  %v2309_v58 = vmul.f32 %v2222_v50, %v2222_v50  ;;  %v2925_v59 = vpack.c.bf16 %v2222_v50, %v2222_v50 }
 0x1c0   : > { %v2328_v55 = vadd.f32 %v2327_v52, %v2326_v48  ;;  %v2276_v60 = vsel %vm409_vm6, %v2227_v51, 0.0  ;;  %v2310_v61 = vmul.f32 %v2227_v51, %v2227_v51  ;;  %v2926_v62 = vpack.c.bf16 %v2227_v51, %v2227_v51 }
 0x1c1   : > { %v2230_v63 = vadd.f32 %v3021_v37, %v2133_v53  ;;  %v3920_v49 = vpop.f32.mrb[16].mxu1  ;;  %v2275_v0 = vadd.f32 %v2274_v57, %v2273_v47  ;;  %v2329_v3 = vsel %vm409_vm6, %v2309_v58, 0.0  ;;  %2428 = vst.msk [vmem:[%s3891_s6 + $0x14] sm:$0xf] %vm2422_vm10, %v2925_v59  ;;  %v2154_v27 = vadd.f32 %v3869_v28, %v3883_v56 }
 0x1c2   : > { %v2234_v4 = vpop.f32.mrb[17].mxu1  ;;  %v2331_v5 = vsel %vm409_vm6, %v2310_v61, 0.0  ;;  %2429 = vst.msk [vmem:[%s3891_s6 + $0x18] sm:$0xf] %vm2422_vm10, %v2926_v62  ;;  %v2330_v13 = vadd.f32 %v2329_v3, %v2328_v55  ;;  %v2165_v30 = vadd.f32 %v3878_v24, %v3883_v56  ;;  %v2157_v48 = vadd.f32 %v3871_v54, %v3883_v56 }
 0x1c3   : > { %v2278_v6 = vsel %vm409_vm6, %v2230_v63, 0.0  ;;  %v2311_v7 = vmul.f32 %v2230_v63, %v2230_v63  ;;  %v2927_v8 = vpack.c.bf16 %v2230_v63, %v2230_v63  ;;  %v3929_v9 = vpop.f32.mrb[18].mxu1  ;;  %v2277_v12 = vadd.f32 %v2276_v60, %v2275_v0 }
 0x1c4   : > { %v2237_v14 = vpop.f32.mrb[19].mxu1  ;;  %v2976_v16 = vpop.f32.mrb[16].mxu0  ;;  %v2332_v17 = vadd.f32 %v2331_v5, %v2330_v13 }
 0x1c5   : > { %v2333_v15 = vsel %vm409_vm6, %v2311_v7, 0.0  ;;  %2430 = vst.msk [vmem:[%s3891_s6 + $0x1c] sm:$0xf] %vm2422_vm10, %v2927_v8  ;;  %v2977_v18 = vpop.f32.mrb[17].mxu0  ;;  %v2279_v19 = vadd.f32 %v2278_v6, %v2277_v12 }
 0x1c6   : > { %v2978_v20 = vadd.f32 %v2977_v18, %v2976_v16  ;;  %v2979_v21 = vpop.f32.mrb[18].mxu0  ;;  %v2334_v25 = vadd.f32 %v2333_v15, %v2332_v17 }
 0x1c7   : > { %v2980_v22 = vpop.f32.mrb[19].mxu0 }
 0x1c8   : > { %v2981_v23 = vadd.f32 %v2980_v22, %v2979_v21  ;;  %v2138_v10 = vadd.f32 %v2978_v20, %v3883_v56 }
 0x1c9   : > { %v3028_v26 = vpop.f32.mrb[20].mxu1 }
 0x1ca   : > { %v3939_v29 = vadd.f32 %v3028_v26, %v2162_v11  ;;  %v2250_v1 = vpop.f32.mrb[21].mxu1  ;;  %v2235_v31 = vadd.f32 %v2234_v4, %v2138_v10  ;;  %v2141_v32 = vadd.f32 %v2981_v23, %v3883_v56 }
 0x1cb   : > { %v2251_v33 = vadd.f32 %v2250_v1, %v2154_v27  ;;  %v3029_v35 = vpop.f32.mrb[22].mxu1 }
 0x1cc   : > { %v2934_v36 = vpack.c.bf16 %v3939_v29, %v3939_v29  ;;  %v3946_v37 = vadd.f32 %v3029_v35, %v2165_v30  ;;  %v2253_v38 = vpop.f32.mrb[23].mxu1  ;;  %v2280_v28 = vsel %vm409_vm6, %v2235_v31, 0.0  ;;  %v2312_v39 = vmul.f32 %v2235_v31, %v2235_v31 }
 0x1cd   : > { %v2928_v41 = vpack.c.bf16 %v2235_v31, %v2235_v31  ;;  %v2238_v2 = vadd.f32 %v2237_v14, %v2141_v32  ;;  %v2281_v42 = vadd.f32 %v2280_v28, %v2279_v19  ;;  %v2932_v47 = vpack.c.bf16 %v2251_v33, %v2251_v33 }
 0x1ce   : > { %2437 = vst.msk [vmem:[%s3891_s6 + $0x38] sm:$0xf] %vm2422_vm10, %v2934_v36  ;;  %v2335_v24 = vsel %vm409_vm6, %v2312_v39, 0.0  ;;  %v2935_v50 = vpack.c.bf16 %v3946_v37, %v3946_v37  ;;  %v2254_v53 = vadd.f32 %v2253_v38, %v2157_v48  ;;  %v2316_v6 = vmul.f32 %v2251_v33, %v2251_v33 }
 0x1cf   : > { %2431 = vst.msk [vmem:[%s3891_s6 + $0x20] sm:$0xf] %vm2422_vm10, %v2928_v41  ;;  %v2282_v43 = vsel %vm409_vm6, %v2238_v2, 0.0  ;;  %v2313_v34 = vmul.f32 %v2238_v2, %v2238_v2  ;;  %v2929_v44 = vpack.c.bf16 %v2238_v2, %v2238_v2  ;;  %v2336_v45 = vadd.f32 %v2335_v24, %v2334_v25  ;;  %2435 = vst.msk [vmem:[%s3891_s6 + $0x30] sm:$0xf] %vm2422_vm10, %v2932_v47 }
 0x1d0   : > { %v2283_v46 = vadd.f32 %v2282_v43, %v2281_v42  ;;  %v2982_v51 = vpop.f32.mrb[20].mxu0  ;;  %2438 = vst.msk [vmem:[%s3891_s6 + $0x3c] sm:$0xf] %vm2422_vm10, %v2935_v50  ;;  %v2933_v54 = vpack.c.bf16 %v2254_v53, %v2254_v53  ;;  %v2317_v16 = vmul.f32 %v2254_v53, %v2254_v53  ;;  %v2318_v19 = vmul.f32 %v3939_v29, %v3939_v29 }
 0x1d1   : > { %v2337_v40 = vsel %vm409_vm6, %v2313_v34, 0.0  ;;  %2432 = vst.msk [vmem:[%s3891_s6 + $0x24] sm:$0xf] %vm2422_vm10, %v2929_v44  ;;  %v2983_v55 = vpop.f32.mrb[21].mxu0  ;;  %v2343_v20 = vsel %vm409_vm6, %v2316_v6, 0.0  ;;  %v2290_v21 = vsel %vm409_vm6, %v2254_v53, 0.0  ;;  %v2319_v23 = vmul.f32 %v3946_v37, %v3946_v37 }
 0x1d2   : > { %v2338_v52 = vadd.f32 %v2337_v40, %v2336_v45  ;;  %v2984_v57 = vadd.f32 %v2983_v55, %v2982_v51  ;;  %v2985_v58 = vpop.f32.mrb[22].mxu0  ;;  %2436 = vst.msk [vmem:[%s3891_s6 + $0x34] sm:$0xf] %vm2422_vm10, %v2933_v54  ;;  %v2292_v11 = vsel %vm409_vm6, %v3939_v29, 0.0  ;;  %v2345_v10 = vsel %vm409_vm6, %v2317_v16, 0.0 }
 0x1d3   : > { %v2986_v59 = vpop.f32.mrb[23].mxu0  ;;  %v2347_v1 = vsel %vm409_vm6, %v2318_v19, 0.0  ;;  %v2294_v30 = vsel %vm409_vm6, %v3946_v37, 0.0 }
 0x1d4   : > { %v2146_v60 = vadd.f32 %v2984_v57, %v3883_v56  ;;  %v2987_v61 = vadd.f32 %v2986_v59, %v2985_v58 }
 0x1d6   : > { %v2243_v62 = vadd.f32 %v3920_v49, %v2146_v60  ;;  %v2149_v63 = vadd.f32 %v2987_v61, %v3883_v56  ;;  %v2288_v56 = vsel %vm409_vm6, %v2251_v33, 0.0  ;;  %v2349_v33 = vsel %vm409_vm6, %v2319_v23, 0.0 }
 0x1d8   : > { %v2284_v0 = vsel %vm409_vm6, %v2243_v62, 0.0  ;;  %v2314_v3 = vmul.f32 %v2243_v62, %v2243_v62  ;;  %v2930_v4 = vpack.c.bf16 %v2243_v62, %v2243_v62  ;;  %v2246_v5 = vadd.f32 %v3929_v9, %v2149_v63 }
 0x1d9   : > { %v2285_v7 = vadd.f32 %v2284_v0, %v2283_v46 }
 0x1da   : > { %v2339_v8 = vsel %vm409_vm6, %v2314_v3, 0.0  ;;  %2433 = vst.msk [vmem:[%s3891_s6 + $0x28] sm:$0xf] %vm2422_vm10, %v2930_v4  ;;  %v2286_v12 = vsel %vm409_vm6, %v2246_v5, 0.0  ;;  %v2315_v13 = vmul.f32 %v2246_v5, %v2246_v5  ;;  %v2931_v14 = vpack.c.bf16 %v2246_v5, %v2246_v5 }
 0x1db   : > { %v2340_v49 = vadd.f32 %v2339_v8, %v2338_v52  ;;  %v2287_v15 = vadd.f32 %v2286_v12, %v2285_v7 }
 0x1dc   : > { %v2341_v17 = vsel %vm409_vm6, %v2315_v13, 0.0  ;;  %2434 = vst.msk [vmem:[%s3891_s6 + $0x2c] sm:$0xf] %vm2422_vm10, %v2931_v14 }
 0x1dd   : > { %v2289_v9 = vadd.f32 %v2288_v56, %v2287_v15  ;;  %v2342_v18 = vadd.f32 %v2341_v17, %v2340_v49 }
 0x1df   : > { %v2291_v22 = vadd.f32 %v2290_v21, %v2289_v9  ;;  %v2344_v25 = vadd.f32 %v2343_v20, %v2342_v18 }
 0x1e1   : > { %v2293_v26 = vadd.f32 %v2292_v11, %v2291_v22  ;;  %v2346_v27 = vadd.f32 %v2345_v10, %v2344_v25 }
 0x1e3   : > { %v2295_v31 = vadd.f32 %v2294_v30, %v2293_v26  ;;  %v2348_v32 = vadd.f32 %v2347_v1, %v2346_v27 }
 0x1e5   : > { %v2296_v35 = vrot.slane %v2295_v31, 4  ;;  %v2350_v29 = vadd.f32 %v2349_v33, %v2348_v32 }
 0x1e7   : > { %v2297_v36 = vadd.f32 %v2296_v35, %v2295_v31  ;;  %v2351_v38 = vrot.slane %v2350_v29, 4 }
 0x1e9   : > { %v2298_v28 = vrot.slane %v2297_v36, 2  ;;  %v2352_v39 = vadd.f32 %v2351_v38, %v2350_v29 }
 0x1eb   : > { %v2299_v41 = vadd.f32 %v2298_v28, %v2297_v36  ;;  %v2353_v2 = vrot.slane %v2352_v39, 2 }
 0x1ed   : > { %v2300_v42 = vrot.slane %v2299_v41, 1  ;;  %v2354_v24 = vadd.f32 %v2353_v2, %v2352_v39 }
 0x1ef   : > { %v2301_v37 = vadd.f32 %v2300_v42, %v2299_v41  ;;  %v2355_v43 = vrot.slane %v2354_v24, 1 }
 0x1f1   : > { %2303 = vst.msk [vmem:[%s331_s9] sm:$0x1] %vm2302_vm11, %v2301_v37  ;;  %v2356_v34 = vadd.f32 %v2355_v43, %v2354_v24 }
 0x1f3   : > { %2357 = vst.msk [vmem:[%s341_s12] sm:$0x1] %vm2302_vm11, %v2356_v34 }
 0x1f4 PF: > { %s16_s22 = sadd.s32 1, %s3171_s22   ;;  %s4027_s18 = smov %s3163_s20 }
 0x1f5   : > { %p13_p8 = scmp.ge.s32.totalorder %s16_s22, 6   ;;  %s4028_s19 = smov %s3167_s21 }
 0x1f6   : > { %s4029_s20 = smov %s4032_s23  ;;  %s4030_s21 = smov %s4036_s24 }
 0x1f7   :  { %15 = sbr.rel (!%p13_p8) target bundleno = 3 (0x3), region = 92 }

</bundles_post_ra>
